<compile_context>
chip_gen: v5e
topology: v5e:2x2
jax: 0.10.0
libtpu: 0.0.40
codegen_flags: <defaults>
</compile_context>

<pallas_src>
import functools

import jax
import jax.numpy as jnp
from jax.experimental import pallas as pl
from jax.experimental.pallas import tpu as pltpu


DEFAULT_BLOCK_BATCH = 128          # sweepable; v6e with a higher vmem limit can take 256
VMEM_LIMIT_BYTES = 48 * 1024 * 1024


def _round_up(x, m):
    return ((x + m - 1) // m) * m


# ---------------------------------------------------------------------------
# The single fused kernel
# ---------------------------------------------------------------------------
def _net_kernel(x_ref, w1_ref, b1_ref, w2_ref, b2_ref,
                fc1w_ref, fc1b_ref, fc2w_ref, fc2b_ref, out_ref, *, bt):
    # ---- conv1 (1->10, k=5) as 5 accumulated MXU matmuls -------------------
    # lhs rows = (h_out, n); rhs[di] is a (28, 240) banded matrix whose
    # columns are (c, w_out) and whose band applies the dj (width) taps.
    x = x_ref[...]                                          # (28, bt, 28) f32
    acc1 = None
    for di in range(5):
        lhs = x[di:di + 24].reshape(24 * bt, 28).astype(jnp.bfloat16)
        t = jnp.dot(lhs, w1_ref[di], preferred_element_type=jnp.float32)
        acc1 = t if acc1 is None else acc1 + t              # (24*bt, 240)

    # ---- conv1: 2x2 max-pool + bias + ReLU ----------------------------------
    # H-pool via a free leading-dim reshape; W-pool keeps pair-maxima at every
    # column (valid pooled values at even j) - the stride-2 selection is folded
    # into the conv2 banded weights, so no strided lane gathers are needed.
    hp = jnp.max(acc1.reshape(12, 2, bt, 240), axis=1)      # (12, bt, 240)
    q = jnp.maximum(hp[:, :, 0:239], hp[:, :, 1:240])       # (12, bt, 239)
    p1 = jnp.maximum(q + b1_ref[...], 0.0)                  # (12, bt, 239)

    # ---- conv2 (10->20, k=5) as 5 accumulated MXU matmuls -------------------
    # lhs for each di is the contiguous sublane slice p1[di:di+8]; rhs[di]
    # (239, 160) applies the dj taps AND the stride-2 pool column selection.
    acc2 = None
    for di in range(5):
        lhs = p1[di:di + 8].reshape(8 * bt, 239).astype(jnp.bfloat16)
        t = jnp.dot(lhs, w2_ref[di], preferred_element_type=jnp.float32)
        acc2 = t if acc2 is None else acc2 + t              # (8*bt, 160)
    y2 = acc2 + b2_ref[...]                                 # cols = w2*20 + co

    # ---- conv2: 2x2 max-pool + ReLU -----------------------------------------
    rr = jnp.max(y2.reshape(4, 2, bt, 160), axis=1)         # H-pool  (4, bt, 160)
    wq = jnp.maximum(rr[:, :, 0:140], rr[:, :, 20:160])     # W pair-max (4, bt, 140)
    p2 = jnp.maximum(wq, 0.0)

    # ---- fc1 (+ReLU) as 4 accumulated matmuls over the pooled-H index ------
    # The even-w2 pool selection and the PyTorch (co, h3, w3) flatten order
    # are folded into the packed (4, 140, 128) weights (outputs padded to 128).
    h = None
    for a in range(4):
        t = jnp.dot(p2[a], fc1w_ref[a], preferred_element_type=jnp.float32)
        h = t if h is None else h + t
    h = jnp.maximum(h + fc1b_ref[...], 0.0)                 # (bt, 128)
    # TODO(synk): dropout is identity here (inference mode, training=False).

    # ---- fc2 (padded to 128 lanes) + log_softmax ----------------------------
    logits = jnp.dot(h, fc2w_ref[...], preferred_element_type=jnp.float32)
    logits = logits + fc2b_ref[...]                         # pad lanes biased -1e30
    m = jnp.max(logits, axis=1, keepdims=True)
    z = logits - m
    lse = jnp.log(jnp.sum(jnp.exp(z), axis=1, keepdims=True))
    out_ref[...] = (z - lse).astype(out_ref.dtype)          # lane-dense (bt, 128)


# ---------------------------------------------------------------------------
# Wrapper: one-time weight packing + pallas_call
# ---------------------------------------------------------------------------
def _prep_weights(params):
    f32 = jnp.float32
    hi = jax.lax.Precision.HIGHEST

    # conv1 banded weights, one (28, 240) matrix per kernel row di.
    # w1band[di, w_in, c*24 + w_out] = W1[c, 0, di, w_in - w_out] (0 <= dj < 5)
    w1 = params["conv1_w"].astype(f32)[:, 0]                          # (10, 5, 5)
    w_in = jnp.arange(28)[:, None]
    w_out = jnp.arange(24)[None, :]
    dj = w_in - w_out                                                 # (28, 24)
    valid = ((dj >= 0) & (dj < 5)).astype(f32)
    g = w1[:, :, jnp.clip(dj, 0, 4)] * valid[None, None]              # (10,5,28,24)
    w1band = jnp.transpose(g, (1, 2, 0, 3)).reshape(5, 28, 240).astype(jnp.bfloat16)
    b1cols = jnp.repeat(params["conv1_b"].astype(f32), 24)[None, :239]  # (1, 239)

    # conv2 banded weights, one (239, 160) matrix per di; the pooled stride-2
    # column selection 2*(w2 + dj) is folded in.
    # w2band[di, ci*24 + 2*(w2+dj), w2*20 + co] = W2[co, ci, di, dj]
    w2 = params["conv2_w"].astype(f32)                                # (20,10,5,5)
    djv = jnp.arange(5)[:, None, None]
    jv = jnp.arange(24)[None, :, None]
    wv = jnp.arange(8)[None, None, :]
    sel = (jv == 2 * (wv + djv)).astype(f32)                          # (5, 24, 8)
    band2 = jnp.einsum("ocid,djw->icjwo", w2, sel, precision=hi)      # (5,10,24,8,20)
    w2band = band2.reshape(5, 240, 160)[:, :239, :].astype(jnp.bfloat16)
    b2cols = jnp.tile(params["conv2_b"].astype(f32), 8)[None, :]      # (1, 160)

    # fc1 weights packed as (4, 140, 128): fc1w[h3, 40*w3 + co, j] =
    # FC1[j, co*16 + h3*4 + w3]; odd-w2 rows and j >= 50 columns are zero.
    fc1 = params["fc1_w"].astype(f32).reshape(50, 20, 4, 4)           # (j,co,h3,w3)
    tmp = jnp.zeros((4, 4, 40, 128), f32)
    tmp = tmp.at[:, :, :20, :50].set(jnp.transpose(fc1, (2, 3, 1, 0)))
    fc1w = tmp.reshape(4, 160, 128)[:, :140, :]                       # (4, 140, 128)
    fc1b = jnp.zeros((1, 128), f32).at[0, :50].set(params["fc1_b"].astype(f32))

    # fc2 padded to 128 output lanes (zero weights, -1e30 bias -> exp == 0).
    fc2w = jnp.zeros((128, 128), f32).at[:50, :10].set(params["fc2_w"].astype(f32).T)
    fc2b = jnp.full((1, 128), -1e30, f32).at[0, :10].set(params["fc2_b"].astype(f32))
    return w1band, b1cols, w2band, b2cols, fc1w, fc1b, fc2w, fc2b


def net_forward(x_nchw, params, *, block_batch=DEFAULT_BLOCK_BATCH):
    assert block_batch % 8 == 0
    n = x_nchw.shape[0]
    assert x_nchw.shape[1:] == (1, 28, 28)

    # Shrink the batch tile for small batches; keep a multiple of 8 sublanes.
    bt = max(8, min(block_batch, _round_up(n, 8)))
    bt = (bt // 8) * 8
    n_pad = _round_up(n, bt)

    weights = _prep_weights(params)

    # (N,1,28,28) -> (28, N, 28) so the batch tile sits on the sublane dim and
    # the W axis (matmul contraction) sits on lanes.
    xt = jnp.transpose(x_nchw.astype(jnp.float32).reshape(n, 28, 28), (1, 0, 2))
    if n_pad != n:
        xt = jnp.pad(xt, ((0, 0), (0, n_pad - n), (0, 0)))

    vmem = pltpu.MemorySpace.VMEM
    out = pl.pallas_call(
        functools.partial(_net_kernel, bt=bt),
        out_shape=jax.ShapeDtypeStruct((n_pad, 128), jnp.float32),
        grid=(n_pad // bt,),
        in_specs=[
            pl.BlockSpec((28, bt, 28), lambda i: (0, i, 0)),                     # image tile
            pl.BlockSpec((5, 28, 240), lambda i: (0, 0, 0), memory_space=vmem),  # conv1 band
            pl.BlockSpec((1, 239), lambda i: (0, 0), memory_space=vmem),         # conv1 bias
            pl.BlockSpec((5, 239, 160), lambda i: (0, 0, 0), memory_space=vmem), # conv2 band
            pl.BlockSpec((1, 160), lambda i: (0, 0), memory_space=vmem),         # conv2 bias
            pl.BlockSpec((4, 140, 128), lambda i: (0, 0, 0), memory_space=vmem), # fc1 packed
            pl.BlockSpec((1, 128), lambda i: (0, 0), memory_space=vmem),         # fc1 bias
            pl.BlockSpec((128, 128), lambda i: (0, 0), memory_space=vmem),       # fc2 padded
            pl.BlockSpec((1, 128), lambda i: (0, 0), memory_space=vmem),         # fc2 bias
        ],
        out_specs=pl.BlockSpec((bt, 128), lambda i: (i, 0)),
        compiler_params=pltpu.CompilerParams(
            dimension_semantics=("parallel",),
            vmem_limit_bytes=VMEM_LIMIT_BYTES),
    )(xt, *weights)
    return out[:n, :10]


# ---------------------------------------------------------------------------
# Reference (plain JAX) and test harness
# ---------------------------------------------------------------------------
def _reference_forward(x_nchw, params):
    hi = jax.lax.Precision.HIGHEST
    x = x_nchw.astype(jnp.float32)

    def conv(x, w, b):
        y = jax.lax.conv_general_dilated(
            x, w, window_strides=(1, 1), padding="VALID",
            dimension_numbers=("NCHW", "OIHW", "NCHW"), precision=hi)
        return y + b[None, :, None, None]

    def pool_relu(x):
        y = jax.lax.reduce_window(x, -jnp.inf, jax.lax.max,
                                  (1, 1, 2, 2), (1, 1, 2, 2), "VALID")
        return jnp.maximum(y, 0.0)

    x = pool_relu(conv(x, params["conv1_w"], params["conv1_b"]))
    x = pool_relu(conv(x, params["conv2_w"], params["conv2_b"]))
    x = x.reshape(x.shape[0], 320)
    x = jnp.maximum(jnp.dot(x, params["fc1_w"].T, precision=hi) + params["fc1_b"], 0.0)
    x = jnp.dot(x, params["fc2_w"].T, precision=hi) + params["fc2_b"]
    return jax.nn.log_softmax(x, axis=1)


def init_params(key):
    ks = jax.random.split(key, 8)
    s = 0.1
    return {
        "conv1_w": s * jax.random.normal(ks[0], (10, 1, 5, 5), jnp.float32),
        "conv1_b": s * jax.random.normal(ks[1], (10,), jnp.float32),
        "conv2_w": s * jax.random.normal(ks[2], (20, 10, 5, 5), jnp.float32),
        "conv2_b": s * jax.random.normal(ks[3], (20,), jnp.float32),
        "fc1_w": s * jax.random.normal(ks[4], (50, 320), jnp.float32),
        "fc1_b": s * jax.random.normal(ks[5], (50,), jnp.float32),
        "fc2_w": s * jax.random.normal(ks[6], (10, 50), jnp.float32),
        "fc2_b": s * jax.random.normal(ks[7], (10,), jnp.float32),
    }


if __name__ == "__main__":
    key = jax.random.PRNGKey(0)
    pkey, xkey = jax.random.split(key)
    params = init_params(pkey)
    x = jax.random.normal(xkey, (2, 1, 28, 28), jnp.float32)

    out = jax.jit(net_forward)(x, params)
    out = jax.block_until_ready(out)

    assert out.shape == (2, 10)
    assert bool(jnp.all(jnp.isfinite(out)))
    # log_softmax rows must exponentiate-sum to 1
    assert jnp.allclose(jnp.sum(jnp.exp(out), axis=1), 1.0, atol=1e-4)
    # compare against a plain-JAX HIGHEST-precision reference (loose tol
    # covers the intentional bf16 MXU operands in the conv matmuls)
    ref = _reference_forward(x, params)
    assert jnp.allclose(out, ref, atol=5e-2, rtol=5e-2), float(jnp.max(jnp.abs(out - ref)))
    print("KERNEL_OK")
</pallas_src>

<mosaic_0001>
module attributes {stable_mosaic.version = 11 : i64} {
  func.func @_net_kernel(%arg0: i32, %arg1: memref<28x8x28xf32, #tpu.memory_space<vmem>>, %arg2: memref<5x28x240xbf16, #tpu.memory_space<vmem>>, %arg3: memref<1x239xf32, #tpu.memory_space<vmem>>, %arg4: memref<5x239x160xbf16, #tpu.memory_space<vmem>>, %arg5: memref<1x160xf32, #tpu.memory_space<vmem>>, %arg6: memref<4x140x128xf32, #tpu.memory_space<vmem>>, %arg7: memref<1x128xf32, #tpu.memory_space<vmem>>, %arg8: memref<128x128xf32, #tpu.memory_space<vmem>>, %arg9: memref<1x128xf32, #tpu.memory_space<vmem>>, %arg10: memref<8x128xf32, #tpu.memory_space<vmem>>) attributes {dimension_semantics = [#tpu.dimension_semantics<parallel>], iteration_bounds = array<i64: 1>, scalar_prefetch = 0 : i64, scratch_operands = 0 : i64, tpu.core_type = #tpu.core_type<tc>, window_params = [{transform_indices = @transform_0, window_bounds = array<i64: 28, 8, 28>}, {pipeline_mode = #tpu.pipeline_mode<synchronous>, transform_indices = @transform_1, window_bounds = array<i64: 5, 28, 240>}, {pipeline_mode = #tpu.pipeline_mode<synchronous>, transform_indices = @transform_2, window_bounds = array<i64: 1, 239>}, {pipeline_mode = #tpu.pipeline_mode<synchronous>, transform_indices = @transform_3, window_bounds = array<i64: 5, 239, 160>}, {pipeline_mode = #tpu.pipeline_mode<synchronous>, transform_indices = @transform_4, window_bounds = array<i64: 1, 160>}, {pipeline_mode = #tpu.pipeline_mode<synchronous>, transform_indices = @transform_5, window_bounds = array<i64: 4, 140, 128>}, {pipeline_mode = #tpu.pipeline_mode<synchronous>, transform_indices = @transform_6, window_bounds = array<i64: 1, 128>}, {pipeline_mode = #tpu.pipeline_mode<synchronous>, transform_indices = @transform_7, window_bounds = array<i64: 128, 128>}, {pipeline_mode = #tpu.pipeline_mode<synchronous>, transform_indices = @transform_8, window_bounds = array<i64: 1, 128>}, {transform_indices = @transform_9, window_bounds = array<i64: 8, 128>}]} {
    %c0 = arith.constant 0 : index
    %c0_0 = arith.constant 0 : index
    %c0_1 = arith.constant 0 : index
    %0 = vector.load %arg1[%c0, %c0_0, %c0_1] : memref<28x8x28xf32, #tpu.memory_space<vmem>>, vector<28x8x28xf32>
    %1 = vector.extract_strided_slice %0 {offsets = [0, 0, 0], sizes = [24, 8, 28], strides = [1, 1, 1]} : vector<28x8x28xf32> to vector<24x8x28xf32>
    %2 = vector.shape_cast %1 : vector<24x8x28xf32> to vector<192x28xf32>
    %3 = arith.truncf %2 : vector<192x28xf32> to vector<192x28xbf16>
    %c0_2 = arith.constant 0 : index
    %c0_3 = arith.constant 0 : index
    %c0_4 = arith.constant 0 : index
    %4 = vector.load %arg2[%c0_2, %c0_3, %c0_4] : memref<5x28x240xbf16, #tpu.memory_space<vmem>>, vector<1x28x240xbf16>
    %5 = vector.shape_cast %4 : vector<1x28x240xbf16> to vector<28x240xbf16>
    %cst = arith.constant dense<0.000000e+00> : vector<192x240xf32>
    %6 = tpu.matmul %3, %5, %cst {dimension_numbers = #tpu.dot_dimension_numbers<[1], [0], [0], [1], [0, 0, 1, 1], [], []>} : vector<192x28xbf16>, vector<28x240xbf16>, vector<192x240xf32> -> vector<192x240xf32>
    %7 = vector.extract_strided_slice %0 {offsets = [1, 0, 0], sizes = [24, 8, 28], strides = [1, 1, 1]} : vector<28x8x28xf32> to vector<24x8x28xf32>
    %8 = vector.shape_cast %7 : vector<24x8x28xf32> to vector<192x28xf32>
    %9 = arith.truncf %8 : vector<192x28xf32> to vector<192x28xbf16>
    %c1 = arith.constant 1 : index
    %c0_5 = arith.constant 0 : index
    %c0_6 = arith.constant 0 : index
    %10 = vector.load %arg2[%c1, %c0_5, %c0_6] : memref<5x28x240xbf16, #tpu.memory_space<vmem>>, vector<1x28x240xbf16>
    %11 = vector.shape_cast %10 : vector<1x28x240xbf16> to vector<28x240xbf16>
    %cst_7 = arith.constant dense<0.000000e+00> : vector<192x240xf32>
    %12 = tpu.matmul %9, %11, %cst_7 {dimension_numbers = #tpu.dot_dimension_numbers<[1], [0], [0], [1], [0, 0, 1, 1], [], []>} : vector<192x28xbf16>, vector<28x240xbf16>, vector<192x240xf32> -> vector<192x240xf32>
    %13 = arith.addf %6, %12 : vector<192x240xf32>
    %14 = vector.extract_strided_slice %0 {offsets = [2, 0, 0], sizes = [24, 8, 28], strides = [1, 1, 1]} : vector<28x8x28xf32> to vector<24x8x28xf32>
    %15 = vector.shape_cast %14 : vector<24x8x28xf32> to vector<192x28xf32>
    %16 = arith.truncf %15 : vector<192x28xf32> to vector<192x28xbf16>
    %c2 = arith.constant 2 : index
    %c0_8 = arith.constant 0 : index
    %c0_9 = arith.constant 0 : index
    %17 = vector.load %arg2[%c2, %c0_8, %c0_9] : memref<5x28x240xbf16, #tpu.memory_space<vmem>>, vector<1x28x240xbf16>
    %18 = vector.shape_cast %17 : vector<1x28x240xbf16> to vector<28x240xbf16>
    %cst_10 = arith.constant dense<0.000000e+00> : vector<192x240xf32>
    %19 = tpu.matmul %16, %18, %cst_10 {dimension_numbers = #tpu.dot_dimension_numbers<[1], [0], [0], [1], [0, 0, 1, 1], [], []>} : vector<192x28xbf16>, vector<28x240xbf16>, vector<192x240xf32> -> vector<192x240xf32>
    %20 = arith.addf %13, %19 : vector<192x240xf32>
    %21 = vector.extract_strided_slice %0 {offsets = [3, 0, 0], sizes = [24, 8, 28], strides = [1, 1, 1]} : vector<28x8x28xf32> to vector<24x8x28xf32>
    %22 = vector.shape_cast %21 : vector<24x8x28xf32> to vector<192x28xf32>
    %23 = arith.truncf %22 : vector<192x28xf32> to vector<192x28xbf16>
    %c3 = arith.constant 3 : index
    %c0_11 = arith.constant 0 : index
    %c0_12 = arith.constant 0 : index
    %24 = vector.load %arg2[%c3, %c0_11, %c0_12] : memref<5x28x240xbf16, #tpu.memory_space<vmem>>, vector<1x28x240xbf16>
    %25 = vector.shape_cast %24 : vector<1x28x240xbf16> to vector<28x240xbf16>
    %cst_13 = arith.constant dense<0.000000e+00> : vector<192x240xf32>
    %26 = tpu.matmul %23, %25, %cst_13 {dimension_numbers = #tpu.dot_dimension_numbers<[1], [0], [0], [1], [0, 0, 1, 1], [], []>} : vector<192x28xbf16>, vector<28x240xbf16>, vector<192x240xf32> -> vector<192x240xf32>
    %27 = arith.addf %20, %26 : vector<192x240xf32>
    %28 = vector.extract_strided_slice %0 {offsets = [4, 0, 0], sizes = [24, 8, 28], strides = [1, 1, 1]} : vector<28x8x28xf32> to vector<24x8x28xf32>
    %29 = vector.shape_cast %28 : vector<24x8x28xf32> to vector<192x28xf32>
    %30 = arith.truncf %29 : vector<192x28xf32> to vector<192x28xbf16>
    %c4 = arith.constant 4 : index
    %c0_14 = arith.constant 0 : index
    %c0_15 = arith.constant 0 : index
    %31 = vector.load %arg2[%c4, %c0_14, %c0_15] : memref<5x28x240xbf16, #tpu.memory_space<vmem>>, vector<1x28x240xbf16>
    %32 = vector.shape_cast %31 : vector<1x28x240xbf16> to vector<28x240xbf16>
    %cst_16 = arith.constant dense<0.000000e+00> : vector<192x240xf32>
    %33 = tpu.matmul %30, %32, %cst_16 {dimension_numbers = #tpu.dot_dimension_numbers<[1], [0], [0], [1], [0, 0, 1, 1], [], []>} : vector<192x28xbf16>, vector<28x240xbf16>, vector<192x240xf32> -> vector<192x240xf32>
    %34 = arith.addf %27, %33 : vector<192x240xf32>
    %35 = vector.shape_cast %34 : vector<192x240xf32> to vector<12x2x8x240xf32>
    %cst_17 = arith.constant dense<0xFF800000> : vector<12x8x240xf32>
    %36 = vector.multi_reduction <maximumf>, %35, %cst_17 [1] : vector<12x2x8x240xf32> to vector<12x8x240xf32>
    %37 = vector.extract_strided_slice %36 {offsets = [0, 0, 0], sizes = [12, 8, 239], strides = [1, 1, 1]} : vector<12x8x240xf32> to vector<12x8x239xf32>
    %38 = vector.extract_strided_slice %36 {offsets = [0, 0, 1], sizes = [12, 8, 239], strides = [1, 1, 1]} : vector<12x8x240xf32> to vector<12x8x239xf32>
    %39 = arith.maximumf %37, %38 : vector<12x8x239xf32>
    %c0_18 = arith.constant 0 : index
    %c0_19 = arith.constant 0 : index
    %40 = vector.load %arg3[%c0_18, %c0_19] : memref<1x239xf32, #tpu.memory_space<vmem>>, vector<1x239xf32>
    %41 = vector.shape_cast %40 : vector<1x239xf32> to vector<1x1x239xf32>
    %42 = vector.broadcast %41 : vector<1x1x239xf32> to vector<12x8x239xf32>
    %43 = arith.addf %39, %42 : vector<12x8x239xf32>
    %cst_20 = arith.constant 0.000000e+00 : f32
    %44 = vector.broadcast %cst_20 : f32 to vector<12x8x239xf32>
    %45 = arith.maximumf %43, %44 : vector<12x8x239xf32>
    %46 = vector.extract_strided_slice %45 {offsets = [0, 0, 0], sizes = [8, 8, 239], strides = [1, 1, 1]} : vector<12x8x239xf32> to vector<8x8x239xf32>
    %47 = vector.shape_cast %46 : vector<8x8x239xf32> to vector<64x239xf32>
    %48 = arith.truncf %47 : vector<64x239xf32> to vector<64x239xbf16>
    %c0_21 = arith.constant 0 : index
    %c0_22 = arith.constant 0 : index
    %c0_23 = arith.constant 0 : index
    %49 = vector.load %arg4[%c0_21, %c0_22, %c0_23] : memref<5x239x160xbf16, #tpu.memory_space<vmem>>, vector<1x239x160xbf16>
    %50 = vector.shape_cast %49 : vector<1x239x160xbf16> to vector<239x160xbf16>
    %cst_24 = arith.constant dense<0.000000e+00> : vector<64x160xf32>
    %51 = tpu.matmul %48, %50, %cst_24 {dimension_numbers = #tpu.dot_dimension_numbers<[1], [0], [0], [1], [0, 0, 1, 1], [], []>} : vector<64x239xbf16>, vector<239x160xbf16>, vector<64x160xf32> -> vector<64x160xf32>
    %52 = vector.extract_strided_slice %45 {offsets = [1, 0, 0], sizes = [8, 8, 239], strides = [1, 1, 1]} : vector<12x8x239xf32> to vector<8x8x239xf32>
    %53 = vector.shape_cast %52 : vector<8x8x239xf32> to vector<64x239xf32>
    %54 = arith.truncf %53 : vector<64x239xf32> to vector<64x239xbf16>
    %c1_25 = arith.constant 1 : index
    %c0_26 = arith.constant 0 : index
    %c0_27 = arith.constant 0 : index
    %55 = vector.load %arg4[%c1_25, %c0_26, %c0_27] : memref<5x239x160xbf16, #tpu.memory_space<vmem>>, vector<1x239x160xbf16>
    %56 = vector.shape_cast %55 : vector<1x239x160xbf16> to vector<239x160xbf16>
    %cst_28 = arith.constant dense<0.000000e+00> : vector<64x160xf32>
    %57 = tpu.matmul %54, %56, %cst_28 {dimension_numbers = #tpu.dot_dimension_numbers<[1], [0], [0], [1], [0, 0, 1, 1], [], []>} : vector<64x239xbf16>, vector<239x160xbf16>, vector<64x160xf32> -> vector<64x160xf32>
    %58 = arith.addf %51, %57 : vector<64x160xf32>
    %59 = vector.extract_strided_slice %45 {offsets = [2, 0, 0], sizes = [8, 8, 239], strides = [1, 1, 1]} : vector<12x8x239xf32> to vector<8x8x239xf32>
    %60 = vector.shape_cast %59 : vector<8x8x239xf32> to vector<64x239xf32>
    %61 = arith.truncf %60 : vector<64x239xf32> to vector<64x239xbf16>
    %c2_29 = arith.constant 2 : index
    %c0_30 = arith.constant 0 : index
    %c0_31 = arith.constant 0 : index
    %62 = vector.load %arg4[%c2_29, %c0_30, %c0_31] : memref<5x239x160xbf16, #tpu.memory_space<vmem>>, vector<1x239x160xbf16>
    %63 = vector.shape_cast %62 : vector<1x239x160xbf16> to vector<239x160xbf16>
    %cst_32 = arith.constant dense<0.000000e+00> : vector<64x160xf32>
    %64 = tpu.matmul %61, %63, %cst_32 {dimension_numbers = #tpu.dot_dimension_numbers<[1], [0], [0], [1], [0, 0, 1, 1], [], []>} : vector<64x239xbf16>, vector<239x160xbf16>, vector<64x160xf32> -> vector<64x160xf32>
    %65 = arith.addf %58, %64 : vector<64x160xf32>
    %66 = vector.extract_strided_slice %45 {offsets = [3, 0, 0], sizes = [8, 8, 239], strides = [1, 1, 1]} : vector<12x8x239xf32> to vector<8x8x239xf32>
    %67 = vector.shape_cast %66 : vector<8x8x239xf32> to vector<64x239xf32>
    %68 = arith.truncf %67 : vector<64x239xf32> to vector<64x239xbf16>
    %c3_33 = arith.constant 3 : index
    %c0_34 = arith.constant 0 : index
    %c0_35 = arith.constant 0 : index
    %69 = vector.load %arg4[%c3_33, %c0_34, %c0_35] : memref<5x239x160xbf16, #tpu.memory_space<vmem>>, vector<1x239x160xbf16>
    %70 = vector.shape_cast %69 : vector<1x239x160xbf16> to vector<239x160xbf16>
    %cst_36 = arith.constant dense<0.000000e+00> : vector<64x160xf32>
    %71 = tpu.matmul %68, %70, %cst_36 {dimension_numbers = #tpu.dot_dimension_numbers<[1], [0], [0], [1], [0, 0, 1, 1], [], []>} : vector<64x239xbf16>, vector<239x160xbf16>, vector<64x160xf32> -> vector<64x160xf32>
    %72 = arith.addf %65, %71 : vector<64x160xf32>
    %73 = vector.extract_strided_slice %45 {offsets = [4, 0, 0], sizes = [8, 8, 239], strides = [1, 1, 1]} : vector<12x8x239xf32> to vector<8x8x239xf32>
    %74 = vector.shape_cast %73 : vector<8x8x239xf32> to vector<64x239xf32>
    %75 = arith.truncf %74 : vector<64x239xf32> to vector<64x239xbf16>
    %c4_37 = arith.constant 4 : index
    %c0_38 = arith.constant 0 : index
    %c0_39 = arith.constant 0 : index
    %76 = vector.load %arg4[%c4_37, %c0_38, %c0_39] : memref<5x239x160xbf16, #tpu.memory_space<vmem>>, vector<1x239x160xbf16>
    %77 = vector.shape_cast %76 : vector<1x239x160xbf16> to vector<239x160xbf16>
    %cst_40 = arith.constant dense<0.000000e+00> : vector<64x160xf32>
    %78 = tpu.matmul %75, %77, %cst_40 {dimension_numbers = #tpu.dot_dimension_numbers<[1], [0], [0], [1], [0, 0, 1, 1], [], []>} : vector<64x239xbf16>, vector<239x160xbf16>, vector<64x160xf32> -> vector<64x160xf32>
    %79 = arith.addf %72, %78 : vector<64x160xf32>
    %c0_41 = arith.constant 0 : index
    %c0_42 = arith.constant 0 : index
    %80 = vector.load %arg5[%c0_41, %c0_42] : memref<1x160xf32, #tpu.memory_space<vmem>>, vector<1x160xf32>
    %81 = vector.broadcast %80 : vector<1x160xf32> to vector<64x160xf32>
    %82 = arith.addf %79, %81 : vector<64x160xf32>
    %83 = vector.shape_cast %82 : vector<64x160xf32> to vector<4x2x8x160xf32>
    %cst_43 = arith.constant dense<0xFF800000> : vector<4x8x160xf32>
    %84 = vector.multi_reduction <maximumf>, %83, %cst_43 [1] : vector<4x2x8x160xf32> to vector<4x8x160xf32>
    %85 = vector.extract_strided_slice %84 {offsets = [0, 0, 0], sizes = [4, 8, 140], strides = [1, 1, 1]} : vector<4x8x160xf32> to vector<4x8x140xf32>
    %86 = vector.extract_strided_slice %84 {offsets = [0, 0, 20], sizes = [4, 8, 140], strides = [1, 1, 1]} : vector<4x8x160xf32> to vector<4x8x140xf32>
    %87 = arith.maximumf %85, %86 : vector<4x8x140xf32>
    %cst_44 = arith.constant 0.000000e+00 : f32
    %88 = vector.broadcast %cst_44 : f32 to vector<4x8x140xf32>
    %89 = arith.maximumf %87, %88 : vector<4x8x140xf32>
    %90 = vector.extract_strided_slice %89 {offsets = [0, 0, 0], sizes = [1, 8, 140], strides = [1, 1, 1]} : vector<4x8x140xf32> to vector<1x8x140xf32>
    %91 = vector.shape_cast %90 : vector<1x8x140xf32> to vector<8x140xf32>
    %c0_45 = arith.constant 0 : index
    %c0_46 = arith.constant 0 : index
    %c0_47 = arith.constant 0 : index
    %92 = vector.load %arg6[%c0_45, %c0_46, %c0_47] : memref<4x140x128xf32, #tpu.memory_space<vmem>>, vector<1x140x128xf32>
    %93 = vector.shape_cast %92 : vector<1x140x128xf32> to vector<140x128xf32>
    %cst_48 = arith.constant dense<0.000000e+00> : vector<8x128xf32>
    %94 = tpu.matmul %91, %93, %cst_48 {dimension_numbers = #tpu.dot_dimension_numbers<[1], [0], [0], [1], [0, 0, 1, 1], [], []>} : vector<8x140xf32>, vector<140x128xf32>, vector<8x128xf32> -> vector<8x128xf32>
    %95 = vector.extract_strided_slice %89 {offsets = [1, 0, 0], sizes = [1, 8, 140], strides = [1, 1, 1]} : vector<4x8x140xf32> to vector<1x8x140xf32>
    %96 = vector.shape_cast %95 : vector<1x8x140xf32> to vector<8x140xf32>
    %c1_49 = arith.constant 1 : index
    %c0_50 = arith.constant 0 : index
    %c0_51 = arith.constant 0 : index
    %97 = vector.load %arg6[%c1_49, %c0_50, %c0_51] : memref<4x140x128xf32, #tpu.memory_space<vmem>>, vector<1x140x128xf32>
    %98 = vector.shape_cast %97 : vector<1x140x128xf32> to vector<140x128xf32>
    %cst_52 = arith.constant dense<0.000000e+00> : vector<8x128xf32>
    %99 = tpu.matmul %96, %98, %cst_52 {dimension_numbers = #tpu.dot_dimension_numbers<[1], [0], [0], [1], [0, 0, 1, 1], [], []>} : vector<8x140xf32>, vector<140x128xf32>, vector<8x128xf32> -> vector<8x128xf32>
    %100 = arith.addf %94, %99 : vector<8x128xf32>
    %101 = vector.extract_strided_slice %89 {offsets = [2, 0, 0], sizes = [1, 8, 140], strides = [1, 1, 1]} : vector<4x8x140xf32> to vector<1x8x140xf32>
    %102 = vector.shape_cast %101 : vector<1x8x140xf32> to vector<8x140xf32>
    %c2_53 = arith.constant 2 : index
    %c0_54 = arith.constant 0 : index
    %c0_55 = arith.constant 0 : index
    %103 = vector.load %arg6[%c2_53, %c0_54, %c0_55] : memref<4x140x128xf32, #tpu.memory_space<vmem>>, vector<1x140x128xf32>
    %104 = vector.shape_cast %103 : vector<1x140x128xf32> to vector<140x128xf32>
    %cst_56 = arith.constant dense<0.000000e+00> : vector<8x128xf32>
    %105 = tpu.matmul %102, %104, %cst_56 {dimension_numbers = #tpu.dot_dimension_numbers<[1], [0], [0], [1], [0, 0, 1, 1], [], []>} : vector<8x140xf32>, vector<140x128xf32>, vector<8x128xf32> -> vector<8x128xf32>
    %106 = arith.addf %100, %105 : vector<8x128xf32>
    %107 = vector.extract_strided_slice %89 {offsets = [3, 0, 0], sizes = [1, 8, 140], strides = [1, 1, 1]} : vector<4x8x140xf32> to vector<1x8x140xf32>
    %108 = vector.shape_cast %107 : vector<1x8x140xf32> to vector<8x140xf32>
    %c3_57 = arith.constant 3 : index
    %c0_58 = arith.constant 0 : index
    %c0_59 = arith.constant 0 : index
    %109 = vector.load %arg6[%c3_57, %c0_58, %c0_59] : memref<4x140x128xf32, #tpu.memory_space<vmem>>, vector<1x140x128xf32>
    %110 = vector.shape_cast %109 : vector<1x140x128xf32> to vector<140x128xf32>
    %cst_60 = arith.constant dense<0.000000e+00> : vector<8x128xf32>
    %111 = tpu.matmul %108, %110, %cst_60 {dimension_numbers = #tpu.dot_dimension_numbers<[1], [0], [0], [1], [0, 0, 1, 1], [], []>} : vector<8x140xf32>, vector<140x128xf32>, vector<8x128xf32> -> vector<8x128xf32>
    %112 = arith.addf %106, %111 : vector<8x128xf32>
    %c0_61 = arith.constant 0 : index
    %c0_62 = arith.constant 0 : index
    %113 = vector.load %arg7[%c0_61, %c0_62] : memref<1x128xf32, #tpu.memory_space<vmem>>, vector<1x128xf32>
    %114 = vector.broadcast %113 : vector<1x128xf32> to vector<8x128xf32>
    %115 = arith.addf %112, %114 : vector<8x128xf32>
    %cst_63 = arith.constant 0.000000e+00 : f32
    %116 = vector.broadcast %cst_63 : f32 to vector<8x128xf32>
    %117 = arith.maximumf %115, %116 : vector<8x128xf32>
    %c0_64 = arith.constant 0 : index
    %c0_65 = arith.constant 0 : index
    %118 = vector.load %arg8[%c0_64, %c0_65] : memref<128x128xf32, #tpu.memory_space<vmem>>, vector<128x128xf32>
    %cst_66 = arith.constant dense<0.000000e+00> : vector<8x128xf32>
    %119 = tpu.matmul %117, %118, %cst_66 {dimension_numbers = #tpu.dot_dimension_numbers<[1], [0], [0], [1], [0, 0, 1, 1], [], []>} : vector<8x128xf32>, vector<128x128xf32>, vector<8x128xf32> -> vector<8x128xf32>
    %c0_67 = arith.constant 0 : index
    %c0_68 = arith.constant 0 : index
    %120 = vector.load %arg9[%c0_67, %c0_68] : memref<1x128xf32, #tpu.memory_space<vmem>>, vector<1x128xf32>
    %121 = vector.broadcast %120 : vector<1x128xf32> to vector<8x128xf32>
    %122 = arith.addf %119, %121 : vector<8x128xf32>
    %cst_69 = arith.constant dense<0xFF800000> : vector<8xf32>
    %123 = vector.multi_reduction <maximumf>, %122, %cst_69 [1] : vector<8x128xf32> to vector<8xf32>
    %124 = vector.shape_cast %123 : vector<8xf32> to vector<8x1xf32>
    %125 = vector.broadcast %124 : vector<8x1xf32> to vector<8x128xf32>
    %126 = arith.subf %122, %125 : vector<8x128xf32>
    %127 = math.exp %126 : vector<8x128xf32>
    %cst_70 = arith.constant dense<0.000000e+00> : vector<8xf32>
    %128 = vector.multi_reduction <add>, %127, %cst_70 [1] : vector<8x128xf32> to vector<8xf32>
    %129 = vector.shape_cast %128 : vector<8xf32> to vector<8x1xf32>
    %130 = math.log %129 : vector<8x1xf32>
    %131 = vector.broadcast %130 : vector<8x1xf32> to vector<8x128xf32>
    %132 = arith.subf %126, %131 : vector<8x128xf32>
    %c0_71 = arith.constant 0 : index
    %c0_72 = arith.constant 0 : index
    %133 = vector.load %arg10[%c0_71, %c0_72] : memref<8x128xf32, #tpu.memory_space<vmem>>, vector<8x128xf32>
    tpu.vector_store %arg10[%c0_71, %c0_72], %132 {strides = array<i32>} : memref<8x128xf32, #tpu.memory_space<vmem>>, vector<8x128xf32>,
    return
  }
  func.func @transform_0(%arg0: i32) -> (i32, i32, i32) {
    %c0_i32 = arith.constant 0 : i32
    %c0_i32_0 = arith.constant 0 : i32
    %c0_i32_1 = arith.constant 0 : i32
    return %c0_i32, %arg0, %c0_i32_0 : i32, i32, i32
  }
  func.func @transform_1(%arg0: i32) -> (i32, i32, i32) {
    %c0_i32 = arith.constant 0 : i32
    %c0_i32_0 = arith.constant 0 : i32
    %c0_i32_1 = arith.constant 0 : i32
    %c0_i32_2 = arith.constant 0 : i32
    return %c0_i32, %c0_i32_0, %c0_i32_1 : i32, i32, i32
  }
  func.func @transform_2(%arg0: i32) -> (i32, i32) {
    %c0_i32 = arith.constant 0 : i32
    %c0_i32_0 = arith.constant 0 : i32
    %c0_i32_1 = arith.constant 0 : i32
    return %c0_i32, %c0_i32_0 : i32, i32
  }
  func.func @transform_3(%arg0: i32) -> (i32, i32, i32) {
    %c0_i32 = arith.constant 0 : i32
    %c0_i32_0 = arith.constant 0 : i32
    %c0_i32_1 = arith.constant 0 : i32
    %c0_i32_2 = arith.constant 0 : i32
    return %c0_i32, %c0_i32_0, %c0_i32_1 : i32, i32, i32
  }
  func.func @transform_4(%arg0: i32) -> (i32, i32) {
    %c0_i32 = arith.constant 0 : i32
    %c0_i32_0 = arith.constant 0 : i32
    %c0_i32_1 = arith.constant 0 : i32
    return %c0_i32, %c0_i32_0 : i32, i32
  }
  func.func @transform_5(%arg0: i32) -> (i32, i32, i32) {
    %c0_i32 = arith.constant 0 : i32
    %c0_i32_0 = arith.constant 0 : i32
    %c0_i32_1 = arith.constant 0 : i32
    %c0_i32_2 = arith.constant 0 : i32
    return %c0_i32, %c0_i32_0, %c0_i32_1 : i32, i32, i32
  }
  func.func @transform_6(%arg0: i32) -> (i32, i32) {
    %c0_i32 = arith.constant 0 : i32
    %c0_i32_0 = arith.constant 0 : i32
    %c0_i32_1 = arith.constant 0 : i32
    return %c0_i32, %c0_i32_0 : i32, i32
  }
  func.func @transform_7(%arg0: i32) -> (i32, i32) {
    %c0_i32 = arith.constant 0 : i32
    %c0_i32_0 = arith.constant 0 : i32
    %c0_i32_1 = arith.constant 0 : i32
    return %c0_i32, %c0_i32_0 : i32, i32
  }
  func.func @transform_8(%arg0: i32) -> (i32, i32) {
    %c0_i32 = arith.constant 0 : i32
    %c0_i32_0 = arith.constant 0 : i32
    %c0_i32_1 = arith.constant 0 : i32
    return %c0_i32, %c0_i32_0 : i32, i32
  }
  func.func @transform_9(%arg0: i32) -> (i32, i32) {
    %c0_i32 = arith.constant 0 : i32
    %c0_i32_0 = arith.constant 0 : i32
    return %arg0, %c0_i32 : i32, i32
  }
}

</mosaic_0001>

<bundles_post_ra>
// kernel: tile.8
= control target key start
LH: loop header
LB: loop body
LE: loop exit
PB: predicated region body
PF: predicated region fallthrough
CT: control target
= control target key end

     0   :  { %s22_s0 = inlined_call_operand.vmem [shape: f32[20], index: 0, kind: input, shape index: {}]   ;;  %s23_s1 = inlined_call_operand.vmem [shape: f32[8,20], index: 1, kind: output, shape index: {}]  }
   0x1   :  { %v4_v0 = vld [vmem:[%s22_s0] ss:$0 sm:$0xff] }
   0x2   :  { %5 = vst [vmem:[%s23_s1] sm:$0xff] %v4_v0 }

// kernel: tile.9
= control target key start
LH: loop header
LB: loop body
LE: loop exit
PB: predicated region body
PF: predicated region fallthrough
CT: control target
= control target key end

     0   :  { %vm9_vm0 = vcmask 64512   ;;  %s83_s12 = smov 120   ;;  %s84_s13 = smov 80   ;;  %vm3_vm1 = vcmask 162816   ;;  %vm13_vm2 = vcmask 97280   ;;  %vm16_vm3 = vcmask 1048512   ;;  %s133_s0 = inlined_call_operand.vmem [shape: f32[8,20], index: 0, kind: input, shape index: {}]   ;;  %s134_s1 = inlined_call_operand.vmem [shape: f32[1,160], index: 1, kind: output, shape index: {}]  }
   0x1   :  { %v67_v0 = vld [vmem:[%s133_s0 + $0x6] sm:$0x1]   ;;  %v70_v3 = vld [vmem:[%s133_s0 + $0x4] sm:$0x1]   ;;  %v72_v4 = vld [vmem:[%s133_s0 + $0x2] sm:$0x1]  }
   0x2   :  { %v68_v1 = vld [vmem:[%s133_s0 + $0x6] sm:$0x1]   ;;  %26 = vrot.lane.b32.xlu1 %v70_v3, %s84_s13  ;;  %s85_s16 = smov 40   ;;  %v69_v5 = vld [vmem:[%s133_s0 + $0x5] sm:$0x1]   ;;  %s86_s23 = smov 100  }
   0x3   :  { %v10_v2 = vsel %vm9_vm0, %v68_v1, %v67_v0  ;;  %38 = vrot.lane.b32.xlu2 %v72_v4, %s85_s16  ;;  %v71_v6 = vld [vmem:[%s133_s0 + $0x3] sm:$0x1]   ;;  %v73_v7 = vld [vmem:[%s133_s0 + $0x1] sm:$0x1]   ;;  %s87_s24 = smov 60   ;;  %s88_s25 = smov 20  }
   0x4   :  { %11 = vrot.lane.b32.xlu0 %v10_v2, %s83_s12  ;;  %v74_v8 = vld [vmem:[%s133_s0 + $0x7] sm:$0x1]   ;;  %s89_s28 = smov 12   ;;  %v2_v9 = vld [vmem:[%s133_s0] sm:$0x1]   ;;  %vm22_vm4 = vcmask 982816  }
   0x5   :  { %4 = vst.msk [vmem:[#allocation0] sm:$0x1] %vm3_vm1, %v2_v9   ;;  %vm28_vm5 = vcmask 818816   ;;  %vm34_vm6 = vcmask 654816   ;;  %vm40_vm7 = vcmask 490816   ;;  %vm46_vm8 = vcmask 326816  }
   0x6   :  { %vm52_vm9 = vcmask 261216  }
   0xa   :  { %32 = vrot.lane.b32.xlu1 %v71_v6, %s87_s24 }
   0xb   :  { %44 = vrot.lane.b32.xlu2 %v73_v7, %s88_s25 }
   0xc   :  { %20 = vrot.lane.b32.xlu0 %v69_v5, %s86_s23 }
  0x14   :  { %50 = vrot.lane.b32.xlu0 %v74_v8, %s89_s28 }
  0x5d   :  { %v39_v10 = vpop.permute.xlu2 %38  }
  0x65   :  { %v45_v11 = vpop.permute.xlu2 %44  }
  0x74   :  { %v27_v13 = vpop.permute.xlu1 %26  }
  0x76   :  { %v12_v12 = vpop.permute.xlu0 %11  }
  0x77   :  { %15 = vst.msk [vmem:[#allocation0 + $0x8] sm:$0x1] %vm13_vm2, %v12_v12  }
  0x78   :  { %17 = vst.msk [vmem:[#allocation0] sm:$0x1] %vm16_vm3, %v12_v12  }
  0x7c   :  { %v33_v15 = vpop.permute.xlu1 %32  }
  0x7e   :  { %v21_v14 = vpop.permute.xlu0 %20  }
  0x7f   :  { %23 = vst.msk [vmem:[#allocation0] sm:$0x1] %vm22_vm4, %v21_v14  }
  0x80   :  { %29 = vst.msk [vmem:[#allocation0] sm:$0x1] %vm28_vm5, %v27_v13  }
  0x81   :  { %35 = vst.msk [vmem:[#allocation0] sm:$0x1] %vm34_vm6, %v33_v15  }
  0x82   :  { %41 = vst.msk [vmem:[#allocation0] sm:$0x1] %vm40_vm7, %v39_v10  }
  0x83   :  { %47 = vst.msk [vmem:[#allocation0] sm:$0x1] %vm46_vm8, %v45_v11  }
  0x86   :  { %v51_v16 = vpop.permute.xlu0 %50  }
  0x87   :  { %54 = vst.msk [vmem:[#allocation0 + $0x8] sm:$0x1] %vm52_vm9, %v51_v16  }
  0x8a   :  { %v57_v17 = vld [vmem:[#allocation0] sm:$0x1] }
  0x8b   :  { %60 = vst [vmem:[%s134_s1] sm:$0x1] %v57_v17 }
  0x8e   :  { %v62_v18 = vld [vmem:[#allocation0 + $0x8] sm:$0x1] }
  0x8f   :  { %75 = vst [vmem:[%s134_s1 + $0x1] sm:$0x1] %v62_v18 }

// kernel: net_forward.1
= control target key start
LH: loop header
LB: loop body
LE: loop exit
PB: predicated region body
PF: predicated region fallthrough
CT: control target
= control target key end

     0   :  { %vm149_vm0 = vcmask 1045504   ;;  %vm112_vm1 = vcmask 228352   ;;  %vm1623_vm2 = vcmask 1046528   ;;  %vm1624_vm3 = vcmask 1047552   ;;  %s4631_s11 = smov 127   ;;  %s7500_s1 = inlined_call_operand.vmem [shape: bf16[5,28,240], index: 1, kind: input, shape index: {}]   ;;  %s7501_s0 = inlined_call_operand.vmem [shape: f32[28,8,28], index: 0, kind: input, shape index: {}]   ;;  %s7502_s3 = inlined_call_operand.vmem [shape: bf16[5,239,160], index: 3, kind: input, shape index: {}]   ;;  %s7503_s2 = inlined_call_operand.vmem [shape: f32[1,239], index: 2, kind: input, shape index: {}]   ;;  %s7504_s4 = inlined_call_operand.vmem [shape: f32[1,160], index: 4, kind: input, shape index: {}]   ;;  %s7505_s5 = inlined_call_operand.vmem [shape: f32[4,140,128], index: 5, kind: input, shape index: {}]   ;;  %s7506_s7 = inlined_call_operand.vmem [shape: f32[128,128], index: 7, kind: input, shape index: {}]   ;;  %s7507_s6 = inlined_call_operand.vmem [shape: f32[1,128], index: 6, kind: input, shape index: {}]   ;;  %s7508_s8 = inlined_call_operand.vmem [shape: f32[1,128], index: 8, kind: input, shape index: {}]   ;;  %s7509_s9 = inlined_call_operand.vmem [shape: f32[8,128], index: 9, kind: output, shape index: {}]  }
   0x1   :  { %v3427_v0 = vld [vmem:[%s7500_s1 + $0x30] sm:$0xf]  ;;  %v4458_v1 = vld [vmem:[%s7500_s1 + $0x34] sm:$0x30]  ;;  %v4457_v2 = vld [vmem:[%s7500_s1 + $0x34] sm:$0xf] }
   0x2   :  { %v3428_v3 = vor.u32 %v4458_v1, %v3427_v0  ;;  %v3429_v4 = vld [vmem:[%s7500_s1 + $0x38] sm:$0x30]  ;;  %v3467_v5 = vld [vmem:[%s7500_s1 + $0x10] sm:$0xf]  ;;  %v4454_v6 = vld [vmem:[%s7500_s1 + $0x14] sm:$0x30] }
   0x3   :  { %v3432_v7 = vor.u32 %v4457_v2, %v3429_v4  ;;  %v3468_v8 = vor.u32 %v4454_v6, %v3467_v5  ;;  %v4453_v9 = vld [vmem:[%s7500_s1 + $0x14] sm:$0xf]  ;;  %v3469_v10 = vld [vmem:[%s7500_s1 + $0x18] sm:$0x30]  ;;  %v3419_v11 = vld [vmem:[%s7500_s1 + $0x20] sm:$0xf] }
   0x4   :  { %v151_v12 = vsel %vm149_vm0, %v3428_v3, 0  ;;  %v3472_v13 = vor.u32 %v4453_v9, %v3469_v10  ;;  %v4456_v14 = vld [vmem:[%s7500_s1 + $0x24] sm:$0xf0]  ;;  %v4455_v15 = vld [vmem:[%s7500_s1 + $0x24] sm:$0xf]  ;;  %v35_v26 = vld [vmem:[%s7501_s0 + $0x10] sm:$0xff] }
   0x5   :  { %v34_v16 = vld [vmem:[%s7501_s0 + $0x8] sm:$0xff]  ;;  %162 = vmatpush.bf16.msra.mxu0 %v151_v12  ;;  %v154_v17 = vsel %vm149_vm0, %v3432_v7, 0  ;;  %v349_v18 = vsel %vm149_vm0, %v3468_v8, 0  ;;  %v3420_v19 = vor.u32 %v4456_v14, %v3419_v11  ;;  %v3459_v21 = vld [vmem:[%s7500_s1] sm:$0xf]  ;;  %v36_v41 = vld [vmem:[%s7501_s0 + $0x18] sm:$0xff] }
   0x6   :  { %v3421_v20 = vld [vmem:[%s7500_s1 + $0x28] sm:$0xf0]  ;;  %231 = vmatpush.bf16.msra.mxu1 %v154_v17  ;;  %360 = vmatpush.bf16.msra.mxu2 %v349_v18  ;;  %v352_v22 = vsel %vm149_vm0, %v3472_v13, 0  ;;  %v4452_v24 = vld [vmem:[%s7500_s1 + $0x4] sm:$0xf0]  ;;  %v33_v29 = vld [vmem:[%s7501_s0] sm:$0xff]  ;;  %v77_v31 = vpack.c.bf16 %v35_v26, %v34_v16  ;;  %v4770_v44 = vpack.c.bf16 %v36_v41, %v35_v26 }
   0x7   :  { %v3424_v23 = vor.u32 %v4455_v15, %v3421_v20  ;;  %v4451_v25 = vld [vmem:[%s7500_s1 + $0x4] sm:$0xf]  ;;  %429 = vmatpush.bf16.msra.mxu3 %v352_v22  ;;  %v3460_v27 = vor.u32 %v4452_v24, %v3459_v21  ;;  %v3461_v28 = vld [vmem:[%s7500_s1 + $0x8] sm:$0xf0]  ;;  %v4461_v32 = vld [vmem:[%s7500_s1 + $0x54] sm:$0xf]  ;;  %v61_v35 = vpack.c.bf16 %v34_v16, %v33_v29 }
   0x8   :  { %v3464_v30 = vor.u32 %v4451_v25, %v3461_v28  ;;  %v3513_v33 = vld [vmem:[%s7500_s1 + $0x58] sm:$0x30]  ;;  %v3511_v34 = vld [vmem:[%s7500_s1 + $0x50] sm:$0xf]  ;;  %v4462_v37 = vld [vmem:[%s7500_s1 + $0x54] sm:$0x30] }
   0x9   :  { %163 = vmatpush.bf16.msra.mxu0 %v3420_v19  ;;  %v3516_v36 = vor.u32 %v4461_v32, %v3513_v33  ;;  %v3512_v38 = vor.u32 %v4462_v37, %v3511_v34  ;;  %v37_v42 = vld [vmem:[%s7501_s0 + $0x20] sm:$0xff]  ;;  %v38_v45 = vld [vmem:[%s7501_s0 + $0x28] sm:$0xff]  ;;  %v39_v46 = vld [vmem:[%s7501_s0 + $0x30] sm:$0xff]  ;;  %vm1150_vm4 = vcmask 916480   ;;  %vm1270_vm5 = vcmask 1039360  }
   0xa   :  { %232 = vmatpush.bf16.msra.mxu1 %v3424_v23  ;;  %361 = vmatpush.bf16.msra.mxu2 %v3460_v27  ;;  %v4768_v43 = vpack.c.bf16 %v37_v42, %v36_v41  ;;  %v4786_v47 = vpack.c.bf16 %v39_v46, %v38_v45  ;;  %v4788_v48 = vpack.c.bf16 %v38_v45, %v37_v42  ;;  %v40_v49 = vld [vmem:[%s7501_s0 + $0x38] sm:$0xff]  ;;  %v41_v50 = vld [vmem:[%s7501_s0 + $0x40] sm:$0xff]  ;;  %v42_v53 = vld [vmem:[%s7501_s0 + $0x48] sm:$0xff]  ;;  %vm1610_vm6 = vcmask 908288  }
   0xb   :  { %430 = vmatpush.bf16.msra.mxu3 %v3464_v30  ;;  %v523_v39 = vsel %vm149_vm0, %v3516_v36, 0  ;;  %v520_v40 = vsel %vm149_vm0, %v3512_v38, 0  ;;  %v4804_v51 = vpack.c.bf16 %v41_v50, %v40_v49  ;;  %v4806_v52 = vpack.c.bf16 %v40_v49, %v39_v46  ;;  %v43_v54 = vld [vmem:[%s7501_s0 + $0x50] sm:$0xff]  ;;  %v4459_v57 = vld [vmem:[%s7500_s1 + $0x44] sm:$0xf]  ;;  %v44_v63 = vld [vmem:[%s7501_s0 + $0x58] sm:$0xff] }
   0xc   :  { %3433 = vmatmul.msk.bf16.vlgmr.msra.gmra.mxu0 %vm112_vm1, %v77_v31  ;;  %v4822_v55 = vpack.c.bf16 %v43_v54, %v42_v53  ;;  %v4824_v56 = vpack.c.bf16 %v42_v53, %v41_v50  ;;  %v3505_v58 = vld [vmem:[%s7500_s1 + $0x48] sm:$0xf0]  ;;  %v3503_v59 = vld [vmem:[%s7500_s1 + $0x40] sm:$0xf]  ;;  %v4460_v61 = vld [vmem:[%s7500_s1 + $0x44] sm:$0xf0]  ;;  %v4854_v2 = vpack.c.bf16 %v44_v63, %v43_v54 }
   0xd   :  { %3445 = vmatmul.msk.bf16.vlgmr.msra.gmra.mxu1 %vm112_vm1, %v77_v31  ;;  %3473 = vmatmul.msk.bf16.vlgmr.msra.gmra.mxu2 %vm112_vm1, %v61_v35  ;;  %v3508_v60 = vor.u32 %v4459_v57, %v3505_v58  ;;  %v3504_v62 = vor.u32 %v4460_v61, %v3503_v59  ;;  %v45_v0 = vld [vmem:[%s7501_s0 + $0x60] sm:$0xff]  ;;  %v46_v3 = vld [vmem:[%s7501_s0 + $0x68] sm:$0xff]  ;;  %v47_v4 = vld [vmem:[%s7501_s0 + $0x70] sm:$0xff]  ;;  %vm3020_vm7 = vcmask 261120   ;;  %vm3130_vm8 = vcmask 1043456  }
   0xe   :  { %600 = vmatpush.bf16.msrb.mxu1 %v523_v39  ;;  %3485 = vmatmul.msk.bf16.vlgmr.msra.gmra.mxu3 %vm112_vm1, %v61_v35  ;;  %v4852_v1 = vpack.c.bf16 %v45_v0, %v44_v63  ;;  %v4870_v5 = vpack.c.bf16 %v47_v4, %v46_v3  ;;  %v4872_v6 = vpack.c.bf16 %v46_v3, %v45_v0  ;;  %v48_v7 = vld [vmem:[%s7501_s0 + $0x78] sm:$0xff]  ;;  %v49_v8 = vld [vmem:[%s7501_s0 + $0x80] sm:$0xff]  ;;  %v50_v11 = vld [vmem:[%s7501_s0 + $0x88] sm:$0xff]  ;;  %vm3126_vm9 = vcmask 97280  }
   0xf   :  { %531 = vmatpush.bf16.msrb.mxu0 %v520_v40  ;;  %v4888_v9 = vpack.c.bf16 %v49_v8, %v48_v7  ;;  %v4890_v10 = vpack.c.bf16 %v48_v7, %v47_v4  ;;  %v51_v12 = vld [vmem:[%s7501_s0 + $0x90] sm:$0xff]  ;;  %v4908_v15 = vpack.c.bf16 %v50_v11, %v49_v8  ;;  %v52_v23 = vld [vmem:[%s7501_s0 + $0x98] sm:$0xff]  ;;  %v53_v24 = vld [vmem:[%s7501_s0 + $0xa0] sm:$0xff]  ;;  %vm3060_vm10 = vcmask 883712  }
  0x10   :  { %7517 = vst [vmem:[#allocation2_spill] sm:$0xff] %v4872_v6  ;;  %v4906_v13 = vpack.c.bf16 %v51_v12, %v50_v11  ;;  %v4928_v26 = vpack.c.bf16 %v53_v24, %v52_v23  ;;  %v4932_v30 = vpack.c.bf16 %v52_v23, %v51_v12  ;;  %v4465_v39 = vld [vmem:[%s7500_s1 + $0x74] sm:$0xf]  ;;  %v3557_v40 = vld [vmem:[%s7500_s1 + $0x78] sm:$0x30]  ;;  %v54_v49 = vld [vmem:[%s7501_s0 + $0xa8] sm:$0xff] }
  0x11   :  { %7518 = vst [vmem:[#allocation3_spill] sm:$0xff] %v4890_v10  ;;  %v3555_v41 = vld [vmem:[%s7500_s1 + $0x70] sm:$0xf]  ;;  %v3560_v42 = vor.u32 %v4465_v39, %v3557_v40  ;;  %v4466_v45 = vld [vmem:[%s7500_s1 + $0x74] sm:$0x30]  ;;  %v4981_v3 = vpack.c.bf16 %v54_v49, %v53_v24 }
  0x12   :  { %601 = vmatpush.bf16.msrb.mxu1 %v3508_v60  ;;  %7519 = vst [vmem:[#allocation4_spill] sm:$0xff] %v4908_v15  ;;  %v3556_v46 = vor.u32 %v4466_v45, %v3555_v41  ;;  %v55_v50 = vld [vmem:[%s7501_s0 + $0xb0] sm:$0xff]  ;;  %v3547_v59 = vld [vmem:[%s7500_s1 + $0x60] sm:$0xf]  ;;  %v4464_v60 = vld [vmem:[%s7500_s1 + $0x64] sm:$0xf0] }
  0x13   :  { %532 = vmatpush.bf16.msrb.mxu0 %v3504_v62  ;;  %v742_v53 = vsel %vm149_vm0, %v3560_v42, 0  ;;  %v4968_v58 = vpack.c.bf16 %v55_v50, %v54_v49  ;;  %v4463_v61 = vld [vmem:[%s7500_s1 + $0x64] sm:$0xf]  ;;  %v3548_v4 = vor.u32 %v4464_v60, %v3547_v59  ;;  %v3549_v7 = vld [vmem:[%s7500_s1 + $0x68] sm:$0xf0] }
  0x14   :  { %819 = vmatpush.bf16.msrb.mxu3 %v742_v53  ;;  %v739_v54 = vsel %vm149_vm0, %v3556_v46, 0  ;;  %v3552_v12 = vor.u32 %v4463_v61, %v3549_v7 }
  0x15   :  { %750 = vmatpush.bf16.msrb.mxu2 %v739_v54 }
  0x18   :  { %820 = vmatpush.bf16.msrb.mxu3 %v3552_v12 }
  0x19   :  { %751 = vmatpush.bf16.msrb.mxu2 %v3548_v4 }
  0x1c   :  { %3434 = vmatmul.msk.bf16.gmra.mxu0 %vm112_vm1, %v4768_v43 }
  0x1d   :  { %3446 = vmatmul.msk.bf16.gmra.mxu1 %vm112_vm1, %v4768_v43  ;;  %3474 = vmatmul.msk.bf16.gmra.mxu2 %vm112_vm1, %v4770_v44 }
  0x1e   :  { %3486 = vmatmul.msk.bf16.gmra.mxu3 %vm112_vm1, %v4770_v44 }
  0x2c   :  { %3435 = vmatmul.msk.bf16.gmra.mxu0 %vm112_vm1, %v4786_v47 }
  0x2d   :  { %3447 = vmatmul.msk.bf16.gmra.mxu1 %vm112_vm1, %v4786_v47  ;;  %3475 = vmatmul.msk.bf16.gmra.mxu2 %vm112_vm1, %v4788_v48 }
  0x2e   :  { %3487 = vmatmul.msk.bf16.gmra.mxu3 %vm112_vm1, %v4788_v48 }
  0x3c   :  { %3436 = vmatmul.msk.bf16.gmra.mxu0 %vm112_vm1, %v4804_v51 }
  0x3d   :  { %3448 = vmatmul.msk.bf16.gmra.mxu1 %vm112_vm1, %v4804_v51  ;;  %3476 = vmatmul.msk.bf16.gmra.mxu2 %vm112_vm1, %v4806_v52 }
  0x3e   :  { %3488 = vmatmul.msk.bf16.gmra.mxu3 %vm112_vm1, %v4806_v52 }
  0x4c   :  { %3437 = vmatmul.msk.bf16.gmra.mxu0 %vm112_vm1, %v4822_v55 }
  0x4d   :  { %3449 = vmatmul.msk.bf16.gmra.mxu1 %vm112_vm1, %v4822_v55  ;;  %3477 = vmatmul.msk.bf16.gmra.mxu2 %vm112_vm1, %v4824_v56 }
  0x4e   :  { %3489 = vmatmul.msk.bf16.gmra.mxu3 %vm112_vm1, %v4824_v56 }
  0x5c   :  { %3438 = vmatmul.msk.bf16.gmra.mxu0 %vm112_vm1, %v4852_v1 }
  0x5d   :  { %3450 = vmatmul.msk.bf16.gmra.mxu1 %vm112_vm1, %v4852_v1  ;;  %3478 = vmatmul.msk.bf16.gmra.mxu2 %vm112_vm1, %v4854_v2 }
  0x5e   :  { %3490 = vmatmul.msk.bf16.gmra.mxu3 %vm112_vm1, %v4854_v2 }
  0x6c   :  { %3439 = vmatmul.msk.bf16.gmra.mxu0 %vm112_vm1, %v4870_v5 }
  0x6d   :  { %3451 = vmatmul.msk.bf16.gmra.mxu1 %vm112_vm1, %v4870_v5  ;;  %3479 = vmatmul.msk.bf16.gmra.mxu2 %vm112_vm1, %v4872_v6 }
  0x6e   :  { %3491 = vmatmul.msk.bf16.gmra.mxu3 %vm112_vm1, %v4872_v6 }
  0x7c   :  { %3440 = vmatmul.msk.bf16.gmra.mxu0 %vm112_vm1, %v4888_v9 }
  0x7d   :  { %3452 = vmatmul.msk.bf16.gmra.mxu1 %vm112_vm1, %v4888_v9  ;;  %3480 = vmatmul.msk.bf16.gmra.mxu2 %vm112_vm1, %v4890_v10 }
  0x7e   :  { %3492 = vmatmul.msk.bf16.gmra.mxu3 %vm112_vm1, %v4890_v10 }
  0x89   :  { %v165_v14 = vpop.f32.mrf.mxu0 }
  0x8a   :  { %v234_v16 = vpop.f32.mrf.mxu1 }
  0x8c   :  { %3441 = vmatmul.msk.bf16.gmra.mxu0 %vm112_vm1, %v4906_v13 }
  0x8d   :  { %3453 = vmatmul.msk.bf16.gmra.mxu1 %vm112_vm1, %v4906_v13  ;;  %3481 = vmatmul.msk.bf16.gmra.mxu2 %vm112_vm1, %v4908_v15 }
  0x8e   :  { %3493 = vmatmul.msk.bf16.gmra.mxu3 %vm112_vm1, %v4908_v15 }
  0x90   :  { %v363_v17 = vpop.f32.mrf.mxu2 }
  0x91   :  { %v4918_v18 = vadd.f32 %v363_v17, %v165_v14  ;;  %v432_v19 = vpop.f32.mrf.mxu3  ;;  %v167_v20 = vpop.f32.mrf.mxu0  ;;  %v4469_v14 = vld [vmem:[%s7500_s1 + $0x94] sm:$0xf] }
  0x92   :  { %v4920_v21 = vadd.f32 %v432_v19, %v234_v16  ;;  %v236_v22 = vpop.f32.mrf.mxu1  ;;  %v3601_v16 = vld [vmem:[%s7500_s1 + $0x98] sm:$0x30] }
  0x93   :  { %v3604_v17 = vor.u32 %v4469_v14, %v3601_v16 }
  0x95   :  { %v961_v24 = vsel %vm149_vm0, %v3604_v17, 0 }
  0x96   :  { %1038 = vmatpush.bf16.msra.mxu1 %v961_v24 }
  0x98   :  { %v365_v25 = vpop.f32.mrf.mxu2 }
  0x99   :  { %v4930_v27 = vadd.f32 %v365_v25, %v167_v20  ;;  %v434_v28 = vpop.f32.mrf.mxu3  ;;  %v170_v29 = vpop.f32.mrf.mxu0 }
  0x9a   :  { %v4934_v31 = vadd.f32 %v434_v28, %v236_v22  ;;  %v239_v32 = vpop.f32.mrf.mxu1 }
  0x9c   :  { %3442 = vmatmul.msk.bf16.gmra.mxu0 %vm112_vm1, %v4928_v26 }
  0x9d   :  { %3454 = vmatmul.msk.bf16.gmra.mxu1 %vm112_vm1, %v4928_v26  ;;  %3482 = vmatmul.msk.bf16.gmra.mxu2 %vm112_vm1, %v4932_v30 }
  0x9e   :  { %3494 = vmatmul.msk.bf16.gmra.mxu3 %vm112_vm1, %v4932_v30 }
  0xa0   :  { %v368_v33 = vpop.f32.mrf.mxu2 }
  0xa1   :  { %v4944_v34 = vadd.f32 %v368_v33, %v170_v29  ;;  %v437_v35 = vpop.f32.mrf.mxu3  ;;  %v172_v36 = vpop.f32.mrf.mxu0  ;;  %v3599_v29 = vld [vmem:[%s7500_s1 + $0x90] sm:$0xf] }
  0xa2   :  { %v4946_v37 = vadd.f32 %v437_v35, %v239_v32  ;;  %v241_v38 = vpop.f32.mrf.mxu1  ;;  %v4470_v32 = vld [vmem:[%s7500_s1 + $0x94] sm:$0x30] }
  0xa3   :  { %v3600_v33 = vor.u32 %v4470_v32, %v3599_v29  ;;  %v56_v35 = vld [vmem:[%s7501_s0 + $0xb8] sm:$0xff] }
  0xa4   :  { %v5027_v46 = vpack.c.bf16 %v56_v35, %v55_v50 }
  0xa8   :  { %v370_v57 = vpop.f32.mrf.mxu2 }
  0xa9   :  { %v4979_v62 = vadd.f32 %v370_v57, %v172_v36  ;;  %v439_v63 = vpop.f32.mrf.mxu3  ;;  %v175_v0 = vpop.f32.mrf.mxu0  ;;  %v5019_v36 = vld [vmem:[%s7501_s0 + $0xc0] sm:$0xff] }
  0xaa   :  { %v4986_v8 = vadd.f32 %v439_v63, %v241_v38  ;;  %v244_v11 = vpop.f32.mrf.mxu1  ;;  %v958_v38 = vsel %vm149_vm0, %v3600_v33, 0  ;;  %v5023_v40 = vpack.c.bf16 %v5019_v36, %v56_v35 }
  0xab   :  { %969 = vmatpush.bf16.msra.mxu0 %v958_v38 }
  0xac   :  { %3443 = vmatmul.msk.bf16.gmra.mxu0 %vm112_vm1, %v4968_v58 }
  0xad   :  { %3455 = vmatmul.msk.bf16.gmra.mxu1 %vm112_vm1, %v4968_v58  ;;  %3483 = vmatmul.msk.bf16.gmra.mxu2 %vm112_vm1, %v4981_v3 }
  0xae   :  { %3495 = vmatmul.msk.bf16.gmra.mxu3 %vm112_vm1, %v4981_v3 }
  0xb0   :  { %v373_v19 = vpop.f32.mrf.mxu2 }
  0xb1   :  { %v5002_v20 = vadd.f32 %v373_v19, %v175_v0  ;;  %v442_v22 = vpop.f32.mrf.mxu3  ;;  %v177_v23 = vpop.f32.mrf.mxu0 }
  0xb2   :  { %v5005_v25 = vadd.f32 %v442_v22, %v244_v11  ;;  %v246_v28 = vpop.f32.mrf.mxu1 }
  0xb8   :  { %v375_v39 = vpop.f32.mrf.mxu2 }
  0xb9   :  { %v5025_v41 = vadd.f32 %v375_v39, %v177_v23  ;;  %v444_v42 = vpop.f32.mrf.mxu3  ;;  %v180_v45 = vpop.f32.mrf.mxu0 }
  0xba   :  { %v5029_v49 = vadd.f32 %v444_v42, %v246_v28  ;;  %v249_v53 = vpop.f32.mrf.mxu1 }
  0xbc   :  { %3444 = vmatmul.msk.bf16.gmra.mxu0 %vm112_vm1, %v5023_v40 }
  0xbd   :  { %3456 = vmatmul.msk.bf16.gmra.mxu1 %vm112_vm1, %v5023_v40  ;;  %3484 = vmatmul.msk.bf16.gmra.mxu2 %vm112_vm1, %v5027_v46 }
  0xbe   :  { %3496 = vmatmul.msk.bf16.gmra.mxu3 %vm112_vm1, %v5027_v46 }
  0xc0   :  { %v378_v54 = vpop.f32.mrf.mxu2 }
  0xc1   :  { %v5039_v57 = vadd.f32 %v378_v54, %v180_v45  ;;  %v447_v50 = vpop.f32.mrf.mxu3  ;;  %v182_v59 = vpop.f32.mrf.mxu0 }
  0xc2   :  { %v5041_v60 = vadd.f32 %v447_v50, %v249_v53  ;;  %v251_v61 = vpop.f32.mrf.mxu1 }
  0xc8   :  { %v380_v63 = vpop.f32.mrf.mxu2 }
  0xc9   :  { %v5043_v0 = vadd.f32 %v380_v63, %v182_v59  ;;  %v449_v4 = vpop.f32.mrf.mxu3  ;;  %v185_v7 = vpop.f32.mrf.mxu0 }
  0xca   :  { %v5045_v11 = vadd.f32 %v449_v4, %v251_v61  ;;  %v254_v12 = vpop.f32.mrf.mxu1 }
  0xcc   :  { %3517 = vmatmul.msk.bf16.vlgmr.msrb.gmra.mxu0 %vm112_vm1, %v4770_v44 }
  0xcd   :  { %3529 = vmatmul.msk.bf16.vlgmr.msrb.gmra.mxu1 %vm112_vm1, %v4770_v44  ;;  %3561 = vmatmul.msk.bf16.vlgmr.msrb.gmra.mxu2 %vm112_vm1, %v4768_v43 }
  0xce   :  { %3573 = vmatmul.msk.bf16.vlgmr.msrb.gmra.mxu3 %vm112_vm1, %v4768_v43 }
  0xd0   :  { %v383_v14 = vpop.f32.mrf.mxu2 }
  0xd1   :  { %v5055_v16 = vadd.f32 %v383_v14, %v185_v7  ;;  %v452_v17 = vpop.f32.mrf.mxu3  ;;  %v187_v19 = vpop.f32.mrf.mxu0 }
  0xd2   :  { %v5057_v22 = vadd.f32 %v452_v17, %v254_v12  ;;  %v256_v23 = vpop.f32.mrf.mxu1 }
  0xd8   :  { %v385_v24 = vpop.f32.mrf.mxu2 }
  0xd9   :  { %v5059_v28 = vadd.f32 %v385_v24, %v187_v19  ;;  %v454_v29 = vpop.f32.mrf.mxu3  ;;  %v190_v32 = vpop.f32.mrf.mxu0 }
  0xda   :  { %v5061_v44 = vadd.f32 %v454_v29, %v256_v23  ;;  %v259_v33 = vpop.f32.mrf.mxu1 }
  0xdc   :  { %3518 = vmatmul.msk.bf16.gmra.mxu0 %vm112_vm1, %v4788_v48 }
  0xdd   :  { %3530 = vmatmul.msk.bf16.gmra.mxu1 %vm112_vm1, %v4788_v48  ;;  %3562 = vmatmul.msk.bf16.gmra.mxu2 %vm112_vm1, %v4786_v47 }
  0xde   :  { %3574 = vmatmul.msk.bf16.gmra.mxu3 %vm112_vm1, %v4786_v47 }
  0xe0   :  { %v388_v43 = vpop.f32.mrf.mxu2 }
  0xe1   :  { %v5071_v35 = vadd.f32 %v388_v43, %v190_v32  ;;  %v457_v38 = vpop.f32.mrf.mxu3  ;;  %v192_v39 = vpop.f32.mrf.mxu0 }
  0xe2   :  { %v5073_v42 = vadd.f32 %v457_v38, %v259_v33  ;;  %v261_v45 = vpop.f32.mrf.mxu1 }
  0xe8   :  { %v390_v53 = vpop.f32.mrf.mxu2 }
  0xe9   :  { %v5075_v54 = vadd.f32 %v390_v53, %v192_v39  ;;  %v459_v50 = vpop.f32.mrf.mxu3  ;;  %v195_v59 = vpop.f32.mrf.mxu0 }
  0xea   :  { %v5077_v61 = vadd.f32 %v459_v50, %v261_v45  ;;  %v264_v63 = vpop.f32.mrf.mxu1 }
  0xec   :  { %3519 = vmatmul.msk.bf16.gmra.mxu0 %vm112_vm1, %v4806_v52 }
  0xed   :  { %3531 = vmatmul.msk.bf16.gmra.mxu1 %vm112_vm1, %v4806_v52  ;;  %3563 = vmatmul.msk.bf16.gmra.mxu2 %vm112_vm1, %v4804_v51 }
  0xee   :  { %3575 = vmatmul.msk.bf16.gmra.mxu3 %vm112_vm1, %v4804_v51 }
  0xf0   :  { %v393_v47 = vpop.f32.mrf.mxu2 }
  0xf1   :  { %v5087_v4 = vadd.f32 %v393_v47, %v195_v59  ;;  %v462_v7 = vpop.f32.mrf.mxu3  ;;  %v197_v12 = vpop.f32.mrf.mxu0 }
  0xf2   :  { %v5089_v14 = vadd.f32 %v462_v7, %v264_v63  ;;  %v266_v17 = vpop.f32.mrf.mxu1 }
  0xf8   :  { %v395_v19 = vpop.f32.mrf.mxu2 }
  0xf9   :  { %v5091_v23 = vadd.f32 %v395_v19, %v197_v12  ;;  %v464_v24 = vpop.f32.mrf.mxu3  ;;  %v200_v29 = vpop.f32.mrf.mxu0 }
  0xfa   :  { %v5093_v32 = vadd.f32 %v464_v24, %v266_v17  ;;  %v269_v33 = vpop.f32.mrf.mxu1  ;;  %v3593_v17 = vld [vmem:[%s7500_s1 + $0x88] sm:$0xf0] }
  0xfc   :  { %3520 = vmatmul.msk.bf16.gmra.mxu0 %vm112_vm1, %v4824_v56 }
  0xfd   :  { %3532 = vmatmul.msk.bf16.gmra.mxu1 %vm112_vm1, %v4824_v56  ;;  %3564 = vmatmul.msk.bf16.gmra.mxu2 %vm112_vm1, %v4822_v55 }
  0xfe   :  { %3576 = vmatmul.msk.bf16.gmra.mxu3 %vm112_vm1, %v4822_v55  ;;  %v4467_v55 = vld [vmem:[%s7500_s1 + $0x84] sm:$0xf] }
  0xff   :  { %v3596_v19 = vor.u32 %v4467_v55, %v3593_v17 }
 0x100   :  { %v398_v51 = vpop.f32.mrf.mxu2 }
 0x101   :  { %v5103_v43 = vadd.f32 %v398_v51, %v200_v29  ;;  %v467_v38 = vpop.f32.mrf.mxu3  ;;  %v202_v39 = vpop.f32.mrf.mxu0  ;;  %1039 = vmatpush.bf16.msra.mxu1 %v3596_v19 }
 0x102   :  { %v5105_v45 = vadd.f32 %v467_v38, %v269_v33  ;;  %v271_v53 = vpop.f32.mrf.mxu1 }
 0x108   :  { %v400_v50 = vpop.f32.mrf.mxu2 }
 0x109   :  { %v5107_v59 = vadd.f32 %v400_v50, %v202_v39  ;;  %v469_v63 = vpop.f32.mrf.mxu3  ;;  %v205_v47 = vpop.f32.mrf.mxu0 }
 0x10a   :  { %v5109_v7 = vadd.f32 %v469_v63, %v271_v53  ;;  %v274_v12 = vpop.f32.mrf.mxu1  ;;  %v4468_v53 = vld [vmem:[%s7500_s1 + $0x84] sm:$0xf0] }
 0x10c   :  { %3521 = vmatmul.msk.bf16.gmra.mxu0 %vm112_vm1, %v4854_v2 }
 0x10d   :  { %3533 = vmatmul.msk.bf16.gmra.mxu1 %vm112_vm1, %v4854_v2  ;;  %3565 = vmatmul.msk.bf16.gmra.mxu2 %vm112_vm1, %v4852_v1 }
 0x10e   :  { %3577 = vmatmul.msk.bf16.gmra.mxu3 %vm112_vm1, %v4852_v1  ;;  %v3591_v1 = vld [vmem:[%s7500_s1 + $0x80] sm:$0xf] }
 0x10f   :  { %v3592_v50 = vor.u32 %v4468_v53, %v3591_v1 }
 0x110   :  { %v403_v24 = vpop.f32.mrf.mxu2 }
 0x111   :  { %v5125_v29 = vadd.f32 %v403_v24, %v205_v47  ;;  %v472_v33 = vpop.f32.mrf.mxu3  ;;  %v207_v51 = vpop.f32.mrf.mxu0  ;;  %970 = vmatpush.bf16.msra.mxu0 %v3592_v50 }
 0x112   :  { %v5127_v38 = vadd.f32 %v472_v33, %v274_v12  ;;  %v276_v39 = vpop.f32.mrf.mxu1 }
 0x118   :  { %v405_v63 = vpop.f32.mrf.mxu2 }
 0x119   :  { %v5135_v55 = vadd.f32 %v405_v63, %v207_v51  ;;  %v474_v47 = vpop.f32.mrf.mxu3  ;;  %v210_v17 = vpop.f32.mrf.mxu0 }
 0x11a   :  { %v5137_v24 = vadd.f32 %v474_v47, %v276_v39  ;;  %v279_v12 = vpop.f32.mrf.mxu1 }
 0x11b   :  { %7520 = vst [vmem:[#allocation5_spill] sm:$0xff] %v5135_v55 }
 0x11c   :  { %7521 = vst [vmem:[#allocation6_spill] sm:$0xff] %v5137_v24  ;;  %3522 = vmatmul.msk.bf16.gmra.mxu0 %vm112_vm1, %v4872_v6 }
 0x11d   :  { %3534 = vmatmul.msk.bf16.gmra.mxu1 %vm112_vm1, %v4872_v6  ;;  %3566 = vmatmul.msk.bf16.gmra.mxu2 %vm112_vm1, %v4870_v5 }
 0x11e   :  { %3578 = vmatmul.msk.bf16.gmra.mxu3 %vm112_vm1, %v4870_v5 }
 0x120   :  { %v408_v19 = vpop.f32.mrf.mxu2 }
 0x121   :  { %v5147_v33 = vadd.f32 %v408_v19, %v210_v17  ;;  %v477_v51 = vpop.f32.mrf.mxu3  ;;  %v212_v1 = vpop.f32.mrf.mxu0 }
 0x122   :  { %v5149_v39 = vadd.f32 %v477_v51, %v279_v12  ;;  %v281_v53 = vpop.f32.mrf.mxu1 }
 0x128   :  { %v410_v50 = vpop.f32.mrf.mxu2 }
 0x129   :  { %v5151_v63 = vadd.f32 %v410_v50, %v212_v1  ;;  %v479_v47 = vpop.f32.mrf.mxu3  ;;  %v215_v24 = vpop.f32.mrf.mxu0 }
 0x12a   :  { %v5153_v55 = vadd.f32 %v479_v47, %v281_v53  ;;  %v284_v6 = vpop.f32.mrf.mxu1 }
 0x12b   :  { %7522 = vst [vmem:[#allocation7_spill] sm:$0xff] %v5151_v63 }
 0x12c   :  { %7523 = vst [vmem:[#allocation8_spill] sm:$0xff] %v5153_v55  ;;  %3523 = vmatmul.msk.bf16.gmra.mxu0 %vm112_vm1, %v4890_v10 }
 0x12d   :  { %3535 = vmatmul.msk.bf16.gmra.mxu1 %vm112_vm1, %v4890_v10  ;;  %3567 = vmatmul.msk.bf16.gmra.mxu2 %vm112_vm1, %v4888_v9 }
 0x12e   :  { %3579 = vmatmul.msk.bf16.gmra.mxu3 %vm112_vm1, %v4888_v9 }
 0x130   :  { %v413_v5 = vpop.f32.mrf.mxu2 }
 0x131   :  { %v5163_v17 = vadd.f32 %v413_v5, %v215_v24  ;;  %v482_v12 = vpop.f32.mrf.mxu3  ;;  %v217_v19 = vpop.f32.mrf.mxu0 }
 0x132   :  { %v5165_v51 = vadd.f32 %v482_v12, %v284_v6  ;;  %v286_v1 = vpop.f32.mrf.mxu1 }
 0x134   :  { %7524 = vst [vmem:[#allocation9_spill] sm:$0xff] %v5165_v51 }
 0x138   :  { %v415_v53 = vpop.f32.mrf.mxu2 }
 0x139   :  { %v5167_v50 = vadd.f32 %v415_v53, %v217_v19  ;;  %v484_v47 = vpop.f32.mrf.mxu3  ;;  %v220_v55 = vpop.f32.mrf.mxu0 }
 0x13a   :  { %v5169_v63 = vadd.f32 %v484_v47, %v286_v1  ;;  %v289_v10 = vpop.f32.mrf.mxu1 }
 0x13b   :  { %7525 = vst [vmem:[#allocation10_spill] sm:$0xff] %v5167_v50 }
 0x13c   :  { %7526 = vst [vmem:[#allocation11_spill] sm:$0xff] %v5169_v63  ;;  %3524 = vmatmul.msk.bf16.gmra.mxu0 %vm112_vm1, %v4908_v15 }
 0x13d   :  { %3536 = vmatmul.msk.bf16.gmra.mxu1 %vm112_vm1, %v4908_v15  ;;  %3568 = vmatmul.msk.bf16.gmra.mxu2 %vm112_vm1, %v4906_v13 }
 0x13e   :  { %3580 = vmatmul.msk.bf16.gmra.mxu3 %vm112_vm1, %v4906_v13 }
 0x140   :  { %v418_v6 = vpop.f32.mrf.mxu2 }
 0x141   :  { %v5179_v9 = vadd.f32 %v418_v6, %v220_v55  ;;  %v487_v24 = vpop.f32.mrf.mxu3  ;;  %v222_v5 = vpop.f32.mrf.mxu0 }
 0x142   :  { %v5181_v12 = vadd.f32 %v487_v24, %v289_v10  ;;  %v291_v19 = vpop.f32.mrf.mxu1 }
 0x148   :  { %v420_v1 = vpop.f32.mrf.mxu2 }
 0x149   :  { %v5183_v53 = vadd.f32 %v420_v1, %v222_v5  ;;  %v489_v47 = vpop.f32.mrf.mxu3  ;;  %v534_v63 = vpop.f32.mrf.mxu0 }
 0x14a   :  { %v5185_v50 = vadd.f32 %v489_v47, %v291_v19  ;;  %v663_v15 = vadd.f32 %v534_v63, %v4918_v18  ;;  %v603_v51 = vpop.f32.mrf.mxu1 }
 0x14b   :  { %v664_v13 = vadd.f32 %v603_v51, %v4920_v21 }
 0x14c   :  { %3525 = vmatmul.msk.bf16.gmra.mxu0 %vm112_vm1, %v4932_v30 }
 0x14d   :  { %3537 = vmatmul.msk.bf16.gmra.mxu1 %vm112_vm1, %v4932_v30  ;;  %3569 = vmatmul.msk.bf16.gmra.mxu2 %vm112_vm1, %v4928_v26 }
 0x14e   :  { %3581 = vmatmul.msk.bf16.gmra.mxu3 %vm112_vm1, %v4928_v26 }
 0x150   :  { %v753_v10 = vpop.f32.mrf.mxu2 }
 0x151   :  { %v5197_v55 = vadd.f32 %v753_v10, %v663_v15  ;;  %v822_v6 = vpop.f32.mrf.mxu3  ;;  %v536_v18 = vpop.f32.mrf.mxu0 }
 0x152   :  { %v5199_v63 = vadd.f32 %v822_v6, %v664_v13  ;;  %v5202_v21 = vadd.f32 %v536_v18, %v4930_v27  ;;  %v605_v51 = vpop.f32.mrf.mxu1  ;;  %v5253_v6 = vld [vmem:[%s7501_s0 + $0xd0] sm:$0xff] }
 0x153   :  { %v5205_v24 = vadd.f32 %v605_v51, %v4934_v31 }
 0x159   :  { %v539_v5 = vpop.f32.mrf.mxu0 }
 0x15a   :  { %v5208_v19 = vadd.f32 %v539_v5, %v4944_v34  ;;  %v608_v1 = vpop.f32.mrf.mxu1 }
 0x15b   :  { %v5211_v26 = vadd.f32 %v608_v1, %v4946_v37 }
 0x15c   :  { %3526 = vmatmul.msk.bf16.gmra.mxu0 %vm112_vm1, %v4981_v3 }
 0x15d   :  { %3538 = vmatmul.msk.bf16.gmra.mxu1 %vm112_vm1, %v4981_v3  ;;  %3570 = vmatmul.msk.bf16.gmra.mxu2 %vm112_vm1, %v4968_v58 }
 0x15e   :  { %3582 = vmatmul.msk.bf16.gmra.mxu3 %vm112_vm1, %v4968_v58 }
 0x161   :  { %v541_v15 = vpop.f32.mrf.mxu0 }
 0x162   :  { %v5222_v27 = vadd.f32 %v541_v15, %v4979_v62  ;;  %v610_v31 = vpop.f32.mrf.mxu1 }
 0x163   :  { %v5225_v34 = vadd.f32 %v610_v31, %v4986_v8 }
 0x169   :  { %v544_v37 = vpop.f32.mrf.mxu0 }
 0x16a   :  { %v5228_v47 = vadd.f32 %v544_v37, %v5002_v20  ;;  %v613_v13 = vpop.f32.mrf.mxu1 }
 0x16b   :  { %v5231_v10 = vadd.f32 %v613_v13, %v5005_v25  ;;  %v58_v25 = vld [vmem:[%s7501_s0 + $0xc8] sm:$0xff] }
 0x16c   :  { %3527 = vmatmul.msk.bf16.gmra.mxu0 %vm112_vm1, %v5027_v46  ;;  %v5256_v18 = vpack.c.bf16 %v58_v25, %v5019_v36 }
 0x16d   :  { %3539 = vmatmul.msk.bf16.gmra.mxu1 %vm112_vm1, %v5027_v46  ;;  %3571 = vmatmul.msk.bf16.gmra.mxu2 %vm112_vm1, %v5023_v40 }
 0x16e   :  { %3583 = vmatmul.msk.bf16.gmra.mxu3 %vm112_vm1, %v5023_v40 }
 0x171   :  { %v546_v58 = vpop.f32.mrf.mxu0 }
 0x172   :  { %v5242_v62 = vadd.f32 %v546_v58, %v5025_v41  ;;  %v615_v8 = vpop.f32.mrf.mxu1  ;;  %v711_v41 = vpack.c.bf16 %v5253_v6, %v58_v25 }
 0x173   :  { %v5245_v20 = vadd.f32 %v615_v8, %v5029_v49 }
 0x179   :  { %v549_v40 = vpop.f32.mrf.mxu0 }
 0x17a   :  { %v5260_v51 = vadd.f32 %v549_v40, %v5039_v57  ;;  %v618_v49 = vpop.f32.mrf.mxu1 }
 0x17b   :  { %v5263_v5 = vadd.f32 %v618_v49, %v5041_v60 }
 0x17c   :  { %3528 = vmatmul.msk.bf16.gmra.mxu0 %vm112_vm1, %v5256_v18 }
 0x17d   :  { %3540 = vmatmul.msk.bf16.gmra.mxu1 %vm112_vm1, %v5256_v18  ;;  %3572 = vmatmul.msk.bf16.gmra.mxu2 %vm112_vm1, %v711_v41 }
 0x17e   :  { %3584 = vmatmul.msk.bf16.gmra.mxu3 %vm112_vm1, %v711_v41 }
 0x181   :  { %v551_v36 = vpop.f32.mrf.mxu0 }
 0x182   :  { %v5272_v1 = vadd.f32 %v551_v36, %v5043_v0  ;;  %v620_v57 = vpop.f32.mrf.mxu1 }
 0x183   :  { %v5275_v15 = vadd.f32 %v620_v57, %v5045_v11 }
 0x189   :  { %v554_v60 = vpop.f32.mrf.mxu0 }
 0x18a   :  { %v5278_v31 = vadd.f32 %v554_v60, %v5055_v16  ;;  %v623_v37 = vpop.f32.mrf.mxu1 }
 0x18b   :  { %v5281_v13 = vadd.f32 %v623_v37, %v5057_v22 }
 0x18c   :  { %3605 = vmatmul.msk.bf16.vlgmr.msra.gmra.mxu0 %vm112_vm1, %v4788_v48 }
 0x18d   :  { %3617 = vmatmul.msk.bf16.vlgmr.msra.gmra.mxu1 %vm112_vm1, %v4788_v48 }
 0x191   :  { %v556_v0 = vpop.f32.mrf.mxu0 }
 0x192   :  { %v5288_v58 = vadd.f32 %v556_v0, %v5059_v28  ;;  %v625_v11 = vpop.f32.mrf.mxu1 }
 0x193   :  { %v5291_v8 = vadd.f32 %v625_v11, %v5061_v44 }
 0x199   :  { %v559_v16 = vpop.f32.mrf.mxu0 }
 0x19a   :  { %v5294_v25 = vadd.f32 %v559_v16, %v5071_v35  ;;  %v628_v22 = vpop.f32.mrf.mxu1 }
 0x19b   :  { %v5297_v40 = vadd.f32 %v628_v22, %v5073_v42  ;;  %v7527_v22 = vld [vmem:[#allocation2_spill] sm:$0xff] }
 0x19c   :  { %3606 = vmatmul.msk.bf16.gmra.mxu0 %vm112_vm1, %v4806_v52 }
 0x19d   :  { %3618 = vmatmul.msk.bf16.gmra.mxu1 %vm112_vm1, %v4806_v52 }
 0x1a1   :  { %v561_v48 = vpop.f32.mrf.mxu0 }
 0x1a2   :  { %v5304_v28 = vadd.f32 %v561_v48, %v5075_v54  ;;  %v630_v44 = vpop.f32.mrf.mxu1 }
 0x1a3   :  { %v5307_v41 = vadd.f32 %v630_v44, %v5077_v61  ;;  %v7529_v44 = vld [vmem:[#allocation6_spill] sm:$0xff] }
 0x1a9   :  { %v564_v35 = vpop.f32.mrf.mxu0 }
 0x1aa   :  { %v5310_v49 = vadd.f32 %v564_v35, %v5087_v4  ;;  %v633_v42 = vpop.f32.mrf.mxu1 }
 0x1ab   :  { %v5313_v36 = vadd.f32 %v633_v42, %v5089_v14 }
 0x1ac   :  { %3607 = vmatmul.msk.bf16.gmra.mxu0 %vm112_vm1, %v4824_v56 }
 0x1ad   :  { %3619 = vmatmul.msk.bf16.gmra.mxu1 %vm112_vm1, %v4824_v56 }
 0x1b1   :  { %v566_v52 = vpop.f32.mrf.mxu0 }
 0x1b2   :  { %v5320_v54 = vadd.f32 %v566_v52, %v5091_v23  ;;  %v635_v61 = vpop.f32.mrf.mxu1 }
 0x1b3   :  { %v5323_v57 = vadd.f32 %v635_v61, %v5093_v32  ;;  %v7533_v61 = vld [vmem:[#allocation3_spill] sm:$0xff] }
 0x1b9   :  { %v569_v4 = vpop.f32.mrf.mxu0 }
 0x1ba   :  { %v5326_v60 = vadd.f32 %v569_v4, %v5103_v43  ;;  %v638_v14 = vpop.f32.mrf.mxu1  ;;  %v755_v4 = vpop.f32.mrf.mxu2 }
 0x1bb   :  { %v5329_v37 = vadd.f32 %v638_v14, %v5105_v45 }
 0x1bc   :  { %3608 = vmatmul.msk.bf16.gmra.mxu0 %vm112_vm1, %v4854_v2 }
 0x1bd   :  { %3620 = vmatmul.msk.bf16.gmra.mxu1 %vm112_vm1, %v4854_v2 }
 0x1c1   :  { %v571_v56 = vpop.f32.mrf.mxu0 }
 0x1c2   :  { %v5336_v23 = vadd.f32 %v571_v56, %v5107_v59  ;;  %v640_v32 = vpop.f32.mrf.mxu1  ;;  %v7528_v59 = vld [vmem:[#allocation5_spill] sm:$0xff]  ;;  %v824_v56 = vpop.f32.mrf.mxu3 }
 0x1c3   :  { %v5339_v0 = vadd.f32 %v640_v32, %v5109_v7  ;;  %v7534_v32 = vld [vmem:[#allocation7_spill] sm:$0xff] }
 0x1c9   :  { %v574_v43 = vpop.f32.mrf.mxu0 }
 0x1ca   :  { %v5342_v11 = vadd.f32 %v574_v43, %v5125_v29  ;;  %v643_v45 = vpop.f32.mrf.mxu1 }
 0x1cb   :  { %v5345_v16 = vadd.f32 %v643_v45, %v5127_v38 }
 0x1cc   :  { %3609 = vmatmul.msk.bf16.gmra.mxu0 %vm112_vm1, %v7527_v22 }
 0x1cd   :  { %3621 = vmatmul.msk.bf16.gmra.mxu1 %vm112_vm1, %v7527_v22  ;;  %v7536_v22 = vld [vmem:[#allocation8_spill] sm:$0xff] }
 0x1d1   :  { %v576_v2 = vpop.f32.mrf.mxu0 }
 0x1d2   :  { %v5352_v48 = vadd.f32 %v576_v2, %v7528_v59  ;;  %v645_v7 = vpop.f32.mrf.mxu1 }
 0x1d3   :  { %v5355_v35 = vadd.f32 %v645_v7, %v7529_v44  ;;  %v5376_v7 = vpop.f32.mrf.mxu2  ;;  %v7539_v44 = vld [vmem:[#allocation9_spill] sm:$0xff] }
 0x1d5   :  { %7530 = vst [vmem:[#allocation2_spill] sm:$0xff] %v5355_v35 }
 0x1d9   :  { %v579_v29 = vpop.f32.mrf.mxu0 }
 0x1da   :  { %v5358_v42 = vadd.f32 %v579_v29, %v5147_v33  ;;  %v648_v38 = vpop.f32.mrf.mxu1 }
 0x1db   :  { %v5361_v52 = vadd.f32 %v648_v38, %v5149_v39  ;;  %v5381_v38 = vpop.f32.mrf.mxu3 }
 0x1dc   :  { %7531 = vst [vmem:[#allocation5_spill] sm:$0xff] %v5358_v42  ;;  %3610 = vmatmul.msk.bf16.gmra.mxu0 %vm112_vm1, %v7533_v61 }
 0x1dd   :  { %7532 = vst [vmem:[#allocation6_spill] sm:$0xff] %v5361_v52  ;;  %3622 = vmatmul.msk.bf16.gmra.mxu1 %vm112_vm1, %v7533_v61  ;;  %v7541_v61 = vld [vmem:[#allocation4_spill] sm:$0xff] }
 0x1e1   :  { %v581_v14 = vpop.f32.mrf.mxu0 }
 0x1e2   :  { %v5368_v43 = vadd.f32 %v581_v14, %v7534_v32  ;;  %v650_v45 = vpop.f32.mrf.mxu1  ;;  %v7542_v32 = vld [vmem:[#allocation10_spill] sm:$0xff] }
 0x1e3   :  { %v5371_v33 = vadd.f32 %v650_v45, %v7536_v22  ;;  %v7544_v22 = vld [vmem:[#allocation11_spill] sm:$0xff] }
 0x1e4   :  { %7535 = vst [vmem:[#allocation3_spill] sm:$0xff] %v5368_v43 }
 0x1e5   :  { %7537 = vst [vmem:[#allocation7_spill] sm:$0xff] %v5371_v33 }
 0x1e9   :  { %v584_v2 = vpop.f32.mrf.mxu0 }
 0x1ea   :  { %v5374_v39 = vadd.f32 %v584_v2, %v5163_v17  ;;  %v653_v59 = vpop.f32.mrf.mxu1 }
 0x1eb   :  { %v5379_v29 = vadd.f32 %v653_v59, %v7539_v44  ;;  %v5395_v59 = vpop.f32.mrf.mxu3 }
 0x1ec   :  { %7538 = vst [vmem:[#allocation8_spill] sm:$0xff] %v5374_v39  ;;  %3611 = vmatmul.msk.bf16.gmra.mxu0 %vm112_vm1, %v7541_v61  ;;  %v5393_v39 = vpop.f32.mrf.mxu2 }
 0x1ed   :  { %7540 = vst [vmem:[#allocation9_spill] sm:$0xff] %v5379_v29  ;;  %3623 = vmatmul.msk.bf16.gmra.mxu1 %vm112_vm1, %v7541_v61 }
 0x1f1   :  { %v586_v14 = vpop.f32.mrf.mxu0 }
 0x1f2   :  { %v5388_v45 = vadd.f32 %v586_v14, %v7542_v32  ;;  %v655_v17 = vpop.f32.mrf.mxu1 }
 0x1f3   :  { %v5391_v2 = vadd.f32 %v655_v17, %v7544_v22  ;;  %v5409_v14 = vpop.f32.mrf.mxu3 }
 0x1f4   :  { %7543 = vst [vmem:[#allocation4_spill] sm:$0xff] %v5388_v45  ;;  %v5407_v61 = vpop.f32.mrf.mxu2 }
 0x1f5   :  { %7545 = vst [vmem:[#allocation10_spill] sm:$0xff] %v5391_v2 }
 0x1f9   :  { %v589_v44 = vpop.f32.mrf.mxu0 }
 0x1fa   :  { %v5398_v29 = vadd.f32 %v589_v44, %v5179_v9  ;;  %v658_v33 = vpop.f32.mrf.mxu1 }
 0x1fb   :  { %v5401_v43 = vadd.f32 %v658_v33, %v5181_v12  ;;  %v3717_v12 = vld [vmem:[%s7502_s3 + $0x160] sm:$0xf]  ;;  %v3773_v33 = vld [vmem:[%s7502_s3 + $0x1d0] sm:$0xf]  ;;  %v834_v2 = vpop.f32.mrf.mxu3 }
 0x1fc   :  { %7546 = vst [vmem:[#allocation11_spill] sm:$0xff] %v5398_v29  ;;  %3612 = vmatmul.msk.bf16.gmra.mxu0 %vm112_vm1, %v4932_v30 }
 0x1fd   :  { %7547 = vst [vmem:[#allocation12_spill] sm:$0xff] %v5401_v43  ;;  %3624 = vmatmul.msk.bf16.gmra.mxu1 %vm112_vm1, %v4932_v30  ;;  %v4516_v30 = vld [vmem:[%s7502_s3 + $0x164] sm:$0xf0] }
 0x1fe   :  { %v3718_v44 = vor.u32 %v4516_v30, %v3717_v12 }
 0x200   :  { %1633 = vmatpush.bf16.msra.mxu2 %v3718_v44  ;;  %v885_v44 = vadd.f32 %v824_v56, %v5205_v24  ;;  %v3709_v56 = vld [vmem:[%s7502_s3 + $0x150] sm:$0xf] }
 0x201   :  { %v591_v32 = vpop.f32.mrf.mxu0 }
 0x202   :  { %v5412_v17 = vadd.f32 %v591_v32, %v5183_v53  ;;  %v660_v9 = vpop.f32.mrf.mxu1  ;;  %v4530_v53 = vld [vmem:[%s7502_s3 + $0x1d4] sm:$0xf0]  ;;  %v4630_v32 = vmov 65535  }
 0x203   :  { %v5415_v22 = vadd.f32 %v660_v9, %v5185_v50  ;;  %v3774_v50 = vor.u32 %v4530_v53, %v3773_v33  ;;  %v1625_v9 = vsel %vm1623_vm2, 4294967295, %v4630_v32  ;;  %v884_v33 = vadd.f32 %v755_v4, %v5202_v21 }
 0x204   :  { %7548 = vst [vmem:[#allocation13_spill] sm:$0xff] %v5412_v17  ;;  %v765_v17 = vpop.f32.mrf.mxu2 }
 0x205   :  { %7549 = vst [vmem:[#allocation14_spill] sm:$0xff] %v5415_v22  ;;  %v5429_v22 = vsel %vm1624_vm3, %v1625_v9, 0 }
 0x206   :  { %v1628_v43 = vand.u32 %v3774_v50, %v5429_v22 }
 0x208   :  { %1663 = vmatpush.bf16.msra.mxu3 %v1628_v43 }
 0x209   :  { %v972_v29 = vpop.f32.mrf.mxu0 }
 0x20a   :  { %v1101_v45 = vadd.f32 %v972_v29, %v5197_v55  ;;  %v1041_v12 = vpop.f32.mrf.mxu1  ;;  %v5442_v29 = vpop.f32.mrf.mxu3 }
 0x20b   :  { %v1102_v30 = vadd.f32 %v1041_v12, %v5199_v63 }
 0x20c   :  { %3613 = vmatmul.msk.bf16.gmra.mxu0 %vm112_vm1, %v4981_v3  ;;  %v5440_v9 = vpop.f32.mrf.mxu2 }
 0x20d   :  { %3625 = vmatmul.msk.bf16.gmra.mxu1 %vm112_vm1, %v4981_v3  ;;  %v1151_v43 = vsel %vm1150_vm4, %v1102_v30, -inf }
 0x211   :  { %v974_v53 = vpop.f32.mrf.mxu0 }
 0x212   :  { %v1103_v50 = vadd.f32 %v974_v53, %v884_v33  ;;  %v1043_v32 = vpop.f32.mrf.mxu1  ;;  %v5462_v30 = vpop.f32.mrf.mxu3  ;;  %v4528_v53 = vld [vmem:[%s7502_s3 + $0x1c4] sm:$0xf0] }
 0x213   :  { %v1104_v55 = vadd.f32 %v1043_v32, %v885_v44  ;;  %v3765_v44 = vld [vmem:[%s7502_s3 + $0x1c0] sm:$0xf]  ;;  %v886_v32 = vadd.f32 %v5376_v7, %v5208_v19 }
 0x214   :  { %v5444_v63 = vmax.f32 %v1101_v45, %v1103_v50  ;;  %v5452_v24 = vpop.f32.mrf.mxu2  ;;  %v4514_v45 = vld [vmem:[%s7502_s3 + $0x154] sm:$0xf0]  ;;  %v3766_v50 = vor.u32 %v4528_v53, %v3765_v44 }
 0x215   :  { %v1152_v12 = vsel %vm1150_vm4, %v1104_v55, -inf  ;;  %v3710_v33 = vor.u32 %v4514_v45, %v3709_v56  ;;  %v888_v55 = vadd.f32 %v5393_v39, %v5222_v27 }
 0x216   :  { %v5448_v3 = vmax.f32 %v1151_v43, %v1152_v12  ;;  %v889_v43 = vadd.f32 %v5395_v59, %v5225_v34  ;;  %1664 = vmatpush.bf16.msra.mxu3 %v3766_v50  ;;  %v892_v59 = vadd.f32 %v765_v17, %v5242_v62 }
 0x217   :  { %1634 = vmatpush.bf16.msra.mxu2 %v3710_v33 }
 0x218   :  { %7550 = vst [vmem:[#allocation15_spill] sm:$0xff] %v5448_v3 }
 0x219   :  { %v977_v21 = vpop.f32.mrf.mxu0 }
 0x21a   :  { %v1046_v4 = vpop.f32.mrf.mxu1  ;;  %v1105_v45 = vadd.f32 %v977_v21, %v886_v32  ;;  %v5488_v39 = vpop.f32.mrf.mxu3 }
 0x21c   :  { %3614 = vmatmul.msk.bf16.gmra.mxu0 %vm112_vm1, %v5027_v46  ;;  %v5486_v34 = vpop.f32.mrf.mxu2 }
 0x21d   :  { %3626 = vmatmul.msk.bf16.gmra.mxu1 %vm112_vm1, %v5027_v46  ;;  %v887_v46 = vadd.f32 %v5381_v38, %v5211_v26 }
 0x21f   :  { %v1106_v12 = vadd.f32 %v1046_v4, %v887_v46 }
 0x221   :  { %v979_v56 = vpop.f32.mrf.mxu0  ;;  %v1155_v26 = vsel %vm1150_vm4, %v1106_v12, -inf }
 0x222   :  { %v1107_v42 = vadd.f32 %v979_v56, %v888_v55  ;;  %v1048_v52 = vpop.f32.mrf.mxu1  ;;  %v844_v44 = vpop.f32.mrf.mxu3 }
 0x223   :  { %v1108_v3 = vadd.f32 %v1048_v52, %v889_v43  ;;  %v890_v52 = vadd.f32 %v5407_v61, %v5228_v47 }
 0x224   :  { %v5478_v35 = vmax.f32 %v1105_v45, %v1107_v42  ;;  %v891_v42 = vadd.f32 %v5409_v14, %v5231_v10  ;;  %v775_v21 = vpop.f32.mrf.mxu2  ;;  %v60_v10 = vld [vmem:[%s7501_s0 + $0xd8] sm:$0xff]  ;;  %v3757_v45 = vld [vmem:[%s7502_s3 + $0x1b0] sm:$0xf] }
 0x225   :  { %v1156_v19 = vsel %vm1150_vm4, %v1108_v3, -inf  ;;  %v893_v3 = vadd.f32 %v834_v2, %v5245_v20  ;;  %v3701_v20 = vld [vmem:[%s7502_s3 + $0x140] sm:$0xf]  ;;  %v4512_v2 = vld [vmem:[%s7502_s3 + $0x144] sm:$0xf0]  ;;  %v930_v17 = vpack.c.bf16 %v60_v10, %v5253_v6  ;;  %v899_v10 = vadd.f32 %v5488_v39, %v5281_v13 }
 0x226   :  { %1226 = vrot.lane.b32.xlu0 %v5478_v35, %s4631_s11  ;;  %v5484_v27 = vmax.f32 %v1155_v26, %v1156_v19  ;;  %v3702_v14 = vor.u32 %v4512_v2, %v3701_v20  ;;  %v4526_v26 = vld [vmem:[%s7502_s3 + $0x1b4] sm:$0xf0]  ;;  %v895_v19 = vadd.f32 %v5442_v29, %v5263_v5  ;;  %v900_v20 = vadd.f32 %v775_v21, %v5288_v58  ;;  %v4524_v58 = vld [vmem:[%s7502_s3 + $0x1a4] sm:$0xf0] }
 0x227   :  { %v3758_v6 = vor.u32 %v4526_v26, %v3757_v45 }
 0x228   :  { %1635 = vmatpush.bf16.msra.mxu2 %v3702_v14  ;;  %v901_v14 = vadd.f32 %v844_v44, %v5291_v8 }
 0x229   :  { %v982_v7 = vpop.f32.mrf.mxu0  ;;  %1665 = vmatpush.bf16.msra.mxu3 %v3758_v6 }
 0x22a   :  { %v1051_v38 = vpop.f32.mrf.mxu1  ;;  %v1109_v53 = vadd.f32 %v982_v7, %v890_v52  ;;  %v847_v56 = vpop.f32.mrf.mxu3  ;;  %v894_v7 = vadd.f32 %v5440_v9, %v5260_v51 }
 0x22b   :  { %v1110_v4 = vadd.f32 %v1051_v38, %v891_v42  ;;  %v896_v38 = vadd.f32 %v5452_v24, %v5272_v1  ;;  %v897_v42 = vadd.f32 %v5462_v30, %v5275_v15  ;;  %v3693_v24 = vld [vmem:[%s7502_s3 + $0x130] sm:$0xf]  ;;  %v4510_v30 = vld [vmem:[%s7502_s3 + $0x134] sm:$0xf0] }
 0x22c   :  { %3615 = vmatmul.msk.bf16.gmra.mxu0 %vm112_vm1, %v5256_v18  ;;  %v778_v12 = vpop.f32.mrf.mxu2 }
 0x22d   :  { %3627 = vmatmul.msk.bf16.gmra.mxu1 %vm112_vm1, %v5256_v18  ;;  %v1159_v47 = vsel %vm1150_vm4, %v1110_v4, -inf }
 0x22e   :  { %1228 = vrot.lane.b32.xlu0 %v5484_v27, %s4631_s11 }
 0x231   :  { %v984_v33 = vpop.f32.mrf.mxu0 }
 0x232   :  { %v1111_v46 = vadd.f32 %v984_v33, %v892_v59  ;;  %v1053_v18 = vpop.f32.mrf.mxu1  ;;  %v849_v9 = vpop.f32.mrf.mxu3 }
 0x233   :  { %v1112_v50 = vadd.f32 %v1053_v18, %v893_v3 }
 0x234   :  { %v5502_v32 = vmax.f32 %v1109_v53, %v1111_v46  ;;  %v780_v18 = vpop.f32.mrf.mxu2 }
 0x235   :  { %v1160_v62 = vsel %vm1150_vm4, %v1112_v50, -inf  ;;  %v3694_v50 = vor.u32 %v4510_v30, %v3693_v24 }
 0x236   :  { %1230 = vrot.lane.b32.xlu1 %v5502_v32, %s4631_s11  ;;  %v5517_v61 = vmax.f32 %v1159_v47, %v1160_v62  ;;  %v898_v62 = vadd.f32 %v5486_v34, %v5278_v31  ;;  %v3749_v31 = vld [vmem:[%s7502_s3 + $0x1a0] sm:$0xf] }
 0x237   :  { %1636 = vmatpush.bf16.msra.mxu2 %v3694_v50  ;;  %v3750_v34 = vor.u32 %v4524_v58, %v3749_v31 }
 0x239   :  { %v987_v55 = vpop.f32.mrf.mxu0  ;;  %1666 = vmatpush.bf16.msra.mxu3 %v3750_v34 }
 0x23a   :  { %v1056_v43 = vpop.f32.mrf.mxu1  ;;  %v1113_v3 = vadd.f32 %v987_v55, %v894_v7  ;;  %v852_v2 = vpop.f32.mrf.mxu3 }
 0x23b   :  { %v1114_v52 = vadd.f32 %v1056_v43, %v895_v19 }
 0x23c   :  { %3616 = vmatmul.msk.bf16.gmra.mxu0 %vm112_vm1, %v930_v17  ;;  %v783_v47 = vpop.f32.mrf.mxu2 }
 0x23d   :  { %3628 = vmatmul.msk.bf16.gmra.mxu1 %vm112_vm1, %v930_v17  ;;  %v1163_v5 = vsel %vm1150_vm4, %v1114_v52, -inf  ;;  %v902_v52 = vadd.f32 %v778_v12, %v5294_v25  ;;  %v3685_v25 = vld [vmem:[%s7502_s3 + $0x120] sm:$0xf] }
 0x23e   :  { %1232 = vrot.lane.b32.xlu1 %v5517_v61, %s4631_s11 }
 0x241   :  { %v989_v59 = vpop.f32.mrf.mxu0 }
 0x242   :  { %v1115_v4 = vadd.f32 %v989_v59, %v896_v38  ;;  %v1058_v33 = vpop.f32.mrf.mxu1  ;;  %v854_v7 = vpop.f32.mrf.mxu3  ;;  %v904_v59 = vadd.f32 %v780_v18, %v5304_v28  ;;  %v4508_v28 = vld [vmem:[%s7502_s3 + $0x124] sm:$0xf0] }
 0x243   :  { %v1116_v53 = vadd.f32 %v1058_v33, %v897_v42  ;;  %v903_v42 = vadd.f32 %v847_v56, %v5297_v40  ;;  %v3686_v12 = vor.u32 %v4508_v28, %v3685_v25 }
 0x244   :  { %v5538_v46 = vmax.f32 %v1113_v3, %v1115_v4  ;;  %v785_v21 = vpop.f32.mrf.mxu2  ;;  %v905_v3 = vadd.f32 %v849_v9, %v5307_v41 }
 0x245   :  { %v1164_v51 = vsel %vm1150_vm4, %v1116_v53, -inf  ;;  %1637 = vmatpush.bf16.msra.mxu2 %v3686_v12  ;;  %v3903_v12 = vld [vmem:[%s7502_s3 + $0xe8] sm:$0xf0] }
 0x246   :  { %1234 = vrot.lane.b32.xlu2 %v5538_v46, %s4631_s11  ;;  %v5544_v1 = vmax.f32 %v1163_v5, %v1164_v51 }
 0x249   :  { %v992_v15 = vpop.f32.mrf.mxu0 }
 0x24a   :  { %v1061_v29 = vpop.f32.mrf.mxu1  ;;  %v1117_v43 = vadd.f32 %v992_v15, %v898_v62  ;;  %v857_v24 = vpop.f32.mrf.mxu3  ;;  %v907_v62 = vadd.f32 %v852_v2, %v5313_v36  ;;  %v4522_v36 = vld [vmem:[%s7502_s3 + $0x194] sm:$0xf0] }
 0x24b   :  { %v1118_v17 = vadd.f32 %v1061_v29, %v899_v10 }
 0x24c   :  { %v788_v15 = vpop.f32.mrf.mxu2 }
 0x24d   :  { %v1167_v13 = vsel %vm1150_vm4, %v1118_v17, -inf  ;;  %v909_v17 = vadd.f32 %v854_v7, %v5323_v57  ;;  %v4506_v7 = vld [vmem:[%s7502_s3 + $0x114] sm:$0xf0] }
 0x24e   :  { %1236 = vrot.lane.b32.xlu2 %v5544_v1, %s4631_s11 }
 0x251   :  { %v994_v55 = vpop.f32.mrf.mxu0 }
 0x252   :  { %v1119_v45 = vadd.f32 %v994_v55, %v900_v20  ;;  %v1063_v26 = vpop.f32.mrf.mxu1  ;;  %v859_v10 = vpop.f32.mrf.mxu3  ;;  %v906_v20 = vadd.f32 %v783_v47, %v5310_v49  ;;  %v3741_v49 = vld [vmem:[%s7502_s3 + $0x190] sm:$0xf] }
 0x253   :  { %v1120_v6 = vadd.f32 %v1063_v26, %v901_v14  ;;  %v908_v14 = vadd.f32 %v785_v21, %v5320_v54  ;;  %v3742_v57 = vor.u32 %v4522_v36, %v3741_v49 }
 0x254   :  { %v5560_v19 = vmax.f32 %v1117_v43, %v1119_v45  ;;  %v790_v9 = vpop.f32.mrf.mxu2 }
 0x255   :  { %v1168_v39 = vsel %vm1150_vm4, %v1120_v6, -inf  ;;  %1667 = vmatpush.bf16.msra.mxu3 %v3742_v57 }
 0x256   :  { %1238 = vrot.lane.b32.xlu0 %v5560_v19, %s4631_s11  ;;  %v5572_v8 = vmax.f32 %v1167_v13, %v1168_v39 }
 0x258   :  { %1240 = vrot.lane.b32.xlu1 %v5572_v8, %s4631_s11 }
 0x259   :  { %v997_v44 = vpop.f32.mrf.mxu0 }
 0x25a   :  { %v1066_v38 = vpop.f32.mrf.mxu1  ;;  %v1121_v53 = vadd.f32 %v997_v44, %v902_v52  ;;  %v862_v2 = vpop.f32.mrf.mxu3  ;;  %v3677_v44 = vld [vmem:[%s7502_s3 + $0x110] sm:$0xf]  ;;  %v910_v52 = vadd.f32 %v788_v15, %v5326_v60  ;;  %v4499_v15 = vld [vmem:[%s7502_s3 + $0xe4] sm:$0xf] }
 0x25b   :  { %v1122_v4 = vadd.f32 %v1066_v38, %v903_v42  ;;  %v3678_v38 = vor.u32 %v4506_v7, %v3677_v44  ;;  %v911_v42 = vadd.f32 %v857_v24, %v5329_v37  ;;  %v3725_v7 = vld [vmem:[%s7502_s3 + $0x170] sm:$0xf] }
 0x25c   :  { %v793_v47 = vpop.f32.mrf.mxu2 }
 0x25d   :  { %v1171_v50 = vsel %vm1150_vm4, %v1122_v4, -inf  ;;  %1638 = vmatpush.bf16.msra.mxu2 %v3678_v38  ;;  %v4518_v38 = vld [vmem:[%s7502_s3 + $0x174] sm:$0xf0] }
 0x261   :  { %v999_v33 = vpop.f32.mrf.mxu0 }
 0x262   :  { %v1123_v5 = vadd.f32 %v999_v33, %v904_v59  ;;  %v1068_v51 = vpop.f32.mrf.mxu1  ;;  %v912_v59 = vadd.f32 %v790_v9, %v5336_v23  ;;  %v4485_v23 = vld [vmem:[%s7502_s3 + $0x74] sm:$0xf] }
 0x263   :  { %v1124_v29 = vadd.f32 %v1068_v51, %v905_v3  ;;  %v913_v3 = vadd.f32 %v859_v10, %v5339_v0  ;;  %v3847_v0 = vld [vmem:[%s7502_s3 + $0x78] sm:$0xf0] }
 0x264   :  { %v5580_v30 = vmax.f32 %v1121_v53, %v1123_v5  ;;  %v795_v4 = vpop.f32.mrf.mxu2  ;;  %v864_v5 = vpop.f32.mrf.mxu3  ;;  %v3850_v24 = vor.u32 %v4485_v23, %v3847_v0  ;;  %v3895_v23 = vld [vmem:[%s7502_s3 + $0xd8] sm:$0xf0]  ;;  %v7553_v0 = vld [vmem:[#allocation6_spill] sm:$0xff] }
 0x265   :  { %v1172_v40 = vsel %vm1150_vm4, %v1124_v29, -inf }
 0x266   :  { %1242 = vrot.lane.b32.xlu2 %v5580_v30, %s4631_s11  ;;  %v5592_v41 = vmax.f32 %v1171_v50, %v1172_v40  ;;  %1973 = vmatpush.bf16.msrb.mxu0 %v3850_v24 }
 0x268   :  { %1244 = vrot.lane.b32.xlu0 %v5592_v41, %s4631_s11 }
 0x269   :  { %v1002_v56 = vpop.f32.mrf.mxu0 }
 0x26a   :  { %v1071_v18 = vpop.f32.mrf.mxu1  ;;  %v1125_v45 = vadd.f32 %v1002_v56, %v906_v20  ;;  %v3906_v56 = vor.u32 %v4499_v15, %v3903_v12 }
 0x26b   :  { %v1126_v55 = vadd.f32 %v1071_v18, %v907_v62 }
 0x26c   :  { %v1913_v10 = vand.u32 %v3906_v56, %v5429_v22  ;;  %v798_v62 = vpop.f32.mrf.mxu2  ;;  %v867_v20 = vpop.f32.mrf.mxu3  ;;  %v7554_v56 = vld [vmem:[#allocation5_spill] sm:$0xff] }
 0x26d   :  { %v1175_v31 = vsel %vm1150_vm4, %v1126_v55, -inf  ;;  %v915_v55 = vadd.f32 %v862_v2, %v5345_v16  ;;  %v3669_v16 = vld [vmem:[%s7502_s3 + $0x100] sm:$0xf]  ;;  %v919_v15 = vadd.f32 %v867_v20, %v7553_v0 }
 0x26e   :  { %2003 = vmatpush.bf16.msrb.mxu1 %v1913_v10 }
 0x271   :  { %v1004_v43 = vpop.f32.mrf.mxu0 }
 0x272   :  { %v1127_v26 = vadd.f32 %v1004_v43, %v908_v14  ;;  %v1073_v6 = vpop.f32.mrf.mxu1  ;;  %v3733_v14 = vld [vmem:[%s7502_s3 + $0x180] sm:$0xf] }
 0x273   :  { %v1128_v13 = vadd.f32 %v1073_v6, %v909_v17  ;;  %v4520_v17 = vld [vmem:[%s7502_s3 + $0x184] sm:$0xf0]  ;;  %v7551_v6 = vld [vmem:[#allocation2_spill] sm:$0xff] }
 0x274   :  { %v5600_v39 = vmax.f32 %v1125_v45, %v1127_v26  ;;  %v3734_v43 = vor.u32 %v4520_v17, %v3733_v14  ;;  %v914_v45 = vadd.f32 %v793_v47, %v5342_v11  ;;  %v916_v26 = vadd.f32 %v795_v4, %v5352_v48  ;;  %v4504_v11 = vld [vmem:[%s7502_s3 + $0x104] sm:$0xf0]  ;;  %v4502_v4 = vld [vmem:[%s7502_s3 + $0xf4] sm:$0xf0] }
 0x275   :  { %v1176_v58 = vsel %vm1150_vm4, %v1128_v13, -inf  ;;  %v917_v13 = vadd.f32 %v864_v5, %v7551_v6  ;;  %v3670_v47 = vor.u32 %v4504_v11, %v3669_v16 }
 0x276   :  { %1246 = vrot.lane.b32.xlu1 %v5600_v39, %s4631_s11  ;;  %v5612_v54 = vmax.f32 %v1175_v31, %v1176_v58  ;;  %1668 = vmatpush.bf16.msra.mxu3 %v3734_v43 }
 0x277   :  { %1639 = vmatpush.bf16.msra.mxu2 %v3670_v47  ;;  %v1331_v47 = vld [vmem:[%s7503_s2] sm:$0x3] }
 0x278   :  { %1248 = vrot.lane.b32.xlu2 %v5612_v54, %s4631_s11 }
 0x279   :  { %v1007_v34 = vpop.f32.mrf.mxu0 }
 0x27a   :  { %v1076_v21 = vpop.f32.mrf.mxu1  ;;  %v1129_v51 = vadd.f32 %v1007_v34, %v910_v52  ;;  %v800_v34 = vpop.f32.mrf.mxu2 }
 0x27b   :  { %v1130_v33 = vadd.f32 %v1076_v21, %v911_v42  ;;  %v869_v42 = vpop.f32.mrf.mxu3 }
 0x27d   :  { %v1179_v28 = vsel %vm1150_vm4, %v1130_v33, -inf }
 0x281   :  { %v1009_v53 = vpop.f32.mrf.mxu0 }
 0x282   :  { %v1131_v29 = vadd.f32 %v1009_v53, %v912_v59  ;;  %v1078_v50 = vpop.f32.mrf.mxu1  ;;  %v3726_v59 = vor.u32 %v4518_v38, %v3725_v7  ;;  %v803_v24 = vpop.f32.mrf.mxu2 }
 0x283   :  { %v1132_v40 = vadd.f32 %v1078_v50, %v913_v3  ;;  %v3661_v3 = vld [vmem:[%s7502_s3 + $0xf0] sm:$0xf]  ;;  %v3839_v50 = vld [vmem:[%s7502_s3 + $0x68] sm:$0xf0]  ;;  %v872_v14 = vpop.f32.mrf.mxu3 }
 0x284   :  { %v5626_v25 = vmax.f32 %v1129_v51, %v1131_v29  ;;  %v3662_v33 = vor.u32 %v4502_v4, %v3661_v3  ;;  %1669 = vmatpush.bf16.msra.mxu3 %v3726_v59  ;;  %v4483_v29 = vld [vmem:[%s7502_s3 + $0x64] sm:$0xf]  ;;  %v5728_v3 = vperm.slane %v1331_v47, 0 }
 0x285   :  { %v1180_v37 = vsel %vm1150_vm4, %v1132_v40, -inf  ;;  %v7552_v40 = vld [vmem:[#allocation15_spill] sm:$0xff] }
 0x286   :  { %1250 = vrot.lane.b32.xlu0 %v5626_v25, %s4631_s11  ;;  %v5632_v60 = vmax.f32 %v1179_v28, %v1180_v37  ;;  %1640 = vmatpush.bf16.msra.mxu2 %v3662_v33  ;;  %v3842_v28 = vor.u32 %v4483_v29, %v3839_v50  ;;  %v4497_v37 = vld [vmem:[%s7502_s3 + $0xd4] sm:$0xf] }
 0x287   :  { %v3898_v12 = vor.u32 %v4497_v37, %v3895_v23  ;;  %v7558_v29 = vld [vmem:[#allocation8_spill] sm:$0xff]  ;;  %v7560_v37 = vld [vmem:[#allocation10_spill] sm:$0xff] }
 0x288   :  { %1252 = vrot.lane.b32.xlu1 %v5632_v60, %s4631_s11  ;;  %1974 = vmatpush.bf16.msrb.mxu0 %v3842_v28  ;;  %v922_v50 = vadd.f32 %v803_v24, %v7558_v29  ;;  %v7559_v28 = vld [vmem:[#allocation4_spill] sm:$0xff] }
 0x289   :  { %v1012_v18 = vpop.f32.mrf.mxu0  ;;  %2004 = vmatpush.bf16.msrb.mxu1 %v3898_v12  ;;  %v7561_v29 = vld [vmem:[#allocation12_spill] sm:$0xff] }
 0x28a   :  { %v1081_v9 = vpop.f32.mrf.mxu1  ;;  %v1133_v49 = vadd.f32 %v1012_v18, %v914_v45  ;;  %v918_v18 = vadd.f32 %v798_v62, %v7554_v56 }
 0x28b   :  { %v1134_v31 = vadd.f32 %v1081_v9, %v915_v55  ;;  %v7555_v9 = vld [vmem:[#allocation3_spill] sm:$0xff] }
 0x28c   :  { %v920_v10 = vadd.f32 %v800_v34, %v7555_v9  ;;  %v7556_v55 = vld [vmem:[#allocation7_spill] sm:$0xff] }
 0x28d   :  { %v1183_v21 = vsel %vm1150_vm4, %v1134_v31, -inf  ;;  %v921_v43 = vadd.f32 %v869_v42, %v7556_v55  ;;  %v5725_v42 = vperm.slane %v1331_v47, 1  ;;  %v3831_v47 = vld [vmem:[%s7502_s3 + $0x58] sm:$0xf0] }
 0x290   :  { %1222 = vrot.lane.b32.xlu1 %v5444_v63, %s4631_s11 }
 0x291   :  { %v1014_v58 = vpop.f32.mrf.mxu0 }
 0x292   :  { %v1135_v36 = vadd.f32 %v1014_v58, %v916_v26  ;;  %v1083_v57 = vpop.f32.mrf.mxu1 }
 0x293   :  { %v1136_v48 = vadd.f32 %v1083_v57, %v917_v13 }
 0x294   :  { %v5667_v2 = vmax.f32 %v1133_v49, %v1135_v36 }
 0x295   :  { %v1184_v44 = vsel %vm1150_vm4, %v1136_v48, -inf  ;;  %v805_v48 = vpop.f32.mrf.mxu2 }
 0x296   :  { %1254 = vrot.lane.b32.xlu2 %v5667_v2, %s4631_s11  ;;  %v5679_v52 = vmax.f32 %v1183_v21, %v1184_v44  ;;  %v874_v21 = vpop.f32.mrf.mxu3 }
 0x297   :  { %v925_v23 = vadd.f32 %v874_v21, %v7560_v37  ;;  %v7563_v37 = vld [vmem:[#allocation13_spill] sm:$0xff] }
 0x298   :  { %1256 = vrot.lane.b32.xlu0 %v5679_v52, %s4631_s11  ;;  %v1227_v51 = vpop.permute.xlu0 %1226 }
 0x299   :  { %v1017_v53 = vpop.f32.mrf.mxu0 }
 0x29a   :  { %v1086_v5 = vpop.f32.mrf.mxu1  ;;  %v1137_v6 = vadd.f32 %v1017_v53, %v918_v18  ;;  %v7557_v53 = vld [vmem:[#allocation9_spill] sm:$0xff] }
 0x29b   :  { %v1138_v45 = vadd.f32 %v1086_v5, %v919_v15  ;;  %v923_v5 = vadd.f32 %v872_v14, %v7557_v53 }
 0x29d   :  { %v1187_v20 = vsel %vm1150_vm4, %v1138_v45, -inf }
 0x29e   :  { %1224 = vrot.lane.b32.xlu2 %v7552_v40, %s4631_s11  ;;  %v877_v45 = vpop.f32.mrf.mxu3 }
 0x2a0   :  { %v1235_v17 = vpop.permute.xlu2 %1234  ;;  %v1229_v57 = vpop.permute.xlu0 %1228 }
 0x2a1   :  { %v1019_v26 = vpop.f32.mrf.mxu0  ;;  %v1272_v44 = vsel %vm1270_vm5, %v1227_v51, %v1229_v57  ;;  %v1310_v59 = vmax.f32 %v5484_v27, %v1229_v57  ;;  %v924_v51 = vadd.f32 %v805_v48, %v7559_v28  ;;  %v4481_v48 = vld [vmem:[%s7502_s3 + $0x54] sm:$0xf]  ;;  %v7562_v28 = vld [vmem:[#allocation11_spill] sm:$0xff] }
 0x2a2   :  { %v1139_v13 = vadd.f32 %v1019_v26, %v920_v10  ;;  %v1088_v31 = vpop.f32.mrf.mxu1  ;;  %v1309_v4 = vmax.f32 %v5478_v35, %v1272_v44 }
 0x2a3   :  { %v1140_v58 = vadd.f32 %v1088_v31, %v921_v43  ;;  %v5737_v0 = vadd.f32 %v5725_v42, %v1310_v59 }
 0x2a4   :  { %v5707_v49 = vmax.f32 %v1137_v6, %v1139_v13  ;;  %v5740_v27 = vadd.f32 %v5728_v3, %v1309_v4 }
 0x2a5   :  { %v1188_v62 = vsel %vm1150_vm4, %v1140_v58, -inf }
 0x2a6   :  { %1258 = vrot.lane.b32.xlu0 %v5707_v49, %s4631_s11  ;;  %v5713_v36 = vmax.f32 %v1187_v20, %v1188_v62  ;;  %v1363_v58 = vmax.f32 %v5740_v27, 0.0  ;;  %v4005_v27 = vld [vmem:[%s7502_s3 + $0x258] sm:$0xf0] }
 0x2a8   :  { %1260 = vrot.lane.b32.xlu1 %v5713_v36, %s4631_s11  ;;  %v5717_v16 = vpop.permute.xlu2 %1236  ;;  %v1231_v11 = vpop.permute.xlu1 %1230 }
 0x2a9   :  { %v1022_v34 = vpop.f32.mrf.mxu0  ;;  %v1274_v38 = vsel %vm1270_vm5, %v1235_v17, %v5717_v16  ;;  %v808_v17 = vpop.f32.mrf.mxu2 }
 0x2aa   :  { %v1091_v7 = vpop.f32.mrf.mxu1  ;;  %v1313_v33 = vmax.f32 %v5538_v46, %v1274_v38  ;;  %v1141_v24 = vadd.f32 %v1022_v34, %v922_v50  ;;  %v4495_v34 = vld [vmem:[%s7502_s3 + $0xc4] sm:$0xf]  ;;  %v3887_v38 = vld [vmem:[%s7502_s3 + $0xc8] sm:$0xf0]  ;;  %v927_v50 = vadd.f32 %v877_v45, %v7561_v29 }
 0x2ab   :  { %v1142_v12 = vadd.f32 %v1091_v7, %v923_v5  ;;  %v3834_v7 = vor.u32 %v4481_v48, %v3831_v47  ;;  %v3890_v4 = vor.u32 %v4495_v34, %v3887_v38  ;;  %v879_v5 = vpop.f32.mrf.mxu3  ;;  %v1314_v34 = vmax.f32 %v5544_v1, %v5717_v16 }
 0x2ac   :  { %v5745_v18 = vadd.f32 %v5728_v3, %v1313_v33 }
 0x2ad   :  { %v1191_v13 = vsel %vm1150_vm4, %v1142_v12, -inf  ;;  %1975 = vmatpush.bf16.msrb.mxu0 %v3834_v7  ;;  %2005 = vmatpush.bf16.msrb.mxu1 %v3890_v4  ;;  %v5825_v4 = vadd.f32 %v5725_v42, %v1314_v34 }
 0x2ae   :  { %v1367_v20 = vmax.f32 %v5745_v18, 0.0 }
 0x2b0   :  { %v1233_v15 = vpop.permute.xlu1 %1232 }
 0x2b1   :  { %v1273_v35 = vsel %vm1270_vm5, %v1231_v11, %v1233_v15  ;;  %v1312_v46 = vmax.f32 %v5517_v61, %v1233_v15  ;;  %v1024_v56 = vpop.f32.mrf.mxu0  ;;  %v1364_v61 = vmax.f32 %v5737_v0, 0.0  ;;  %v810_v53 = vpop.f32.mrf.mxu2  ;;  %v7564_v15 = vld [vmem:[#allocation14_spill] sm:$0xff] }
 0x2b2   :  { %v1311_v9 = vmax.f32 %v5502_v32, %v1273_v35  ;;  %v1143_v10 = vadd.f32 %v1024_v56, %v924_v51  ;;  %v1093_v14 = vpop.f32.mrf.mxu1  ;;  %v926_v51 = vadd.f32 %v808_v17, %v7562_v28  ;;  %v929_v12 = vadd.f32 %v879_v5, %v7564_v15  ;;  %v4529_v17 = vld [vmem:[%s7502_s3 + $0x1d4] sm:$0xf] }
 0x2b3   :  { %v5749_v55 = vadd.f32 %v5725_v42, %v1312_v46  ;;  %v1144_v43 = vadd.f32 %v1093_v14, %v925_v23  ;;  %v928_v23 = vadd.f32 %v810_v53, %v7563_v37  ;;  %v4515_v14 = vld [vmem:[%s7502_s3 + $0x164] sm:$0xf]  ;;  %v4513_v15 = vld [vmem:[%s7502_s3 + $0x154] sm:$0xf] }
 0x2b4   :  { %v1341_v26 = vadd.f32 %v5728_v3, %v1311_v9  ;;  %v5752_v6 = vmax.f32 %v1141_v24, %v1143_v10 }
 0x2b5   :  { %v1366_v31 = vmax.f32 %v5749_v55, 0.0  ;;  %v1192_v32 = vsel %vm1150_vm4, %v1144_v43, -inf  ;;  %v3719_v43 = vld [vmem:[%s7502_s3 + $0x168] sm:$0xf0] }
 0x2b6   :  { %v1365_v62 = vmax.f32 %v1341_v26, 0.0  ;;  %1262 = vrot.lane.b32.xlu2 %v5752_v6, %s4631_s11  ;;  %v5762_v57 = vmax.f32 %v1191_v13, %v1192_v32  ;;  %v3722_v26 = vor.u32 %v4515_v14, %v3719_v43  ;;  %v3775_v13 = vld [vmem:[%s7502_s3 + $0x1d8] sm:$0xf0]  ;;  %v4511_v14 = vld [vmem:[%s7502_s3 + $0x144] sm:$0xf] }
 0x2b7   :  { %v5768_v11 = vpack.c.bf16 %v1366_v31, %v1364_v61  ;;  %v3778_v48 = vor.u32 %v4529_v17, %v3775_v13  ;;  %v3703_v43 = vld [vmem:[%s7502_s3 + $0x148] sm:$0xf0]  ;;  %v4525_v17 = vld [vmem:[%s7502_s3 + $0x1b4] sm:$0xf]  ;;  %v3759_v13 = vld [vmem:[%s7502_s3 + $0x1b8] sm:$0xf0] }
 0x2b8   :  { %v5781_v21 = vpack.c.bf16 %v1367_v20, %v1365_v62  ;;  %v5785_v44 = vpack.c.bf16 %v1365_v62, %v1363_v58  ;;  %1264 = vrot.lane.b32.xlu0 %v5762_v57, %s4631_s11  ;;  %1691 = vmatpush.bf16.msrb.mxu2 %v3722_v26  ;;  %v3762_v34 = vor.u32 %v4525_v17, %v3759_v13  ;;  %v3695_v17 = vld [vmem:[%s7502_s3 + $0x138] sm:$0xf0]  ;;  %v4523_v13 = vld [vmem:[%s7502_s3 + $0x1a4] sm:$0xf] }
 0x2b9   :  { %v1027_v59 = vpop.f32.mrf.mxu0  ;;  %3779 = vmatmul.msk.bf16.vlgmr.msra.gmra.mxu3 %vm1610_vm6, %v5768_v11  ;;  %v1631_v7 = vand.u32 %v3778_v48, %v5429_v22  ;;  %v3706_v48 = vor.u32 %v4511_v14, %v3703_v43  ;;  %v4509_v43 = vld [vmem:[%s7502_s3 + $0x134] sm:$0xf] }
 0x2ba   :  { %v1096_v33 = vpop.f32.mrf.mxu1  ;;  %1641 = vmatmul.bf16.vlgmr.msra.gmra.mxu2 %v5785_v44  ;;  %v1145_v56 = vadd.f32 %v1027_v59, %v926_v51 }
 0x2bb   :  { %v1146_v35 = vadd.f32 %v1096_v33, %v927_v50  ;;  %1721 = vmatpush.bf16.msrb.mxu3 %v1631_v7  ;;  %v1368_v50 = vmax.f32 %v5825_v4, 0.0 }
 0x2bd   :  { %v1195_v32 = vsel %vm1150_vm4, %v1146_v35, -inf  ;;  %v4527_v35 = vld [vmem:[%s7502_s3 + $0x1c4] sm:$0xf] }
 0x2c0   :  { %v5829_v5 = vpop.permute.xlu2 %1242 }
 0x2c1   :  { %v1029_v46 = vpop.f32.mrf.mxu0 }
 0x2c2   :  { %v1147_v24 = vadd.f32 %v1029_v46, %v928_v23  ;;  %v1098_v9 = vpop.f32.mrf.mxu1 }
 0x2c3   :  { %v1148_v10 = vadd.f32 %v1098_v9, %v929_v12  ;;  %v3711_v12 = vld [vmem:[%s7502_s3 + $0x158] sm:$0xf0]  ;;  %v4493_v9 = vld [vmem:[%s7502_s3 + $0xb4] sm:$0xf] }
 0x2c4   :  { %v5808_v45 = vmax.f32 %v1145_v56, %v1147_v24  ;;  %v3714_v56 = vor.u32 %v4513_v15, %v3711_v12  ;;  %v3767_v24 = vld [vmem:[%s7502_s3 + $0x1c8] sm:$0xf0] }
 0x2c5   :  { %v1196_v62 = vsel %vm1150_vm4, %v1148_v10, -inf  ;;  %v3879_v10 = vld [vmem:[%s7502_s3 + $0xb8] sm:$0xf0]  ;;  %v3770_v18 = vor.u32 %v4527_v35, %v3767_v24  ;;  %v4487_v35 = vld [vmem:[%s7502_s3 + $0x84] sm:$0xf] }
 0x2c6   :  { %1266 = vrot.lane.b32.xlu1 %v5808_v45, %s4631_s11  ;;  %v5817_v47 = vmax.f32 %v1195_v32, %v1196_v62  ;;  %v4491_v32 = vld [vmem:[%s7502_s3 + $0xa4] sm:$0xf]  ;;  %v3871_v62 = vld [vmem:[%s7502_s3 + $0xa8] sm:$0xf0]  ;;  %1692 = vmatpush.bf16.msrb.mxu2 %v3714_v56 }
 0x2c7   :  { %1722 = vmatpush.bf16.msrb.mxu3 %v3770_v18  ;;  %v3874_v7 = vor.u32 %v4491_v32, %v3871_v62  ;;  %v3807_v18 = vld [vmem:[%s7502_s3 + $0x28] sm:$0xf0]  ;;  %v3698_v62 = vor.u32 %v4509_v43, %v3695_v17 }
 0x2c8   :  { %1268 = vrot.lane.b32.xlu2 %v5817_v47, %s4631_s11  ;;  %v1239_v38 = vpop.permute.xlu0 %1238 }
 0x2ca   :  { %v1241_v59 = vpop.permute.xlu1 %1240  ;;  %1693 = vmatpush.bf16.msrb.mxu2 %v3706_v48  ;;  %v3751_v48 = vld [vmem:[%s7502_s3 + $0x1a8] sm:$0xf0] }
 0x2cb   :  { %v1275_v33 = vsel %vm1270_vm5, %v1239_v38, %v1241_v59  ;;  %v1316_v53 = vmax.f32 %v5572_v8, %v1241_v59  ;;  %v4479_v8 = vld [vmem:[%s7502_s3 + $0x44] sm:$0xf]  ;;  %1723 = vmatpush.bf16.msrb.mxu3 %v3762_v34  ;;  %v4489_v59 = vld [vmem:[%s7502_s3 + $0x94] sm:$0xf] }
 0x2cc   :  { %v1315_v29 = vmax.f32 %v5560_v19, %v1275_v33  ;;  %v3823_v19 = vld [vmem:[%s7502_s3 + $0x48] sm:$0xf0]  ;;  %v3863_v33 = vld [vmem:[%s7502_s3 + $0x98] sm:$0xf0]  ;;  %v4473_v34 = vld [vmem:[%s7502_s3 + $0x14] sm:$0xf] }
 0x2cd   :  { %v5833_v1 = vadd.f32 %v5725_v42, %v1316_v53  ;;  %v3826_v23 = vor.u32 %v4479_v8, %v3823_v19 }
 0x2ce   :  { %v5836_v16 = vadd.f32 %v5728_v3, %v1315_v29  ;;  %v3866_v29 = vor.u32 %v4489_v59, %v3863_v33  ;;  %1694 = vmatpush.bf16.msrb.mxu2 %v3698_v62  ;;  %v4471_v33 = vld [vmem:[%s7502_s3 + $0x4] sm:$0xf] }
 0x2cf   :  { %v1370_v28 = vmax.f32 %v5833_v1, 0.0  ;;  %1976 = vmatpush.bf16.msrb.mxu0 %v3826_v23  ;;  %v3815_v23 = vld [vmem:[%s7502_s3 + $0x38] sm:$0xf0]  ;;  %v4519_v62 = vld [vmem:[%s7502_s3 + $0x184] sm:$0xf] }
 0x2d0   :  { %v1369_v51 = vmax.f32 %v5836_v16, 0.0 }
 0x2d1   :  { %v5851_v37 = vpack.c.bf16 %v1370_v28, %v1368_v50 }
 0x2d2   :  { %v5866_v46 = vpack.c.bf16 %v1369_v51, %v1367_v20  ;;  %v3882_v20 = vor.u32 %v4493_v9, %v3879_v10  ;;  %v1249_v26 = vpop.permute.xlu2 %1248  ;;  %v4475_v10 = vld [vmem:[%s7502_s3 + $0x24] sm:$0xf] }
 0x2d3   :  { %3780 = vmatmul.msk.bf16.gmra.mxu3 %vm1610_vm6, %v5851_v37  ;;  %v1320_v38 = vmax.f32 %v5612_v54, %v1249_v26  ;;  %v4477_v54 = vld [vmem:[%s7502_s3 + $0x34] sm:$0xf] }
 0x2d4   :  { %1646 = vmatmul.bf16.gmra.mxu2 %v5866_v46  ;;  %2006 = vmatpush.bf16.msrb.mxu1 %v3882_v20  ;;  %v3818_v15 = vor.u32 %v4477_v54, %v3815_v23  ;;  %v3810_v20 = vor.u32 %v4475_v10, %v3807_v18 }
 0x2d5   :  { %v5906_v8 = vadd.f32 %v5725_v42, %v1320_v38  ;;  %v3754_v38 = vor.u32 %v4523_v13, %v3751_v48  ;;  %v4505_v13 = vld [vmem:[%s7502_s3 + $0x114] sm:$0xf] }
 0x2d6   :  { %1977 = vmatpush.bf16.msrb.mxu0 %v3818_v15 }
 0x2d7   :  { %v1374_v24 = vmax.f32 %v5906_v8, 0.0  ;;  %1724 = vmatpush.bf16.msrb.mxu3 %v3754_v38  ;;  %v4503_v38 = vld [vmem:[%s7502_s3 + $0x104] sm:$0xf]  ;;  %v4474_v8 = vld [vmem:[%s7502_s3 + $0x14] sm:$0xf0] }
 0x2d8   :  { %2007 = vmatpush.bf16.msrb.mxu1 %v3874_v7  ;;  %v3799_v7 = vld [vmem:[%s7502_s3 + $0x18] sm:$0xf0] }
 0x2d9   :  { %v3802_v59 = vor.u32 %v4473_v34, %v3799_v7  ;;  %v3735_v34 = vld [vmem:[%s7502_s3 + $0x188] sm:$0xf0] }
 0x2da   :  { %v1245_v53 = vpop.permute.xlu0 %1244  ;;  %1978 = vmatpush.bf16.msrb.mxu0 %v3810_v20  ;;  %v3738_v7 = vor.u32 %v4519_v62, %v3735_v34 }
 0x2db   :  { %v1318_v19 = vmax.f32 %v5592_v41, %v1245_v53  ;;  %v3855_v41 = vld [vmem:[%s7502_s3 + $0x88] sm:$0xf0]  ;;  %v1276_v32 = vsel %vm1270_vm5, %v5829_v5, %v1245_v53 }
 0x2dc   :  { %2008 = vmatpush.bf16.msrb.mxu1 %v3866_v29  ;;  %v3858_v56 = vor.u32 %v4487_v35, %v3855_v41  ;;  %v1317_v5 = vmax.f32 %v5580_v30, %v1276_v32  ;;  %v3791_v53 = vld [vmem:[%s7502_s3 + $0x8] sm:$0xf0]  ;;  %v4507_v30 = vld [vmem:[%s7502_s3 + $0x124] sm:$0xf]  ;;  %v4521_v41 = vld [vmem:[%s7502_s3 + $0x194] sm:$0xf] }
 0x2dd   :  { %v5916_v12 = vadd.f32 %v5725_v42, %v1318_v19  ;;  %v3794_v19 = vor.u32 %v4471_v33, %v3791_v53  ;;  %v3687_v35 = vld [vmem:[%s7502_s3 + $0x128] sm:$0xf0]  ;;  %v3679_v32 = vld [vmem:[%s7502_s3 + $0x118] sm:$0xf0] }
 0x2de   :  { %1979 = vmatpush.bf16.msrb.mxu0 %v3802_v59  ;;  %v5969_v23 = vadd.f32 %v5728_v3, %v1317_v5  ;;  %v3682_v48 = vor.u32 %v4505_v13, %v3679_v32  ;;  %v3671_v59 = vld [vmem:[%s7502_s3 + $0x108] sm:$0xf0] }
 0x2df   :  { %v1372_v9 = vmax.f32 %v5916_v12, 0.0  ;;  %v3674_v5 = vor.u32 %v4503_v38, %v3671_v59  ;;  %v4061_v32 = vld [vmem:[%s7502_s3 + $0x2c8] sm:$0xf0]  ;;  %v3957_v12 = vld [vmem:[%s7502_s3 + $0x1f8] sm:$0xf0] }
 0x2e0   :  { %2009 = vmatpush.bf16.msrb.mxu1 %v3858_v56  ;;  %v3690_v56 = vor.u32 %v4507_v30, %v3687_v35  ;;  %v1371_v18 = vmax.f32 %v5969_v23, 0.0  ;;  %v3727_v30 = vld [vmem:[%s7502_s3 + $0x178] sm:$0xf0] }
 0x2e1   :  { %v5936_v14 = vpack.c.bf16 %v1374_v24, %v1372_v9 }
 0x2e2   :  { %1980 = vmatpush.bf16.msrb.mxu0 %v3794_v19  ;;  %1695 = vmatpush.bf16.msrb.mxu2 %v3690_v56  ;;  %v3663_v56 = vld [vmem:[%s7502_s3 + $0xf8] sm:$0xf0] }
 0x2e3   :  { %3781 = vmatmul.msk.bf16.gmra.mxu3 %vm1610_vm6, %v5936_v14 }
 0x2e6   :  { %1696 = vmatpush.bf16.msrb.mxu2 %v3682_v48 }
 0x2e8   :  { %v1247_v29 = vpop.permute.xlu1 %1246 }
 0x2e9   :  { %v1277_v54 = vsel %vm1270_vm5, %v1247_v29, %v1249_v26  ;;  %v3743_v26 = vld [vmem:[%s7502_s3 + $0x198] sm:$0xf0] }
 0x2ea   :  { %v1319_v15 = vmax.f32 %v5600_v39, %v1277_v54  ;;  %v3746_v10 = vor.u32 %v4521_v41, %v3743_v26  ;;  %1697 = vmatpush.bf16.msrb.mxu2 %v3674_v5  ;;  %v3845_v5 = vld [vmem:[%s7502_s3 + $0x70] sm:$0xf] }
 0x2ec   :  { %v5985_v39 = vadd.f32 %v5728_v3, %v1319_v15  ;;  %1725 = vmatpush.bf16.msrb.mxu3 %v3746_v10  ;;  %v4517_v15 = vld [vmem:[%s7502_s3 + $0x174] sm:$0xf] }
 0x2ed   :  { %v3730_v41 = vor.u32 %v4517_v15, %v3727_v30  ;;  %v4557_v15 = vld [vmem:[%s7502_s3 + $0x2b4] sm:$0xf]  ;;  %v4053_v30 = vld [vmem:[%s7502_s3 + $0x2b8] sm:$0xf0] }
 0x2ee   :  { %v1373_v20 = vmax.f32 %v5985_v39, 0.0  ;;  %v4589_v39 = vld [vmem:[%s7502_s3 + $0x3b4] sm:$0xf] }
 0x2f0   :  { %v5993_v43 = vpack.c.bf16 %v1373_v20, %v1371_v18  ;;  %v1255_v17 = vpop.permute.xlu2 %1254  ;;  %1726 = vmatpush.bf16.msrb.mxu3 %v3738_v7 }
 0x2f2   :  { %1651 = vmatmul.bf16.gmra.mxu2 %v5993_v43 }
 0x2f4   :  { %1727 = vmatpush.bf16.msrb.mxu3 %v3730_v41 }
 0x2f8   :  { %v1225_v33 = vpop.permute.xlu2 %1224  ;;  %v1251_v10 = vpop.permute.xlu0 %1250 }
 0x2f9   :  { %v1308_v53 = vmax.f32 %v7552_v40, %v1225_v33  ;;  %v4501_v40 = vld [vmem:[%s7502_s3 + $0xf4] sm:$0xf] }
 0x2fa   :  { %v1253_v29 = vpop.permute.xlu1 %1252  ;;  %v3666_v26 = vor.u32 %v4501_v40, %v3663_v56  ;;  %v4056_v40 = vor.u32 %v4557_v15, %v4053_v30  ;;  %v4037_v15 = vld [vmem:[%s7502_s3 + $0x298] sm:$0xf0] }
 0x2fb   :  { %v1338_v19 = vadd.f32 %v5725_v42, %v1308_v53  ;;  %v1278_v34 = vsel %vm1270_vm5, %v1251_v10, %v1253_v29  ;;  %v1322_v59 = vmax.f32 %v5632_v60, %v1253_v29  ;;  %v4500_v60 = vld [vmem:[%s7502_s3 + $0xe4] sm:$0xf0] }
 0x2fc   :  { %1698 = vmatpush.bf16.msrb.mxu2 %v3666_v26  ;;  %v1321_v53 = vmax.f32 %v5626_v25, %v1278_v34  ;;  %v6102_v34 = vpack.c.bf16 %v1368_v50, %v1366_v31  ;;  %v3837_v50 = vld [vmem:[%s7502_s3 + $0x60] sm:$0xf] }
 0x2fd   :  { %v1362_v54 = vmax.f32 %v1338_v19, 0.0  ;;  %v6070_v56 = vadd.f32 %v5725_v42, %v1322_v59  ;;  %v4543_v59 = vld [vmem:[%s7502_s3 + $0x244] sm:$0xf] }
 0x2ff   :  { %v6024_v35 = vpack.c.bf16 %v1364_v61, %v1362_v54  ;;  %v4559_v61 = vld [vmem:[%s7502_s3 + $0x2c4] sm:$0xf] }
 0x300   :  { %v4064_v48 = vor.u32 %v4559_v61, %v4061_v32  ;;  %v4555_v32 = vld [vmem:[%s7502_s3 + $0x2a4] sm:$0xf] }
 0x301   :  { %3911 = vmatmul.msk.bf16.vlgmr.msrb.gmra.mxu1 %vm1610_vm6, %v6024_v35 }
 0x302   :  { %v1223_v13 = vpop.permute.xlu1 %1222  ;;  %v2219_v38 = vand.u32 %v4064_v48, %v5429_v22 }
 0x303   :  { %v1271_v0 = vsel %vm1270_vm5, %v1223_v13, %v1225_v33  ;;  %v4486_v33 = vld [vmem:[%s7502_s3 + $0x74] sm:$0xf0] }
 0x304   :  { %v1307_v62 = vmax.f32 %v5444_v63, %v1271_v0  ;;  %v3901_v63 = vld [vmem:[%s7502_s3 + $0xe0] sm:$0xf]  ;;  %v3846_v54 = vor.u32 %v4486_v33, %v3845_v5  ;;  %2309 = vmatpush.bf16.msra.mxu1 %v2219_v38  ;;  %v4545_v0 = vld [vmem:[%s7502_s3 + $0x254] sm:$0xf]  ;;  %v3997_v5 = vld [vmem:[%s7502_s3 + $0x248] sm:$0xf0] }
 0x305   :  { %v3902_v29 = vor.u32 %v4500_v60, %v3901_v63  ;;  %v4000_v4 = vor.u32 %v4543_v59, %v3997_v5  ;;  %v4484_v63 = vld [vmem:[%s7502_s3 + $0x64] sm:$0xf0]  ;;  %v4498_v60 = vld [vmem:[%s7502_s3 + $0xd4] sm:$0xf0]  ;;  %v4539_v5 = vld [vmem:[%s7502_s3 + $0x224] sm:$0xf] }
 0x306   :  { %v1337_v7 = vadd.f32 %v5728_v3, %v1307_v62  ;;  %1915 = vmatpush.bf16.msra.mxu2 %v3846_v54  ;;  %v4045_v62 = vld [vmem:[%s7502_s3 + $0x2a8] sm:$0xf0]  ;;  %v3838_v54 = vor.u32 %v4484_v63, %v3837_v50  ;;  %v4549_v63 = vld [vmem:[%s7502_s3 + $0x274] sm:$0xf] }
 0x307   :  { %v1910_v13 = vand.u32 %v3902_v29, %v5429_v22  ;;  %v4553_v29 = vld [vmem:[%s7502_s3 + $0x294] sm:$0xf] }
 0x308   :  { %v1361_v19 = vmax.f32 %v1337_v7, 0.0  ;;  %2310 = vmatpush.bf16.msra.mxu1 %v4056_v40  ;;  %v1376_v7 = vmax.f32 %v6070_v56, 0.0  ;;  %v4541_v40 = vld [vmem:[%s7502_s3 + $0x234] sm:$0xf]  ;;  %v3789_v56 = vld [vmem:[%s7502_s3] sm:$0xf] }
 0x309   :  { %1945 = vmatpush.bf16.msra.mxu3 %v1910_v13  ;;  %v4482_v13 = vld [vmem:[%s7502_s3 + $0x54] sm:$0xf0] }
 0x30a   :  { %v6067_v41 = vpack.c.bf16 %v1363_v58, %v1361_v19  ;;  %v1257_v25 = vpop.permute.xlu0 %1256  ;;  %v6082_v58 = vadd.f32 %v5728_v3, %v1321_v53  ;;  %v3893_v53 = vld [vmem:[%s7502_s3 + $0xd0] sm:$0xf]  ;;  %1916 = vmatpush.bf16.msra.mxu2 %v3838_v54  ;;  %v6274_v16 = vpack.c.bf16 %v1376_v7, %v1374_v24  ;;  %v3853_v24 = vld [vmem:[%s7502_s3 + $0x80] sm:$0xf] }
 0x30b   :  { %v1279_v26 = vsel %vm1270_vm5, %v1255_v17, %v1257_v25  ;;  %v1324_v10 = vmax.f32 %v5679_v52, %v1257_v25  ;;  %v4008_v17 = vor.u32 %v4545_v0, %v4005_v27  ;;  %v3894_v30 = vor.u32 %v4498_v60, %v3893_v53  ;;  %v3885_v27 = vld [vmem:[%s7502_s3 + $0xc0] sm:$0xf]  ;;  %v4021_v53 = vld [vmem:[%s7502_s3 + $0x278] sm:$0xf0]  ;;  %v4537_v60 = vld [vmem:[%s7502_s3 + $0x214] sm:$0xf] }
 0x30c   :  { %v1323_v61 = vmax.f32 %v5667_v2, %v1279_v26  ;;  %1981 = vmatmul.bf16.vlgmr.msrb.gmra.mxu0 %v6067_v41  ;;  %v4048_v2 = vor.u32 %v4555_v32, %v4045_v62  ;;  %v1375_v33 = vmax.f32 %v6082_v58, 0.0  ;;  %v4040_v25 = vor.u32 %v4553_v29, %v4037_v15  ;;  %v3989_v26 = vld [vmem:[%s7502_s3 + $0x238] sm:$0xf0]  ;;  %v4551_v32 = vld [vmem:[%s7502_s3 + $0x284] sm:$0xf] }
 0x30d   :  { %v6087_v52 = vadd.f32 %v5725_v42, %v1324_v10  ;;  %2279 = vmatpush.bf16.msra.mxu0 %v4008_v17  ;;  %v3829_v10 = vld [vmem:[%s7502_s3 + $0x50] sm:$0xf]  ;;  %v3992_v0 = vor.u32 %v4541_v40, %v3989_v26  ;;  %1946 = vmatpush.bf16.msra.mxu3 %v3894_v30  ;;  %v4496_v17 = vld [vmem:[%s7502_s3 + $0xc4] sm:$0xf0]  ;;  %v4029_v62 = vld [vmem:[%s7502_s3 + $0x288] sm:$0xf0]  ;;  %v4024_v54 = vor.u32 %v4549_v63, %v4021_v53 }
 0x30e   :  { %v6096_v48 = vadd.f32 %v5728_v3, %v1323_v61  ;;  %2311 = vmatpush.bf16.msra.mxu1 %v4048_v2  ;;  %v3830_v61 = vor.u32 %v4482_v13, %v3829_v10  ;;  %v3886_v2 = vor.u32 %v4496_v17, %v3885_v27  ;;  %v4032_v59 = vor.u32 %v4551_v32, %v4029_v62  ;;  %v3973_v29 = vld [vmem:[%s7502_s3 + $0x218] sm:$0xf0]  ;;  %v4547_v30 = vld [vmem:[%s7502_s3 + $0x264] sm:$0xf]  ;;  %v3821_v40 = vld [vmem:[%s7502_s3 + $0x40] sm:$0xf] }
 0x30f   :  { %v1378_v38 = vmax.f32 %v6087_v52, 0.0  ;;  %v3976_v15 = vor.u32 %v4537_v60, %v3973_v29  ;;  %v4480_v26 = vld [vmem:[%s7502_s3 + $0x44] sm:$0xf0]  ;;  %v3877_v13 = vld [vmem:[%s7502_s3 + $0xb0] sm:$0xf] }
 0x310   :  { %v1377_v55 = vmax.f32 %v6096_v48, 0.0  ;;  %1917 = vmatpush.bf16.msra.mxu2 %v3830_v61  ;;  %v3822_v27 = vor.u32 %v4480_v26, %v3821_v40  ;;  %v4494_v61 = vld [vmem:[%s7502_s3 + $0xb4] sm:$0xf0]  ;;  %v4535_v17 = vld [vmem:[%s7502_s3 + $0x204] sm:$0xf] }
 0x311   :  { %v6118_v31 = vpack.c.bf16 %v1378_v38, %v1376_v7  ;;  %3912 = vmatmul.msk.bf16.gmra.mxu1 %vm1610_vm6, %v6102_v34  ;;  %2280 = vmatpush.bf16.msra.mxu0 %v4000_v4  ;;  %v3981_v4 = vld [vmem:[%s7502_s3 + $0x228] sm:$0xf0]  ;;  %v3878_v32 = vor.u32 %v4494_v61, %v3877_v13  ;;  %v3805_v53 = vld [vmem:[%s7502_s3 + $0x20] sm:$0xf]  ;;  %v4476_v60 = vld [vmem:[%s7502_s3 + $0x24] sm:$0xf0] }
 0x312   :  { %v6135_v19 = vpack.c.bf16 %v1377_v55, %v1375_v33  ;;  %2312 = vmatpush.bf16.msra.mxu1 %v4040_v25  ;;  %v3984_v50 = vor.u32 %v4539_v5, %v3981_v4  ;;  %1947 = vmatpush.bf16.msra.mxu3 %v3886_v2  ;;  %v4013_v25 = vld [vmem:[%s7502_s3 + $0x268] sm:$0xf0]  ;;  %v4478_v2 = vld [vmem:[%s7502_s3 + $0x34] sm:$0xf0]  ;;  %v3869_v5 = vld [vmem:[%s7502_s3 + $0xa0] sm:$0xf]  ;;  %v3806_v29 = vor.u32 %v4476_v60, %v3805_v53 }
 0x313   :  { %3782 = vmatmul.msk.bf16.gmra.mxu3 %vm1610_vm6, %v6118_v31  ;;  %v4016_v10 = vor.u32 %v4547_v30, %v4013_v25  ;;  %v3965_v62 = vld [vmem:[%s7502_s3 + $0x208] sm:$0xf0]  ;;  %v4492_v4 = vld [vmem:[%s7502_s3 + $0xa4] sm:$0xf0]  ;;  %v3861_v30 = vld [vmem:[%s7502_s3 + $0x90] sm:$0xf] }
 0x314   :  { %1656 = vmatmul.bf16.gmra.mxu2 %v6135_v19  ;;  %v3968_v1 = vor.u32 %v4535_v17, %v3965_v62  ;;  %v3949_v63 = vld [vmem:[%s7502_s3 + $0x1e8] sm:$0xf0]  ;;  %v4490_v25 = vld [vmem:[%s7502_s3 + $0x94] sm:$0xf0]  ;;  %v4472_v26 = vld [vmem:[%s7502_s3 + $0x4] sm:$0xf0] }
 0x315   :  { %2281 = vmatpush.bf16.msra.mxu0 %v3992_v0  ;;  %v6211_v0 = vpack.c.bf16 %v1372_v9, %v1370_v28  ;;  %1918 = vmatpush.bf16.msra.mxu2 %v3822_v27  ;;  %v4533_v28 = vld [vmem:[%s7502_s3 + $0x1f4] sm:$0xf]  ;;  %v3813_v9 = vld [vmem:[%s7502_s3 + $0x30] sm:$0xf]  ;;  %v3862_v40 = vor.u32 %v4490_v25, %v3861_v30  ;;  %v3790_v13 = vor.u32 %v4472_v26, %v3789_v56  ;;  %v4163_v53 = vld [vmem:[%s7502_s3 + $0x348] sm:$0xf0] }
 0x316   :  { %2313 = vmatpush.bf16.msra.mxu1 %v4032_v59  ;;  %1948 = vmatpush.bf16.msra.mxu3 %v3878_v32  ;;  %v3814_v59 = vor.u32 %v4478_v2, %v3813_v9  ;;  %v4003_v58 = vld [vmem:[%s7502_s3 + $0x250] sm:$0xf]  ;;  %v4059_v32 = vld [vmem:[%s7502_s3 + $0x2c0] sm:$0xf]  ;;  %v4587_v2 = vld [vmem:[%s7502_s3 + $0x3a4] sm:$0xf] }
 0x317   :  { %v4585_v60 = vld [vmem:[%s7502_s3 + $0x394] sm:$0xf]  ;;  %v4051_v25 = vld [vmem:[%s7502_s3 + $0x2b0] sm:$0xf]  ;;  %v4195_v26 = vld [vmem:[%s7502_s3 + $0x388] sm:$0xf0] }
 0x318   :  { %v3955_v52 = vld [vmem:[%s7502_s3 + $0x1f0] sm:$0xf]  ;;  %v4619_v48 = vld [vmem:[%s7502_s3 + $0x4a4] sm:$0xf] }
 0x319   :  { %2282 = vmatpush.bf16.msra.mxu0 %v3984_v50  ;;  %1919 = vmatpush.bf16.msra.mxu2 %v3814_v59  ;;  %v3870_v50 = vor.u32 %v4492_v4, %v3869_v5  ;;  %v3995_v59 = vld [vmem:[%s7502_s3 + $0x240] sm:$0xf]  ;;  %v4544_v5 = vld [vmem:[%s7502_s3 + $0x244] sm:$0xf0] }
 0x31a   :  { %2314 = vmatpush.bf16.msra.mxu1 %v4024_v54 }
 0x31b   :  { %1949 = vmatpush.bf16.msra.mxu3 %v3870_v50  ;;  %v3996_v50 = vor.u32 %v4544_v5, %v3995_v59  ;;  %v4139_v5 = vld [vmem:[%s7502_s3 + $0x318] sm:$0xf0] }
 0x31c   :  { %1986 = vmatmul.bf16.gmra.mxu0 %v5781_v21 }
 0x31d   :  { %2283 = vmatpush.bf16.msra.mxu0 %v3976_v15  ;;  %v6261_v15 = vpack.c.bf16 %v1371_v18, %v1369_v51  ;;  %1920 = vmatpush.bf16.msra.mxu2 %v3806_v29  ;;  %v3797_v51 = vld [vmem:[%s7502_s3 + $0x10] sm:$0xf]  ;;  %v4488_v18 = vld [vmem:[%s7502_s3 + $0x84] sm:$0xf0]  ;;  %v4203_v29 = vld [vmem:[%s7502_s3 + $0x398] sm:$0xf0] }
 0x31e   :  { %2315 = vmatpush.bf16.msra.mxu1 %v4016_v10  ;;  %v3798_v23 = vor.u32 %v4474_v8, %v3797_v51  ;;  %v3854_v7 = vor.u32 %v4488_v18, %v3853_v24  ;;  %v6303_v10 = vpack.c.bf16 %v1375_v33, %v1373_v20  ;;  %v4219_v20 = vld [vmem:[%s7502_s3 + $0x3b8] sm:$0xf0]  ;;  %v4546_v33 = vld [vmem:[%s7502_s3 + $0x254] sm:$0xf0]  ;;  %v4206_v51 = vor.u32 %v4585_v60, %v4203_v29  ;;  %v4573_v8 = vld [vmem:[%s7502_s3 + $0x334] sm:$0xf] }
 0x31f   :  { %1950 = vmatpush.bf16.msra.mxu3 %v3862_v40  ;;  %v4222_v62 = vor.u32 %v4589_v39, %v4219_v20  ;;  %v4558_v40 = vld [vmem:[%s7502_s3 + $0x2b4] sm:$0xf0]  ;;  %v4155_v18 = vld [vmem:[%s7502_s3 + $0x338] sm:$0xf0]  ;;  %v3987_v39 = vld [vmem:[%s7502_s3 + $0x230] sm:$0xf] }
 0x320   :  { %v4052_v24 = vor.u32 %v4558_v40, %v4051_v25  ;;  %v4158_v56 = vor.u32 %v4573_v8, %v4155_v18  ;;  %v4542_v20 = vld [vmem:[%s7502_s3 + $0x234] sm:$0xf0]  ;;  %v4540_v60 = vld [vmem:[%s7502_s3 + $0x224] sm:$0xf0]  ;;  %v4567_v25 = vld [vmem:[%s7502_s3 + $0x304] sm:$0xf] }
 0x321   :  { %3913 = vmatmul.msk.bf16.gmra.mxu1 %vm1610_vm6, %v6211_v0  ;;  %2284 = vmatpush.bf16.msra.mxu0 %v3968_v1  ;;  %v4004_v1 = vor.u32 %v4546_v33, %v4003_v58  ;;  %v2541_v9 = vand.u32 %v4222_v62, %v5429_v22  ;;  %v3988_v33 = vor.u32 %v4542_v20, %v3987_v39  ;;  %v4187_v62 = vld [vmem:[%s7502_s3 + $0x378] sm:$0xf0]  ;;  %v4131_v40 = vld [vmem:[%s7502_s3 + $0x308] sm:$0xf0]  ;;  %v4577_v8 = vld [vmem:[%s7502_s3 + $0x354] sm:$0xf] }
 0x322   :  { %1921 = vmatpush.bf16.msra.mxu2 %v3798_v23 }
 0x323   :  { %3783 = vmatmul.msk.bf16.vlgmr.msrb.gmra.mxu3 %vm1610_vm6, %v5768_v11  ;;  %v3960_v11 = vor.u32 %v4533_v28, %v3957_v12  ;;  %v4560_v28 = vld [vmem:[%s7502_s3 + $0x2c4] sm:$0xf0]  ;;  %2631 = vmatpush.bf16.msrb.mxu1 %v2541_v9 }
 0x324   :  { %1699 = vmatmul.bf16.vlgmr.msrb.gmra.mxu2 %v5785_v44  ;;  %v4531_v44 = vld [vmem:[%s7502_s3 + $0x1e4] sm:$0xf]  ;;  %1951 = vmatpush.bf16.msra.mxu3 %v3854_v7  ;;  %v4060_v12 = vor.u32 %v4560_v28, %v4059_v32  ;;  %v4581_v32 = vld [vmem:[%s7502_s3 + $0x374] sm:$0xf]  ;;  %v4043_v28 = vld [vmem:[%s7502_s3 + $0x2a0] sm:$0xf] }
 0x325   :  { %2285 = vmatpush.bf16.msra.mxu0 %v3960_v11  ;;  %v3952_v54 = vor.u32 %v4531_v44, %v3949_v63  ;;  %v4211_v11 = vld [vmem:[%s7502_s3 + $0x3a8] sm:$0xf0]  ;;  %v4575_v63 = vld [vmem:[%s7502_s3 + $0x344] sm:$0xf]  ;;  %v4190_v9 = vor.u32 %v4581_v32, %v4187_v62  ;;  %v3971_v32 = vld [vmem:[%s7502_s3 + $0x210] sm:$0xf] }
 0x326   :  { %1922 = vmatpush.bf16.msra.mxu2 %v3790_v13  ;;  %v2216_v4 = vand.u32 %v4060_v12, %v5429_v22  ;;  %v4214_v44 = vor.u32 %v4587_v2, %v4211_v11  ;;  %v4583_v7 = vld [vmem:[%s7502_s3 + $0x384] sm:$0xf]  ;;  %v4556_v12 = vld [vmem:[%s7502_s3 + $0x2a4] sm:$0xf0]  ;;  %v4569_v2 = vld [vmem:[%s7502_s3 + $0x314] sm:$0xf] }
 0x327   :  { %v4198_v13 = vor.u32 %v4583_v7, %v4195_v26  ;;  %v4044_v59 = vor.u32 %v4556_v12, %v4043_v28  ;;  %v4554_v7 = vld [vmem:[%s7502_s3 + $0x294] sm:$0xf0]  ;;  %v4565_v26 = vld [vmem:[%s7502_s3 + $0x2f4] sm:$0xf]  ;;  %v1259_v12 = vpop.permute.xlu0 %1258 }
 0x328   :  { %2251 = vmatpush.bf16.msrb.mxu3 %v2216_v4  ;;  %2632 = vmatpush.bf16.msrb.mxu1 %v4214_v44  ;;  %v4579_v4 = vld [vmem:[%s7502_s3 + $0x364] sm:$0xf]  ;;  %v4179_v44 = vld [vmem:[%s7502_s3 + $0x368] sm:$0xf0]  ;;  %v4561_v28 = vld [vmem:[%s7502_s3 + $0x2d4] sm:$0xf] }
 0x329   :  { %2286 = vmatpush.bf16.msra.mxu0 %v3952_v54  ;;  %v4166_v54 = vor.u32 %v4575_v63, %v4163_v53  ;;  %v4142_v63 = vor.u32 %v4569_v2, %v4139_v5  ;;  %v4182_v53 = vor.u32 %v4579_v4, %v4179_v44  ;;  %v4027_v2 = vld [vmem:[%s7502_s3 + $0x280] sm:$0xf]  ;;  %v4536_v4 = vld [vmem:[%s7502_s3 + $0x204] sm:$0xf0] }
 0x32a   :  { %2221 = vmatpush.bf16.msrb.mxu2 %v4004_v1 }
 0x32c   :  { %1991 = vmatmul.bf16.gmra.mxu0 %v6261_v15  ;;  %2633 = vmatpush.bf16.msrb.mxu1 %v4206_v51  ;;  %v4134_v51 = vor.u32 %v4567_v25, %v4131_v40  ;;  %v4019_v40 = vld [vmem:[%s7502_s3 + $0x270] sm:$0xf] }
 0x32d   :  { %2601 = vmatpush.bf16.msrb.mxu0 %v4166_v54  ;;  %2252 = vmatpush.bf16.msrb.mxu3 %v4052_v24  ;;  %v3979_v54 = vld [vmem:[%s7502_s3 + $0x220] sm:$0xf]  ;;  %v4171_v24 = vld [vmem:[%s7502_s3 + $0x358] sm:$0xf0] }
 0x32e   :  { %2222 = vmatpush.bf16.msrb.mxu2 %v3996_v50  ;;  %v3980_v29 = vor.u32 %v4540_v60, %v3979_v54  ;;  %v4174_v18 = vor.u32 %v4577_v8, %v4171_v24 }
 0x330   :  { %2634 = vmatpush.bf16.msrb.mxu1 %v4198_v13 }
 0x331   :  { %3914 = vmatmul.msk.bf16.gmra.mxu1 %vm1610_vm6, %v6274_v16  ;;  %2602 = vmatpush.bf16.msrb.mxu0 %v4158_v56  ;;  %v4035_v56 = vld [vmem:[%s7502_s3 + $0x290] sm:$0xf] }
 0x332   :  { %2223 = vmatpush.bf16.msrb.mxu2 %v3988_v33  ;;  %2253 = vmatpush.bf16.msrb.mxu3 %v4044_v59  ;;  %v4036_v13 = vor.u32 %v4554_v7, %v4035_v56  ;;  %v4115_v33 = vld [vmem:[%s7502_s3 + $0x2e8] sm:$0xf0]  ;;  %v3963_v59 = vld [vmem:[%s7502_s3 + $0x200] sm:$0xf] }
 0x333   :  { %3784 = vmatmul.msk.bf16.gmra.mxu3 %vm1610_vm6, %v5851_v37  ;;  %v3964_v54 = vor.u32 %v4536_v4, %v3963_v59  ;;  %v4617_v4 = vld [vmem:[%s7502_s3 + $0x494] sm:$0xf] }
 0x334   :  { %1704 = vmatmul.bf16.gmra.mxu2 %v5866_v46  ;;  %2635 = vmatpush.bf16.msrb.mxu1 %v4190_v9 }
 0x336   :  { %2224 = vmatpush.bf16.msrb.mxu2 %v3980_v29  ;;  %2254 = vmatpush.bf16.msrb.mxu3 %v4036_v13  ;;  %v4011_v13 = vld [vmem:[%s7502_s3 + $0x260] sm:$0xf] }
 0x338   :  { %2636 = vmatpush.bf16.msrb.mxu1 %v4182_v53 }
 0x33c   :  { %1996 = vmatmul.bf16.gmra.mxu0 %v6303_v10  ;;  %v1671_v27 = vpop.f32.mrf.mxu3  ;;  %2637 = vmatpush.bf16.msrb.mxu1 %v4174_v18 }
 0x33d   :  { %v1642_v61 = vpop.f32.mrf.mxu2 }
 0x33e   :  { %v6306_v17 = vadd.f32 %v1671_v27, %v1642_v61  ;;  %v4571_v27 = vld [vmem:[%s7502_s3 + $0x324] sm:$0xf]  ;;  %v4147_v61 = vld [vmem:[%s7502_s3 + $0x328] sm:$0xf0] }
 0x33f   :  { %v4150_v58 = vor.u32 %v4571_v27, %v4147_v61  ;;  %v4123_v27 = vld [vmem:[%s7502_s3 + $0x2f8] sm:$0xf0]  ;;  %v1261_v61 = vpop.permute.xlu1 %1260 }
 0x340   :  { %v4126_v39 = vor.u32 %v4565_v26, %v4123_v27  ;;  %v1326_v20 = vmax.f32 %v5713_v36, %v1261_v61  ;;  %v4538_v36 = vld [vmem:[%s7502_s3 + $0x214] sm:$0xf0]  ;;  %v1280_v44 = vsel %vm1270_vm5, %v1259_v12, %v1261_v61  ;;  %v4548_v27 = vld [vmem:[%s7502_s3 + $0x264] sm:$0xf0]  ;;  %v3947_v61 = vld [vmem:[%s7502_s3 + $0x1e0] sm:$0xf] }
 0x341   :  { %4069 = vmatmul.msk.bf16.vlgmr.msra.gmra.mxu1 %vm1610_vm6, %v6102_v34  ;;  %2603 = vmatpush.bf16.msrb.mxu0 %v4150_v58  ;;  %v4563_v58 = vld [vmem:[%s7502_s3 + $0x2e4] sm:$0xf]  ;;  %v1325_v29 = vmax.f32 %v5707_v49, %v1280_v44  ;;  %v4590_v12 = vld [vmem:[%s7502_s3 + $0x3b4] sm:$0xf0]  ;;  %v4369_v44 = vld [vmem:[%s7502_s3 + $0x498] sm:$0xf0] }
 0x342   :  { %v4118_v62 = vor.u32 %v4563_v58, %v4115_v33  ;;  %v4532_v58 = vld [vmem:[%s7502_s3 + $0x1e4] sm:$0xf0] }
 0x343   :  { %3785 = vmatmul.msk.bf16.gmra.mxu3 %vm1610_vm6, %v5936_v14  ;;  %v6516_v8 = vadd.f32 %v5728_v3, %v1325_v29  ;;  %v3948_v33 = vor.u32 %v4532_v58, %v3947_v61  ;;  %v4605_v29 = vld [vmem:[%s7502_s3 + $0x434] sm:$0xf]  ;;  %v4588_v61 = vld [vmem:[%s7502_s3 + $0x3a4] sm:$0xf0] }
 0x344   :  { %1709 = vmatmul.bf16.gmra.mxu2 %v5993_v43  ;;  %v6358_v30 = vpop.f32.mrf.mxu3 }
 0x345   :  { %v6369_v23 = vpop.f32.mrf.mxu2  ;;  %2604 = vmatpush.bf16.msrb.mxu0 %v4142_v63  ;;  %v1379_v7 = vmax.f32 %v6516_v8, 0.0  ;;  %v4105_v8 = vld [vmem:[%s7502_s3 + $0x2d0] sm:$0xf] }
 0x349   :  { %2605 = vmatpush.bf16.msrb.mxu0 %v4134_v51  ;;  %v4550_v51 = vld [vmem:[%s7502_s3 + $0x274] sm:$0xf0] }
 0x34a   :  { %v4020_v49 = vor.u32 %v4550_v51, %v4019_v40  ;;  %v4321_v40 = vld [vmem:[%s7502_s3 + $0x438] sm:$0xf0]  ;;  %v4153_v51 = vld [vmem:[%s7502_s3 + $0x330] sm:$0xf] }
 0x34c   :  { %2287 = vmatmul.bf16.vlgmr.msra.gmra.mxu0 %v5781_v21 }
 0x34d   :  { %2606 = vmatpush.bf16.msrb.mxu0 %v4126_v39  ;;  %v6543_v39 = vpack.c.bf16 %v1379_v7, %v1377_v55  ;;  %v4377_v55 = vld [vmem:[%s7502_s3 + $0x4a8] sm:$0xf0] }
 0x351   :  { %4070 = vmatmul.msk.bf16.gmra.mxu1 %vm1610_vm6, %v6211_v0  ;;  %2607 = vmatpush.bf16.msrb.mxu0 %v4118_v62  ;;  %v4576_v62 = vld [vmem:[%s7502_s3 + $0x344] sm:$0xf0] }
 0x353   :  { %3786 = vmatmul.msk.bf16.gmra.mxu3 %vm1610_vm6, %v6118_v31 }
 0x354   :  { %1714 = vmatmul.bf16.gmra.mxu2 %v6135_v19 }
 0x356   :  { %v1676_v1 = vpop.f32.mrf.mxu3 }
 0x357   :  { %v1647_v11 = vpop.f32.mrf.mxu2 }
 0x358   :  { %v6421_v50 = vadd.f32 %v1676_v1, %v1647_v11  ;;  %v6473_v1 = vadd.f32 %v5725_v42, %v1326_v20  ;;  %v4552_v11 = vld [vmem:[%s7502_s3 + $0x284] sm:$0xf0]  ;;  %v4012_v20 = vor.u32 %v4548_v27, %v4011_v13  ;;  %v4209_v27 = vld [vmem:[%s7502_s3 + $0x3a0] sm:$0xf] }
 0x359   :  { %v4028_v5 = vor.u32 %v4552_v11, %v4027_v2 }
 0x35a   :  { %v1380_v63 = vmax.f32 %v6473_v1, 0.0 }
 0x35b   :  { %2255 = vmatpush.bf16.msrb.mxu3 %v4028_v5 }
 0x35c   :  { %2292 = vmatmul.bf16.gmra.mxu0 %v6261_v15  ;;  %v6505_v25 = vpack.c.bf16 %v1380_v63, %v1378_v38  ;;  %v4534_v38 = vld [vmem:[%s7502_s3 + $0x1f4] sm:$0xf0] }
 0x35d   :  { %v3956_v56 = vor.u32 %v4534_v38, %v3955_v52  ;;  %v4324_v52 = vor.u32 %v4605_v29, %v4321_v40  ;;  %v4345_v29 = vld [vmem:[%s7502_s3 + $0x468] sm:$0xf0] }
 0x35e   :  { %v6495_v53 = vpop.f32.mrf.mxu3 }
 0x35f   :  { %v6498_v60 = vpop.f32.mrf.mxu2  ;;  %2256 = vmatpush.bf16.msrb.mxu3 %v4020_v49  ;;  %v4574_v49 = vld [vmem:[%s7502_s3 + $0x334] sm:$0xf0] }
 0x360   :  { %v4154_v38 = vor.u32 %v4574_v49, %v4153_v51 }
 0x361   :  { %4071 = vmatmul.msk.bf16.gmra.mxu1 %vm1610_vm6, %v6274_v16 }
 0x363   :  { %3907 = vmatmul.msk.bf16.vlgmr.msra.gmra.mxu3 %vm1610_vm6, %v6024_v35  ;;  %v3972_v35 = vor.u32 %v4538_v36, %v3971_v32  ;;  %v4161_v36 = vld [vmem:[%s7502_s3 + $0x340] sm:$0xf] }
 0x364   :  { %1923 = vmatmul.bf16.vlgmr.msra.gmra.mxu2 %v6067_v41  ;;  %v4107_v41 = vld [vmem:[%s7502_s3 + $0x2d8] sm:$0xf0]  ;;  %2257 = vmatpush.bf16.msrb.mxu3 %v4012_v20 }
 0x365   :  { %2225 = vmatpush.bf16.msrb.mxu2 %v3972_v35  ;;  %v4110_v9 = vor.u32 %v4561_v28, %v4107_v41  ;;  %v4217_v35 = vld [vmem:[%s7502_s3 + $0x3b0] sm:$0xf]  ;;  %v4380_v28 = vor.u32 %v4619_v48, %v4377_v55  ;;  %v4162_v41 = vor.u32 %v4576_v62, %v4161_v36  ;;  %v4603_v48 = vld [vmem:[%s7502_s3 + $0x424] sm:$0xf]  ;;  %v4313_v55 = vld [vmem:[%s7502_s3 + $0x428] sm:$0xf0] }
 0x366   :  { %v1681_v24 = vpop.f32.mrf.mxu3  ;;  %v4218_v2 = vor.u32 %v4590_v12, %v4217_v35  ;;  %v4316_v36 = vor.u32 %v4603_v48, %v4313_v55  ;;  %v4613_v35 = vld [vmem:[%s7502_s3 + $0x474] sm:$0xf]  ;;  %v4201_v48 = vld [vmem:[%s7502_s3 + $0x390] sm:$0xf]  ;;  %v4586_v55 = vld [vmem:[%s7502_s3 + $0x394] sm:$0xf0] }
 0x367   :  { %2608 = vmatpush.bf16.msrb.mxu0 %v4110_v9  ;;  %v2863_v11 = vand.u32 %v4380_v28, %v5429_v22  ;;  %v4353_v28 = vld [vmem:[%s7502_s3 + $0x478] sm:$0xf0]  ;;  %v4601_v12 = vld [vmem:[%s7502_s3 + $0x414] sm:$0xf] }
 0x368   :  { %v2538_v59 = vand.u32 %v4218_v2, %v5429_v22  ;;  %v4305_v2 = vld [vmem:[%s7502_s3 + $0x418] sm:$0xf0] }
 0x369   :  { %2226 = vmatpush.bf16.msrb.mxu2 %v3964_v54  ;;  %2953 = vmatpush.bf16.msra.mxu1 %v2863_v11  ;;  %v4372_v54 = vor.u32 %v4617_v4, %v4369_v44  ;;  %v4145_v11 = vld [vmem:[%s7502_s3 + $0x320] sm:$0xf]  ;;  %v4308_v4 = vor.u32 %v4601_v12, %v4305_v2  ;;  %v4597_v12 = vld [vmem:[%s7502_s3 + $0x3f4] sm:$0xf]  ;;  %v4289_v2 = vld [vmem:[%s7502_s3 + $0x3f8] sm:$0xf0] }
 0x36a   :  { %2573 = vmatpush.bf16.msra.mxu3 %v2538_v59  ;;  %v4572_v59 = vld [vmem:[%s7502_s3 + $0x324] sm:$0xf0] }
 0x36b   :  { %2923 = vmatpush.bf16.msra.mxu0 %v4324_v52  ;;  %v4146_v44 = vor.u32 %v4572_v59, %v4145_v11  ;;  %v4292_v59 = vor.u32 %v4597_v12, %v4289_v2  ;;  %v4129_v12 = vld [vmem:[%s7502_s3 + $0x300] sm:$0xf] }
 0x36c   :  { %2297 = vmatmul.bf16.gmra.mxu0 %v6303_v10 }
 0x36d   :  { %2227 = vmatpush.bf16.msrb.mxu2 %v3956_v56  ;;  %2954 = vmatpush.bf16.msra.mxu1 %v4372_v54  ;;  %v4611_v54 = vld [vmem:[%s7502_s3 + $0x464] sm:$0xf] }
 0x36e   :  { %v6605_v56 = vpop.f32.mrf.mxu3  ;;  %v4348_v49 = vor.u32 %v4611_v54, %v4345_v29 }
 0x36f   :  { %2924 = vmatpush.bf16.msra.mxu0 %v4316_v36 }
 0x371   :  { %4072 = vmatmul.msk.bf16.gmra.mxu1 %vm1610_vm6, %v6505_v25  ;;  %2228 = vmatpush.bf16.msrb.mxu2 %v3948_v33  ;;  %v4210_v33 = vor.u32 %v4588_v61, %v4209_v27 }
 0x373   :  { %3908 = vmatmul.msk.bf16.gmra.mxu3 %vm1610_vm6, %v6102_v34  ;;  %2925 = vmatpush.bf16.msra.mxu0 %v4308_v4  ;;  %v4607_v4 = vld [vmem:[%s7502_s3 + $0x444] sm:$0xf] }
 0x374   :  { %1928 = vmatmul.bf16.gmra.mxu2 %v5781_v21  ;;  %2574 = vmatpush.bf16.msra.mxu3 %v4210_v33  ;;  %v4337_v33 = vld [vmem:[%s7502_s3 + $0x458] sm:$0xf0] }
 0x375   :  { %v1652_v18 = vpop.f32.mrf.mxu2  ;;  %2543 = vmatpush.bf16.msra.mxu2 %v4162_v41  ;;  %v4356_v41 = vor.u32 %v4613_v35, %v4353_v28  ;;  %v4137_v35 = vld [vmem:[%s7502_s3 + $0x310] sm:$0xf]  ;;  %v4202_v28 = vor.u32 %v4586_v55, %v4201_v48  ;;  %v4193_v48 = vld [vmem:[%s7502_s3 + $0x380] sm:$0xf]  ;;  %v4584_v55 = vld [vmem:[%s7502_s3 + $0x384] sm:$0xf0] }
 0x376   :  { %v6528_v26 = vadd.f32 %v1681_v24, %v1652_v18  ;;  %v4615_v24 = vld [vmem:[%s7502_s3 + $0x484] sm:$0xf]  ;;  %v4361_v18 = vld [vmem:[%s7502_s3 + $0x488] sm:$0xf0] }
 0x377   :  { %v4364_v20 = vor.u32 %v4615_v24, %v4361_v18  ;;  %v4297_v24 = vld [vmem:[%s7502_s3 + $0x408] sm:$0xf0] }
 0x378   :  { %2575 = vmatpush.bf16.msra.mxu3 %v4202_v28  ;;  %v4593_v28 = vld [vmem:[%s7502_s3 + $0x3d4] sm:$0xf] }
 0x379   :  { %2544 = vmatpush.bf16.msra.mxu2 %v4154_v38  ;;  %2955 = vmatpush.bf16.msra.mxu1 %v4364_v20  ;;  %v4599_v38 = vld [vmem:[%s7502_s3 + $0x404] sm:$0xf]  ;;  %v4609_v20 = vld [vmem:[%s7502_s3 + $0x454] sm:$0xf] }
 0x37a   :  { %v4300_v27 = vor.u32 %v4599_v38, %v4297_v24  ;;  %v4340_v36 = vor.u32 %v4609_v20, %v4337_v33  ;;  %v4281_v38 = vld [vmem:[%s7502_s3 + $0x3e8] sm:$0xf0]  ;;  %v1265_v24 = vpop.permute.xlu0 %1264 }
 0x37c   :  { %2302 = vmatmul.bf16.gmra.mxu0 %v6543_v39 }
 0x37d   :  { %v6615_v58 = vpop.f32.mrf.mxu2  ;;  %2956 = vmatpush.bf16.msra.mxu1 %v4356_v41  ;;  %2545 = vmatpush.bf16.msra.mxu2 %v4146_v44  ;;  %v4570_v41 = vld [vmem:[%s7502_s3 + $0x314] sm:$0xf0]  ;;  %v4329_v44 = vld [vmem:[%s7502_s3 + $0x448] sm:$0xf0] }
 0x37e   :  { %v6549_v32 = vpop.f32.mrf.mxu1  ;;  %2926 = vmatpush.bf16.msra.mxu0 %v4300_v27  ;;  %v4138_v11 = vor.u32 %v4570_v41, %v4137_v35  ;;  %v4194_v35 = vor.u32 %v4584_v55, %v4193_v48  ;;  %v4273_v41 = vld [vmem:[%s7502_s3 + $0x3d8] sm:$0xf0] }
 0x380   :  { %2576 = vmatpush.bf16.msra.mxu3 %v4194_v35  ;;  %v4185_v35 = vld [vmem:[%s7502_s3 + $0x370] sm:$0xf] }
 0x381   :  { %4227 = vmatmul.msk.bf16.vlgmr.msrb.gmra.mxu1 %vm1610_vm6, %v5851_v37  ;;  %2546 = vmatpush.bf16.msra.mxu2 %v4138_v11 }
 0x382   :  { %2957 = vmatpush.bf16.msra.mxu1 %v4348_v49  ;;  %2927 = vmatpush.bf16.msra.mxu0 %v4292_v59 }
 0x383   :  { %3909 = vmatmul.msk.bf16.gmra.mxu3 %vm1610_vm6, %v6211_v0 }
 0x384   :  { %1933 = vmatmul.bf16.gmra.mxu2 %v6261_v15 }
 0x386   :  { %v6574_v9 = vpop.f32.mrf.mxu1  ;;  %2958 = vmatpush.bf16.msra.mxu1 %v4340_v36  ;;  %v1328_v36 = vmax.f32 %v5762_v57, %v1265_v24  ;;  %v4568_v57 = vld [vmem:[%s7502_s3 + $0x304] sm:$0xf0] }
 0x387   :  { %v4130_v2 = vor.u32 %v4568_v57, %v4129_v12 }
 0x389   :  { %v6578_v5 = vpop.f32.mrf.mxu0  ;;  %2547 = vmatpush.bf16.msra.mxu2 %v4130_v2 }
 0x38c   :  { %2609 = vmatmul.bf16.vlgmr.msrb.gmra.mxu0 %v5866_v46 }
 0x38e   :  { %v6607_v13 = vpop.f32.mrf.mxu1 }
 0x391   :  { %v6623_v62 = vpop.f32.mrf.mxu0  ;;  %4228 = vmatmul.msk.bf16.gmra.mxu1 %vm1610_vm6, %v5936_v14 }
 0x393   :  { %3910 = vmatmul.msk.bf16.gmra.mxu3 %vm1610_vm6, %v6274_v16 }
 0x394   :  { %1938 = vmatmul.bf16.gmra.mxu2 %v6303_v10 }
 0x396   :  { %v1686_v40 = vpop.f32.mrf.mxu3  ;;  %v6654_v51 = vpop.f32.mrf.mxu1 }
 0x397   :  { %v1657_v52 = vpop.f32.mrf.mxu2 }
 0x398   :  { %v6662_v18 = vadd.f32 %v1686_v40, %v1657_v52  ;;  %v4332_v40 = vor.u32 %v4607_v4, %v4329_v44  ;;  %v4595_v52 = vld [vmem:[%s7502_s3 + $0x3e4] sm:$0xf]  ;;  %v6736_v4 = vadd.f32 %v5725_v42, %v1328_v36 }
 0x399   :  { %v6664_v61 = vpop.f32.mrf.mxu0  ;;  %v4284_v20 = vor.u32 %v4595_v52, %v4281_v38  ;;  %v1263_v38 = vpop.permute.xlu2 %1262 }
 0x39a   :  { %2959 = vmatpush.bf16.msra.mxu1 %v4332_v40  ;;  %v1281_v48 = vsel %vm1270_vm5, %v1263_v38, %v1265_v24  ;;  %v1382_v55 = vmax.f32 %v6736_v4, 0.0  ;;  %v4564_v38 = vld [vmem:[%s7502_s3 + $0x2e4] sm:$0xf0]  ;;  %v4335_v4 = vld [vmem:[%s7502_s3 + $0x450] sm:$0xf] }
 0x39b   :  { %2928 = vmatpush.bf16.msra.mxu0 %v4284_v20 }
 0x39c   :  { %2614 = vmatmul.bf16.gmra.mxu0 %v5993_v43  ;;  %v6772_v2 = vpack.c.bf16 %v1382_v55, %v1380_v63  ;;  %v4177_v63 = vld [vmem:[%s7502_s3 + $0x360] sm:$0xf] }
 0x39e   :  { %v1688_v54 = vpop.f32.mrf.mxu3  ;;  %v6697_v29 = vpop.f32.mrf.mxu1 }
 0x39f   :  { %v1659_v49 = vpop.f32.mrf.mxu2 }
 0x3a0   :  { %v6705_v27 = vadd.f32 %v1688_v54, %v1659_v49  ;;  %v4265_v54 = vld [vmem:[%s7502_s3 + $0x3c8] sm:$0xf0] }
 0x3a1   :  { %v6707_v33 = vpop.f32.mrf.mxu0  ;;  %4229 = vmatmul.msk.bf16.gmra.mxu1 %vm1610_vm6, %v6118_v31 }
 0x3a3   :  { %4065 = vmatmul.msk.bf16.vlgmr.msrb.gmra.mxu3 %vm1610_vm6, %v6102_v34  ;;  %v4276_v34 = vor.u32 %v4593_v28, %v4273_v41  ;;  %v4582_v28 = vld [vmem:[%s7502_s3 + $0x374] sm:$0xf0]  ;;  %v1327_v41 = vmax.f32 %v5752_v6, %v1281_v48 }
 0x3a4   :  { %2229 = vmatmul.bf16.vlgmr.msrb.gmra.mxu2 %v5781_v21  ;;  %v4591_v21 = vld [vmem:[%s7502_s3 + $0x3c4] sm:$0xf]  ;;  %v4186_v24 = vor.u32 %v4582_v28, %v4185_v35 }
 0x3a5   :  { %2929 = vmatpush.bf16.msra.mxu0 %v4276_v34  ;;  %v4268_v49 = vor.u32 %v4591_v21, %v4265_v54  ;;  %v6779_v6 = vadd.f32 %v5728_v3, %v1327_v41 }
 0x3a6   :  { %v1729_v11 = vpop.f32.mrf.mxu3  ;;  %v6733_v59 = vpop.f32.mrf.mxu1  ;;  %2577 = vmatpush.bf16.msra.mxu3 %v4186_v24 }
 0x3a7   :  { %v1700_v44 = vpop.f32.mrf.mxu2 }
 0x3a8   :  { %v1730_v40 = vadd.f32 %v1729_v11, %v1700_v44 }
 0x3a9   :  { %v6744_v52 = vpop.f32.mrf.mxu0  ;;  %2930 = vmatpush.bf16.msra.mxu0 %v4268_v49 }
 0x3aa   :  { %v1983_v20 = vadd.f32 %v6578_v5, %v1730_v40  ;;  %v4121_v5 = vld [vmem:[%s7502_s3 + $0x2f0] sm:$0xf]  ;;  %v4580_v40 = vld [vmem:[%s7502_s3 + $0x364] sm:$0xf0] }
 0x3ab   :  { %v4178_v49 = vor.u32 %v4580_v40, %v4177_v63 }
 0x3ac   :  { %v6750_v36 = vadd.f32 %v6549_v32, %v1983_v20  ;;  %2619 = vmatmul.bf16.gmra.mxu0 %v6135_v19  ;;  %v4566_v32 = vld [vmem:[%s7502_s3 + $0x2f4] sm:$0xf0] }
 0x3ad   :  { %v4122_v34 = vor.u32 %v4566_v32, %v4121_v5  ;;  %2578 = vmatpush.bf16.msra.mxu3 %v4178_v49 }
 0x3ae   :  { %v1731_v12 = vpop.f32.mrf.mxu3  ;;  %v6766_v57 = vpop.f32.mrf.mxu1 }
 0x3af   :  { %v1702_v11 = vpop.f32.mrf.mxu2  ;;  %2548 = vmatpush.bf16.msra.mxu2 %v4122_v34  ;;  %v4169_v34 = vld [vmem:[%s7502_s3 + $0x350] sm:$0xf] }
 0x3b0   :  { %v1732_v44 = vadd.f32 %v1731_v12, %v1702_v11  ;;  %v4578_v11 = vld [vmem:[%s7502_s3 + $0x354] sm:$0xf0] }
 0x3b1   :  { %v6774_v21 = vpop.f32.mrf.mxu0  ;;  %4230 = vmatmul.msk.bf16.gmra.mxu1 %vm1610_vm6, %v6772_v2 }
 0x3b2   :  { %v1985_v54 = vadd.f32 %v6623_v62, %v1732_v44  ;;  %v4113_v62 = vld [vmem:[%s7502_s3 + $0x2e0] sm:$0xf] }
 0x3b3   :  { %4066 = vmatmul.msk.bf16.gmra.mxu3 %vm1610_vm6, %v6211_v0  ;;  %v4114_v35 = vor.u32 %v4564_v38, %v4113_v62 }
 0x3b4   :  { %2234 = vmatmul.bf16.gmra.mxu2 %v6261_v15  ;;  %v6786_v1 = vadd.f32 %v6574_v9, %v1985_v54  ;;  %v1381_v9 = vmax.f32 %v6779_v6, 0.0 }
 0x3b5   :  { %2549 = vmatpush.bf16.msra.mxu2 %v4114_v35  ;;  %v4606_v35 = vld [vmem:[%s7502_s3 + $0x434] sm:$0xf0] }
 0x3b6   :  { %v1734_v20 = vpop.f32.mrf.mxu3  ;;  %v6801_v48 = vpop.f32.mrf.mxu1  ;;  %v6810_v41 = vpack.c.bf16 %v1381_v9, %v1379_v7  ;;  %v4562_v7 = vld [vmem:[%s7502_s3 + $0x2d4] sm:$0xf0] }
 0x3b7   :  { %v1705_v28 = vpop.f32.mrf.mxu2  ;;  %v4106_v54 = vor.u32 %v4562_v7, %v4105_v8 }
 0x3b8   :  { %v1735_v5 = vadd.f32 %v1734_v20, %v1705_v28  ;;  %v4319_v20 = vld [vmem:[%s7502_s3 + $0x430] sm:$0xf] }
 0x3b9   :  { %v6803_v24 = vpop.f32.mrf.mxu0  ;;  %2550 = vmatpush.bf16.msra.mxu2 %v4106_v54  ;;  %v4320_v28 = vor.u32 %v4606_v35, %v4319_v20 }
 0x3ba   :  { %v1988_v32 = vadd.f32 %v6664_v61, %v1735_v5  ;;  %v4170_v61 = vor.u32 %v4578_v11, %v4169_v34  ;;  %v4620_v5 = vld [vmem:[%s7502_s3 + $0x4a4] sm:$0xf0] }
 0x3bc   :  { %2624 = vmatmul.bf16.gmra.mxu0 %v6810_v41  ;;  %v6814_v12 = vadd.f32 %v6607_v13, %v1988_v32  ;;  %2579 = vmatpush.bf16.msra.mxu3 %v4170_v61 }
 0x3bd   :  { %2865 = vmatpush.bf16.msrb.mxu2 %v4320_v28 }
 0x3be   :  { %v1736_v44 = vpop.f32.mrf.mxu3  ;;  %v6828_v13 = vpop.f32.mrf.mxu1 }
 0x3bf   :  { %v1707_v63 = vpop.f32.mrf.mxu2 }
 0x3c0   :  { %v1737_v40 = vadd.f32 %v1736_v44, %v1707_v63  ;;  %v4311_v63 = vld [vmem:[%s7502_s3 + $0x420] sm:$0xf] }
 0x3c1   :  { %v6830_v62 = vpop.f32.mrf.mxu0  ;;  %4385 = vmatmul.msk.bf16.vlgmr.msra.gmra.mxu1 %vm1610_vm6, %v6211_v0 }
 0x3c2   :  { %v1990_v49 = vadd.f32 %v6707_v33, %v1737_v40  ;;  %v4375_v33 = vld [vmem:[%s7502_s3 + $0x4a0] sm:$0xf]  ;;  %v4604_v40 = vld [vmem:[%s7502_s3 + $0x424] sm:$0xf0] }
 0x3c3   :  { %4067 = vmatmul.msk.bf16.gmra.mxu3 %vm1610_vm6, %v6274_v16  ;;  %v4376_v34 = vor.u32 %v4620_v5, %v4375_v33 }
 0x3c4   :  { %2239 = vmatmul.bf16.gmra.mxu2 %v6303_v10  ;;  %v6839_v38 = vadd.f32 %v6654_v51, %v1990_v49  ;;  %v4312_v49 = vor.u32 %v4604_v40, %v4311_v63 }
 0x3c5   :  { %v2860_v61 = vand.u32 %v4376_v34, %v5429_v22 }
 0x3c6   :  { %v1739_v32 = vpop.f32.mrf.mxu3  ;;  %v2319_v51 = vpop.f32.mrf.mxu1  ;;  %2866 = vmatpush.bf16.msrb.mxu2 %v4312_v49 }
 0x3c7   :  { %v1710_v11 = vpop.f32.mrf.mxu2  ;;  %2895 = vmatpush.bf16.msrb.mxu3 %v2860_v61  ;;  %v4303_v61 = vld [vmem:[%s7502_s3 + $0x410] sm:$0xf] }
 0x3c8   :  { %v1740_v8 = vadd.f32 %v1739_v32, %v1710_v11 }
 0x3c9   :  { %v6854_v7 = vpop.f32.mrf.mxu0 }
 0x3ca   :  { %v1993_v44 = vadd.f32 %v6744_v52, %v1740_v8  ;;  %v4367_v52 = vld [vmem:[%s7502_s3 + $0x490] sm:$0xf] }
 0x3cc   :  { %2931 = vmatmul.bf16.vlgmr.msra.gmra.mxu0 %v6261_v15  ;;  %v6859_v54 = vadd.f32 %v6697_v29, %v1993_v44  ;;  %v4618_v29 = vld [vmem:[%s7502_s3 + $0x494] sm:$0xf0] }
 0x3cd   :  { %v4368_v33 = vor.u32 %v4618_v29, %v4367_v52  ;;  %v4616_v29 = vld [vmem:[%s7502_s3 + $0x484] sm:$0xf0] }
 0x3ce   :  { %v1741_v22 = vpop.f32.mrf.mxu3  ;;  %v2322_v20 = vpop.f32.mrf.mxu1 }
 0x3cf   :  { %v1712_v35 = vpop.f32.mrf.mxu2  ;;  %2896 = vmatpush.bf16.msrb.mxu3 %v4368_v33 }
 0x3d0   :  { %v1742_v28 = vadd.f32 %v1741_v22, %v1712_v35 }
 0x3d1   :  { %v2290_v5 = vpop.f32.mrf.mxu0  ;;  %4386 = vmatmul.msk.bf16.gmra.mxu1 %vm1610_vm6, %v6274_v16 }
 0x3d2   :  { %v1995_v32 = vadd.f32 %v6774_v21, %v1742_v28  ;;  %v2320_v34 = vadd.f32 %v2319_v51, %v2290_v5  ;;  %v4602_v21 = vld [vmem:[%s7502_s3 + $0x414] sm:$0xf0] }
 0x3d3   :  { %4068 = vmatmul.msk.bf16.gmra.mxu3 %vm1610_vm6, %v6505_v25  ;;  %v4304_v51 = vor.u32 %v4602_v21, %v4303_v61 }
 0x3d4   :  { %v6879_v11 = vadd.f32 %v2320_v34, %v6786_v1  ;;  %2244 = vmatmul.bf16.gmra.mxu2 %v6543_v39  ;;  %v6883_v8 = vadd.f32 %v6733_v59, %v1995_v32  ;;  %v4359_v59 = vld [vmem:[%s7502_s3 + $0x480] sm:$0xf] }
 0x3d5   :  { %2867 = vmatpush.bf16.msrb.mxu2 %v4304_v51  ;;  %v4360_v35 = vor.u32 %v4616_v29, %v4359_v59 }
 0x3d6   :  { %v1744_v44 = vpop.f32.mrf.mxu3  ;;  %v2324_v63 = vpop.f32.mrf.mxu1 }
 0x3d7   :  { %v1715_v40 = vpop.f32.mrf.mxu2  ;;  %2897 = vmatpush.bf16.msrb.mxu3 %v4360_v35 }
 0x3d8   :  { %v1745_v1 = vadd.f32 %v1744_v44, %v1715_v40  ;;  %v4351_v40 = vld [vmem:[%s7502_s3 + $0x470] sm:$0xf] }
 0x3d9   :  { %v2293_v49 = vpop.f32.mrf.mxu0 }
 0x3da   :  { %v1998_v22 = vadd.f32 %v6803_v24, %v1745_v1  ;;  %v2323_v52 = vadd.f32 %v2322_v20, %v2293_v49  ;;  %v4295_v24 = vld [vmem:[%s7502_s3 + $0x400] sm:$0xf]  ;;  %v4600_v20 = vld [vmem:[%s7502_s3 + $0x404] sm:$0xf0]  ;;  %v4614_v1 = vld [vmem:[%s7502_s3 + $0x474] sm:$0xf0] }
 0x3db   :  { %v4296_v5 = vor.u32 %v4600_v20, %v4295_v24  ;;  %v4352_v49 = vor.u32 %v4614_v1, %v4351_v40 }
 0x3dc   :  { %v6899_v33 = vadd.f32 %v2323_v52, %v6814_v12  ;;  %2936 = vmatmul.bf16.gmra.mxu0 %v6303_v10  ;;  %v6903_v28 = vadd.f32 %v6766_v57, %v1998_v22  ;;  %v1269_v57 = vpop.permute.xlu2 %1268  ;;  %v4598_v52 = vld [vmem:[%s7502_s3 + $0x3f4] sm:$0xf0] }
 0x3dd   :  { %2868 = vmatpush.bf16.msrb.mxu2 %v4296_v5  ;;  %v1330_v59 = vmax.f32 %v5817_v47, %v1269_v57  ;;  %2898 = vmatpush.bf16.msrb.mxu3 %v4352_v49  ;;  %v4343_v47 = vld [vmem:[%s7502_s3 + $0x460] sm:$0xf] }
 0x3de   :  { %v1746_v32 = vpop.f32.mrf.mxu3  ;;  %v2327_v34 = vpop.f32.mrf.mxu1 }
 0x3df   :  { %v1717_v61 = vpop.f32.mrf.mxu2  ;;  %v1360_v24 = vadd.f32 %v5725_v42, %v1330_v59  ;;  %v4279_v42 = vld [vmem:[%s7502_s3 + $0x3e0] sm:$0xf] }
 0x3e0   :  { %v1747_v12 = vadd.f32 %v1746_v32, %v1717_v61 }
 0x3e1   :  { %v2295_v21 = vpop.f32.mrf.mxu0  ;;  %4387 = vmatmul.msk.bf16.gmra.mxu1 %vm1610_vm6, %v6505_v25 }
 0x3e2   :  { %v2000_v51 = vadd.f32 %v6830_v62, %v1747_v12  ;;  %v2325_v44 = vadd.f32 %v2324_v63, %v2295_v21  ;;  %v4287_v63 = vld [vmem:[%s7502_s3 + $0x3f0] sm:$0xf] }
 0x3e3   :  { %4223 = vmatmul.msk.bf16.vlgmr.msra.gmra.mxu3 %vm1610_vm6, %v5851_v37  ;;  %v4288_v37 = vor.u32 %v4598_v52, %v4287_v63 }
 0x3e4   :  { %v6923_v22 = vadd.f32 %v2325_v44, %v6839_v38  ;;  %2551 = vmatmul.bf16.vlgmr.msra.gmra.mxu2 %v5866_v46  ;;  %v6927_v62 = vadd.f32 %v6801_v48, %v2000_v51  ;;  %v1267_v46 = vpop.permute.xlu1 %1266  ;;  %v1674_v51 = vadd.f32 %v6358_v30, %v6369_v23 }
 0x3e5   :  { %2869 = vmatpush.bf16.msrb.mxu2 %v4288_v37  ;;  %v1282_v61 = vsel %vm1270_vm5, %v1267_v46, %v1269_v57 }
 0x3e6   :  { %v1953_v29 = vpop.f32.mrf.mxu3  ;;  %v2329_v38 = vpop.f32.mrf.mxu1  ;;  %v1329_v57 = vmax.f32 %v5808_v45, %v1282_v61 }
 0x3e7   :  { %v1924_v35 = vpop.f32.mrf.mxu2 }
 0x3e8   :  { %v1925_v48 = vadd.f32 %v1924_v35, %v6306_v17  ;;  %v4612_v17 = vld [vmem:[%s7502_s3 + $0x464] sm:$0xf0]  ;;  %v1359_v45 = vadd.f32 %v5728_v3, %v1329_v57  ;;  %v4271_v3 = vld [vmem:[%s7502_s3 + $0x3d0] sm:$0xf] }
 0x3e9   :  { %v2298_v20 = vpop.f32.mrf.mxu0  ;;  %v4344_v21 = vor.u32 %v4612_v17, %v4343_v47  ;;  %v4327_v17 = vld [vmem:[%s7502_s3 + $0x440] sm:$0xf] }
 0x3ea   :  { %v6938_v5 = vadd.f32 %v1953_v29, %v1925_v48  ;;  %v2328_v32 = vadd.f32 %v2327_v34, %v2298_v20  ;;  %v1384_v34 = vmax.f32 %v1360_v24, 0.0 }
 0x3eb   :  { %2899 = vmatpush.bf16.msrb.mxu3 %v4344_v21 }
 0x3ec   :  { %v6942_v12 = vadd.f32 %v2328_v32, %v6859_v54  ;;  %2941 = vmatmul.bf16.gmra.mxu0 %v6543_v39  ;;  %v4596_v54 = vld [vmem:[%s7502_s3 + $0x3e4] sm:$0xf0]  ;;  %v6962_v49 = vpack.c.bf16 %v1384_v34, %v1382_v55  ;;  %v4610_v55 = vld [vmem:[%s7502_s3 + $0x454] sm:$0xf0] }
 0x3ed   :  { %v4280_v1 = vor.u32 %v4596_v54, %v4279_v42  ;;  %v4336_v29 = vor.u32 %v4610_v55, %v4335_v4  ;;  %v4263_v42 = vld [vmem:[%s7502_s3 + $0x3c0] sm:$0xf] }
 0x3ee   :  { %v1955_v44 = vpop.f32.mrf.mxu3  ;;  %v2332_v40 = vpop.f32.mrf.mxu1 }
 0x3ef   :  { %v1926_v63 = vpop.f32.mrf.mxu2  ;;  %2870 = vmatpush.bf16.msrb.mxu2 %v4280_v1  ;;  %2900 = vmatpush.bf16.msrb.mxu3 %v4336_v29 }
 0x3f0   :  { %v1927_v52 = vadd.f32 %v1926_v63, %v1674_v51 }
 0x3f1   :  { %v2300_v59 = vpop.f32.mrf.mxu0  ;;  %4388 = vmatmul.msk.bf16.gmra.mxu1 %vm1610_vm6, %v6962_v49 }
 0x3f2   :  { %v6967_v37 = vadd.f32 %v1955_v44, %v1927_v52  ;;  %v2330_v30 = vadd.f32 %v2329_v38, %v2300_v59 }
 0x3f3   :  { %4224 = vmatmul.msk.bf16.gmra.mxu3 %vm1610_vm6, %v5936_v14  ;;  %v4594_v14 = vld [vmem:[%s7502_s3 + $0x3d4] sm:$0xf0] }
 0x3f4   :  { %v6972_v23 = vadd.f32 %v2330_v30, %v6883_v8  ;;  %2556 = vmatmul.bf16.gmra.mxu2 %v5993_v43  ;;  %v1383_v8 = vmax.f32 %v1359_v45, 0.0  ;;  %v4272_v35 = vor.u32 %v4594_v14, %v4271_v3 }
 0x3f6   :  { %v1958_v38 = vpop.f32.mrf.mxu3  ;;  %v2334_v43 = vpop.f32.mrf.mxu1  ;;  %2871 = vmatpush.bf16.msrb.mxu2 %v4272_v35  ;;  %v6992_v61 = vpack.c.bf16 %v1383_v8, %v1381_v9  ;;  %v4592_v9 = vld [vmem:[%s7502_s3 + $0x3c4] sm:$0xf0] }
 0x3f7   :  { %v1929_v46 = vpop.f32.mrf.mxu2  ;;  %v4264_v54 = vor.u32 %v4592_v9, %v4263_v42 }
 0x3f8   :  { %v1930_v48 = vadd.f32 %v1929_v46, %v6421_v50  ;;  %v4608_v50 = vld [vmem:[%s7502_s3 + $0x444] sm:$0xf0] }
 0x3f9   :  { %v2303_v24 = vpop.f32.mrf.mxu0  ;;  %v4328_v6 = vor.u32 %v4608_v50, %v4327_v17 }
 0x3fa   :  { %v6988_v20 = vadd.f32 %v1958_v38, %v1930_v48  ;;  %v2333_v32 = vadd.f32 %v2332_v40, %v2303_v24  ;;  %2872 = vmatpush.bf16.msrb.mxu2 %v4264_v54 }
 0x3fb   :  { %2901 = vmatpush.bf16.msrb.mxu3 %v4328_v6 }
 0x3fc   :  { %v6995_v47 = vadd.f32 %v2333_v32, %v6903_v28  ;;  %2946 = vmatmul.bf16.gmra.mxu0 %v6992_v61  ;;  %v1679_v28 = vadd.f32 %v6495_v53, %v6498_v60  ;;  %v2318_v53 = vadd.f32 %v6828_v13, %v6854_v7 }
 0x3fe   :  { %v1960_v34 = vpop.f32.mrf.mxu3  ;;  %v2639_v21 = vpop.f32.mrf.mxu1  ;;  %v2338_v4 = vadd.f32 %v2318_v53, %v6750_v36 }
 0x3ff   :  { %v1931_v57 = vpop.f32.mrf.mxu2 }
 0x400   :  { %v1932_v51 = vadd.f32 %v1931_v57, %v1679_v28 }
 0x401   :  { %v2305_v44 = vpop.f32.mrf.mxu0 }
 0x402   :  { %v7012_v40 = vadd.f32 %v1960_v34, %v1932_v51  ;;  %v2335_v1 = vadd.f32 %v2334_v43, %v2305_v44 }
 0x403   :  { %4225 = vmatmul.msk.bf16.gmra.mxu3 %vm1610_vm6, %v6118_v31 }
 0x404   :  { %v7017_v63 = vadd.f32 %v2335_v1, %v6927_v62  ;;  %2561 = vmatmul.bf16.gmra.mxu2 %v6135_v19  ;;  %v1684_v62 = vadd.f32 %v6605_v56, %v6615_v58 }
 0x406   :  { %v1963_v60 = vpop.f32.mrf.mxu3  ;;  %v2641_v52 = vpop.f32.mrf.mxu1 }
 0x407   :  { %v1934_v59 = vpop.f32.mrf.mxu2 }
 0x408   :  { %v1935_v45 = vadd.f32 %v1934_v59, %v6528_v26 }
 0x409   :  { %v2610_v30 = vpop.f32.mrf.mxu0 }
 0x40a   :  { %v7024_v55 = vadd.f32 %v1963_v60, %v1935_v45  ;;  %v2640_v3 = vadd.f32 %v2639_v21, %v2610_v30 }
 0x40c   :  { %v7026_v31 = vadd.f32 %v2640_v3, %v2338_v4 }
 0x40e   :  { %v1965_v19 = vpop.f32.mrf.mxu3  ;;  %v2644_v29 = vpop.f32.mrf.mxu1 }
 0x40f   :  { %v1936_v14 = vpop.f32.mrf.mxu2 }
 0x410   :  { %v1937_v13 = vadd.f32 %v1936_v14, %v1684_v62 }
 0x411   :  { %v2612_v7 = vpop.f32.mrf.mxu0 }
 0x412   :  { %v7030_v8 = vadd.f32 %v1965_v19, %v1937_v13  ;;  %v2642_v38 = vadd.f32 %v2641_v52, %v2612_v7 }
 0x413   :  { %4226 = vmatmul.msk.bf16.gmra.mxu3 %vm1610_vm6, %v6772_v2 }
 0x414   :  { %v7035_v26 = vadd.f32 %v2642_v38, %v6879_v11  ;;  %2566 = vmatmul.bf16.gmra.mxu2 %v6810_v41 }
 0x416   :  { %v1968_v36 = vpop.f32.mrf.mxu3  ;;  %v7038_v43 = vpop.f32.mrf.mxu1 }
 0x417   :  { %v1939_v56 = vpop.f32.mrf.mxu2 }
 0x418   :  { %v1940_v58 = vadd.f32 %v1939_v56, %v6662_v18 }
 0x419   :  { %v2615_v35 = vpop.f32.mrf.mxu0 }
 0x41a   :  { %v7041_v46 = vadd.f32 %v1968_v36, %v1940_v58  ;;  %v2645_v48 = vadd.f32 %v2644_v29, %v2615_v35  ;;  %v7094_v29 = vld [vmem:[%s7504_s4] sm:$0x3]  ;;  %s4632_s4 = smov 108  }
 0x41c   :  { %v7044_v24 = vadd.f32 %v2645_v48, %v6899_v33 }
 0x41e   :  { %v1970_v32 = vpop.f32.mrf.mxu3  ;;  %v2649_v2 = vpop.f32.mrf.mxu1 }
 0x41f   :  { %v1941_v17 = vpop.f32.mrf.mxu2 }
 0x420   :  { %v1942_v11 = vadd.f32 %v1941_v17, %v6705_v27 }
 0x421   :  { %v7047_v50 = vpop.f32.mrf.mxu0 }
 0x422   :  { %v7049_v41 = vadd.f32 %v1970_v32, %v1942_v11 }
 0x423   :  { %4381 = vmatmul.msk.bf16.vlgmr.msrb.gmra.mxu3 %vm1610_vm6, %v6211_v0 }
 0x424   :  { %2873 = vmatmul.bf16.vlgmr.msrb.gmra.mxu2 %v6261_v15 }
 0x426   :  { %v7054_v18 = vpop.f32.mrf.mxu3  ;;  %v2651_v42 = vpop.f32.mrf.mxu1 }
 0x427   :  { %v7056_v6 = vpop.f32.mrf.mxu2 }
 0x429   :  { %v2620_v33 = vpop.f32.mrf.mxu0 }
 0x42a   :  { %v2650_v9 = vadd.f32 %v2649_v2, %v2620_v33 }
 0x42c   :  { %v7059_v28 = vadd.f32 %v2650_v9, %v6942_v12 }
 0x42e   :  { %v7061_v27 = vpop.f32.mrf.mxu3  ;;  %v2654_v34 = vpop.f32.mrf.mxu1 }
 0x42f   :  { %v7063_v21 = vpop.f32.mrf.mxu2 }
 0x431   :  { %v2622_v54 = vpop.f32.mrf.mxu0 }
 0x432   :  { %v2652_v57 = vadd.f32 %v2651_v42, %v2622_v54 }
 0x433   :  { %4382 = vmatmul.msk.bf16.gmra.mxu3 %vm1610_vm6, %v6274_v16 }
 0x434   :  { %v7068_v0 = vadd.f32 %v2652_v57, %v6972_v23  ;;  %2878 = vmatmul.bf16.gmra.mxu2 %v6303_v10 }
 0x436   :  { %v7071_v15 = vpop.f32.mrf.mxu3  ;;  %v7073_v51 = vpop.f32.mrf.mxu1 }
 0x437   :  { %v7075_v12 = vpop.f32.mrf.mxu2 }
 0x439   :  { %v2625_v44 = vpop.f32.mrf.mxu0 }
 0x43a   :  { %v2655_v1 = vadd.f32 %v2654_v34, %v2625_v44 }
 0x43c   :  { %v7078_v53 = vadd.f32 %v2655_v1, %v6995_v47 }
 0x43e   :  { %v2266_v60 = vpop.f32.mrf.mxu3  ;;  %v2961_v52 = vpop.f32.mrf.mxu1 }
 0x43f   :  { %v2237_v59 = vpop.f32.mrf.mxu2 }
 0x440   :  { %v2267_v16 = vadd.f32 %v2266_v60, %v2237_v59 }
 0x441   :  { %v7080_v45 = vpop.f32.mrf.mxu0 }
 0x442   :  { %v7083_v23 = vadd.f32 %v2267_v16, %v7012_v40 }
 0x443   :  { %4383 = vmatmul.msk.bf16.gmra.mxu3 %vm1610_vm6, %v6505_v25 }
 0x444   :  { %2883 = vmatmul.bf16.gmra.mxu2 %v6543_v39  ;;  %v7098_v39 = vperm.slane %v7094_v29, 1 }
 0x446   :  { %v2269_v10 = vpop.f32.mrf.mxu3  ;;  %v2963_v30 = vpop.f32.mrf.mxu1 }
 0x447   :  { %v2240_v4 = vpop.f32.mrf.mxu2 }
 0x448   :  { %v2270_v3 = vadd.f32 %v2269_v10, %v2240_v4 }
 0x449   :  { %v2932_v47 = vpop.f32.mrf.mxu0 }
 0x44a   :  { %v7089_v62 = vadd.f32 %v2270_v3, %v7024_v55  ;;  %v2962_v19 = vadd.f32 %v2961_v52, %v2932_v47 }
 0x44c   :  { %v2982_v25 = vadd.f32 %v2962_v19, %v7026_v31 }
 0x44e   :  { %v2271_v40 = vpop.f32.mrf.mxu3  ;;  %v2966_v13 = vpop.f32.mrf.mxu1  ;;  %v3004_v56 = vadd.f32 %v7098_v39, %v2982_v25 }
 0x44f   :  { %v2242_v14 = vpop.f32.mrf.mxu2 }
 0x450   :  { %v2272_v7 = vadd.f32 %v2271_v40, %v2242_v14  ;;  %v3021_v2 = vsel %vm3020_vm7, %v3004_v56, -inf }
 0x451   :  { %v2934_v38 = vpop.f32.mrf.mxu0 }
 0x452   :  { %v7101_v36 = vadd.f32 %v2272_v7, %v7030_v8  ;;  %v2964_v55 = vadd.f32 %v2963_v30, %v2934_v38  ;;  %v2265_v38 = vadd.f32 %v7071_v15, %v7075_v12  ;;  %v2657_v15 = vadd.f32 %v7073_v51, %v7080_v45 }
 0x453   :  { %4384 = vmatmul.msk.bf16.gmra.mxu3 %vm1610_vm6, %v6962_v49 }
 0x454   :  { %v2984_v58 = vadd.f32 %v2964_v55, %v7035_v26  ;;  %2888 = vmatmul.bf16.gmra.mxu2 %v6992_v61  ;;  %v2647_v61 = vadd.f32 %v7038_v43, %v7047_v50 }
 0x456   :  { %v3006_v31 = vadd.f32 %v7098_v39, %v2984_v58  ;;  %v2274_v35 = vpop.f32.mrf.mxu3  ;;  %v2968_v17 = vpop.f32.mrf.mxu1  ;;  %v2666_v44 = vadd.f32 %v2647_v61, %v6923_v22 }
 0x457   :  { %v2245_v48 = vpop.f32.mrf.mxu2 }
 0x458   :  { %v2275_v32 = vadd.f32 %v2274_v35, %v2245_v48  ;;  %v3022_v8 = vsel %vm3020_vm7, %v3006_v31, -inf  ;;  %v2341_v35 = vadd.f32 %v2265_v38, %v6988_v20 }
 0x459   :  { %v2937_v11 = vpop.f32.mrf.mxu0  ;;  %v7111_v42 = vmax.f32 %v3021_v2, %v3022_v8 }
 0x45a   :  { %v7114_v49 = vadd.f32 %v2275_v32, %v7041_v46  ;;  %v2967_v26 = vadd.f32 %v2966_v13, %v2937_v11  ;;  %v2260_v46 = vadd.f32 %v7054_v18, %v7056_v6 }
 0x45c   :  { %v2986_v34 = vadd.f32 %v2967_v26, %v7044_v24  ;;  %v2337_v24 = vadd.f32 %v2260_v46, %v6938_v5 }
 0x45e   :  { %v2276_v33 = vpop.f32.mrf.mxu3  ;;  %v2971_v52 = vpop.f32.mrf.mxu1  ;;  %v3008_v59 = vadd.f32 %v7098_v39, %v2986_v34 }
 0x45f   :  { %v2247_v9 = vpop.f32.mrf.mxu2 }
 0x460   :  { %v2277_v54 = vadd.f32 %v2276_v33, %v2247_v9  ;;  %v3025_v22 = vsel %vm3020_vm7, %v3008_v59, -inf  ;;  %v2674_v9 = vadd.f32 %v2657_v15, %v7017_v63 }
 0x461   :  { %v2939_v57 = vpop.f32.mrf.mxu0 }
 0x462   :  { %v7121_v1 = vadd.f32 %v2277_v54, %v7049_v41  ;;  %v2969_v60 = vadd.f32 %v2968_v17, %v2939_v57 }
 0x464   :  { %v2988_v16 = vadd.f32 %v2969_v60, %v2666_v44 }
 0x466   :  { %v3010_v43 = vadd.f32 %v7098_v39, %v2988_v16  ;;  %v2581_v50 = vpop.f32.mrf.mxu3  ;;  %v2973_v6 = vpop.f32.mrf.mxu1 }
 0x467   :  { %v2552_v10 = vpop.f32.mrf.mxu2 }
 0x468   :  { %v2582_v30 = vadd.f32 %v2581_v50, %v2552_v10  ;;  %v3026_v41 = vsel %vm3020_vm7, %v3010_v43, -inf }
 0x469   :  { %v2942_v4 = vpop.f32.mrf.mxu0  ;;  %v7130_v3 = vmax.f32 %v3025_v22, %v3026_v41  ;;  %v2262_v41 = vadd.f32 %v7061_v27, %v7063_v21 }
 0x46a   :  { %v2659_v47 = vadd.f32 %v2582_v30, %v2337_v24  ;;  %v2972_v19 = vadd.f32 %v2971_v52, %v2942_v4 }
 0x46b   :  { %3050 = vrot.lane.b32.xlu0 %v7130_v3, %s4632_s4 }
 0x46c   :  { %v2990_v18 = vadd.f32 %v2972_v19, %v7059_v28  ;;  %v2339_v19 = vadd.f32 %v2262_v41, %v6967_v37  ;;  %v4404_v41 = vld [vmem:[%s7505_s5 + $0x108] sm:$0xff] }
 0x46d   :  { %3134 = vmatpush.msra.mxu2 %v4404_v41  ;;  %v3091_v41 = vld [vmem:[%s7505_s5 + $0x10] sm:$0xff] }
 0x46e   :  { %v3012_v40 = vadd.f32 %v7098_v39, %v2990_v18  ;;  %v2583_v5 = vpop.f32.mrf.mxu3  ;;  %v2976_v58 = vpop.f32.mrf.mxu1 }
 0x46f   :  { %v2554_v14 = vpop.f32.mrf.mxu2 }
 0x470   :  { %v3029_v13 = vsel %vm3020_vm7, %v3012_v40, -inf  ;;  %v2584_v4 = vadd.f32 %v2583_v5, %v2554_v14 }
 0x471   :  { %v2944_v25 = vpop.f32.mrf.mxu0 }
 0x472   :  { %v2974_v7 = vadd.f32 %v2973_v6, %v2944_v25  ;;  %v2661_v40 = vadd.f32 %v2584_v4, %v2339_v19  ;;  %v7167_v25 = vperm.slane %v7094_v29, 0  ;;  %v4406_v29 = vld [vmem:[%s7505_s5 + $0x118] sm:$0xf]  ;;  %v4401_v4 = vld [vmem:[%s7505_s5 + $0xf0] sm:$0xff] }
 0x473   :  { %3046 = vrot.lane.b32.xlu0 %v7111_v42, %s4632_s4  ;;  %4407 = vmatpush.msk.msra.mxu3 %vm3130_vm8, %v4406_v29  ;;  %v4393_v29 = vld [vmem:[%s7505_s5 + $0xb0] sm:$0xff] }
 0x474   :  { %v2992_v55 = vadd.f32 %v2974_v7, %v7068_v0 }
 0x476   :  { %v3014_v56 = vadd.f32 %v7098_v39, %v2992_v55  ;;  %v2586_v28 = vpop.f32.mrf.mxu3  ;;  %v2978_v61 = vpop.f32.mrf.mxu1 }
 0x477   :  { %v2557_v31 = vpop.f32.mrf.mxu2 }
 0x478   :  { %v2587_v48 = vadd.f32 %v2586_v28, %v2557_v31  ;;  %v3030_v32 = vsel %vm3020_vm7, %v3014_v56, -inf }
 0x479   :  { %v2947_v2 = vpop.f32.mrf.mxu0  ;;  %v7145_v8 = vmax.f32 %v3029_v13, %v3030_v32 }
 0x47a   :  { %v2663_v17 = vadd.f32 %v2587_v48, %v2341_v35  ;;  %v2977_v11 = vadd.f32 %v2976_v58, %v2947_v2  ;;  %v4405_v35 = vld [vmem:[%s7505_s5 + $0x110] sm:$0xff] }
 0x47b   :  { %3169 = vmatpush.msra.mxu3 %v4405_v35  ;;  %v4422_v35 = vld [vmem:[%s7505_s5 + $0x178] sm:$0xff] }
 0x47c   :  { %v2994_v26 = vadd.f32 %v2977_v11, %v7078_v53 }
 0x47e   :  { %v2588_v12 = vpop.f32.mrf.mxu3  ;;  %v3016_v34 = vadd.f32 %v7098_v39, %v2994_v26 }
 0x47f   :  { %v2559_v0 = vpop.f32.mrf.mxu2 }
 0x480   :  { %v3033_v46 = vsel %vm3020_vm7, %v3016_v34, -inf  ;;  %v2589_v37 = vadd.f32 %v2588_v12, %v2559_v0 }
 0x481   :  { %v2949_v33 = vpop.f32.mrf.mxu0 }
 0x482   :  { %v2979_v20 = vadd.f32 %v2978_v61, %v2949_v33  ;;  %v2665_v14 = vadd.f32 %v2589_v37, %v7083_v23  ;;  %v3106_v23 = vld [vmem:[%s7505_s5 + $0x88] sm:$0xf]  ;;  %v4425_v37 = vld [vmem:[%s7505_s5 + $0x190] sm:$0xff] }
 0x483   :  { %4409 = vmatpush.msk.msrb.mxu3 %vm3130_vm8, %v3106_v23  ;;  %v3102_v23 = vld [vmem:[%s7505_s5 + $0x68] sm:$0xff] }
 0x484   :  { %v2996_v54 = vadd.f32 %v2979_v20, %v2674_v9 }
 0x486   :  { %v3018_v57 = vadd.f32 %v7098_v39, %v2996_v54  ;;  %v2591_v44 = vpop.f32.mrf.mxu3 }
 0x487   :  { %v2562_v60 = vpop.f32.mrf.mxu2 }
 0x488   :  { %v2592_v52 = vadd.f32 %v2591_v44, %v2562_v60  ;;  %v3034_v51 = vsel %vm3020_vm7, %v3018_v57, -inf }
 0x489   :  { %v7155_v45 = vmax.f32 %v3033_v46, %v3034_v51 }
 0x48a   :  { %v2667_v53 = vadd.f32 %v2592_v52, %v7089_v62 }
 0x48b   :  { %3058 = vrot.lane.b32.xlu0 %v7155_v45, %s4632_s4 }
 0x48e   :  { %v2593_v63 = vpop.f32.mrf.mxu3 }
 0x48f   :  { %v2564_v59 = vpop.f32.mrf.mxu2 }
 0x490   :  { %v2594_v0 = vadd.f32 %v2593_v63, %v2564_v59 }
 0x492   :  { %v2669_v9 = vadd.f32 %v2594_v0, %v7101_v36  ;;  %v3100_v0 = vld [vmem:[%s7505_s5 + $0x58] sm:$0xff] }
 0x496   :  { %v2596_v16 = vpop.f32.mrf.mxu3 }
 0x497   :  { %v2567_v43 = vpop.f32.mrf.mxu2 }
 0x498   :  { %v2597_v50 = vadd.f32 %v2596_v16, %v2567_v43 }
 0x49a   :  { %v7161_v39 = vadd.f32 %v2597_v50, %v7114_v49 }
 0x49e   :  { %v2598_v10 = vpop.f32.mrf.mxu3 }
 0x49f   :  { %v2569_v24 = vpop.f32.mrf.mxu2 }
 0x4a0   :  { %v2599_v51 = vadd.f32 %v2598_v10, %v2569_v24  ;;  %v4403_v10 = vld [vmem:[%s7505_s5 + $0x100] sm:$0xff] }
 0x4a1   :  { %3135 = vmatpush.msra.mxu2 %v4403_v10  ;;  %v4413_v10 = vld [vmem:[%s7505_s5 + $0x130] sm:$0xff] }
 0x4a2   :  { %v2673_v43 = vadd.f32 %v2599_v51, %v7121_v1  ;;  %v4402_v1 = vld [vmem:[%s7505_s5 + $0xf8] sm:$0xff]  ;;  %v4417_v51 = vld [vmem:[%s7505_s5 + $0x150] sm:$0xff] }
 0x4a3   :  { %3136 = vmatpush.msra.mxu2 %v4402_v1  ;;  %v4412_v1 = vld [vmem:[%s7505_s5 + $0x128] sm:$0xff] }
 0x4a5   :  { %3137 = vmatpush.msra.mxu2 %v4401_v4  ;;  %v4411_v4 = vld [vmem:[%s7505_s5 + $0x120] sm:$0xff] }
 0x4a6   :  { %v2903_v30 = vpop.f32.mrf.mxu3 }
 0x4a7   :  { %v2874_v22 = vpop.f32.mrf.mxu2 }
 0x4a8   :  { %v2904_v62 = vadd.f32 %v2903_v30, %v2874_v22 }
 0x4aa   :  { %v2981_v13 = vadd.f32 %v2904_v62, %v2659_v47 }
 0x4ac   :  { %v3003_v38 = vadd.f32 %v7167_v25, %v2981_v13  ;;  %v4399_v13 = vld [vmem:[%s7505_s5 + $0xe0] sm:$0xff] }
 0x4ae   :  { %v2905_v18 = vpop.f32.mrf.mxu3 }
 0x4af   :  { %v2876_v6 = vpop.f32.mrf.mxu2 }
 0x4b0   :  { %v2906_v49 = vadd.f32 %v2905_v18, %v2876_v6  ;;  %v4400_v6 = vld [vmem:[%s7505_s5 + $0xe8] sm:$0xff] }
 0x4b1   :  { %3138 = vmatpush.msra.mxu2 %v4400_v6  ;;  %v4435_v6 = vld [vmem:[%s7505_s5 + $0x1d0] sm:$0xff] }
 0x4b2   :  { %v2983_v7 = vadd.f32 %v2906_v49, %v2661_v40  ;;  %v4396_v49 = vld [vmem:[%s7505_s5 + $0xc8] sm:$0xff] }
 0x4b3   :  { %3139 = vmatpush.msra.mxu2 %v4399_v13  ;;  %v4433_v13 = vld [vmem:[%s7505_s5 + $0x1c0] sm:$0xff] }
 0x4b4   :  { %v3005_v55 = vadd.f32 %v7167_v25, %v2983_v7  ;;  %v4446_v7 = vld [vmem:[%s7505_s5 + $0x228] sm:$0xff] }
 0x4b5   :  { %3311 = vmatpush.msrb.mxu0 %v4446_v7 }
 0x4b6   :  { %v2908_v56 = vpop.f32.mrf.mxu3  ;;  %v7171_v28 = vmax.f32 %v3003_v38, %v3005_v55  ;;  %v4445_v38 = vld [vmem:[%s7505_s5 + $0x220] sm:$0xff] }
 0x4b7   :  { %v2879_v27 = vpop.f32.mrf.mxu2  ;;  %v4395_v55 = vld [vmem:[%s7505_s5 + $0xc0] sm:$0xff]  ;;  %3312 = vmatpush.msrb.mxu0 %v4445_v38 }
 0x4b8   :  { %3044 = vrot.lane.b32.xlu2 %v7171_v28, %s4632_s4  ;;  %v2909_v21 = vadd.f32 %v2908_v56, %v2879_v27  ;;  %v4444_v56 = vld [vmem:[%s7505_s5 + $0x218] sm:$0xff] }
 0x4b9   :  { %v4426_v27 = vld [vmem:[%s7505_s5 + $0x198] sm:$0xff]  ;;  %3313 = vmatpush.msrb.mxu0 %v4444_v56  ;;  %v4428_v56 = vld [vmem:[%s7505_s5 + $0x1a8] sm:$0xf] }
 0x4ba   :  { %v2985_v58 = vadd.f32 %v2909_v21, %v2663_v17  ;;  %v3105_v17 = vld [vmem:[%s7505_s5 + $0x80] sm:$0xff]  ;;  %v4394_v21 = vld [vmem:[%s7505_s5 + $0xb8] sm:$0xff] }
 0x4bb   :  { %3215 = vmatpush.msrb.mxu3 %v3105_v17  ;;  %v3101_v17 = vld [vmem:[%s7505_s5 + $0x60] sm:$0xff] }
 0x4bc   :  { %v3007_v32 = vadd.f32 %v7167_v25, %v2985_v58  ;;  %v4423_v58 = vld [vmem:[%s7505_s5 + $0x180] sm:$0xff] }
 0x4be   :  { %v2910_v5 = vpop.f32.mrf.mxu3 }
 0x4bf   :  { %v2881_v47 = vpop.f32.mrf.mxu2 }
 0x4c0   :  { %v2911_v31 = vadd.f32 %v2910_v5, %v2881_v47  ;;  %v4443_v5 = vld [vmem:[%s7505_s5 + $0x210] sm:$0xff]  ;;  %v4424_v47 = vld [vmem:[%s7505_s5 + $0x188] sm:$0xff] }
 0x4c1   :  { %3314 = vmatpush.msrb.mxu0 %v4443_v5 }
 0x4c2   :  { %v2987_v48 = vadd.f32 %v2911_v31, %v2665_v14  ;;  %v4442_v14 = vld [vmem:[%s7505_s5 + $0x208] sm:$0xff] }
 0x4c3   :  { %v4392_v31 = vld [vmem:[%s7505_s5 + $0xa8] sm:$0xff]  ;;  %3315 = vmatpush.msrb.mxu0 %v4442_v14 }
 0x4c4   :  { %v3009_v2 = vadd.f32 %v7167_v25, %v2987_v48  ;;  %v4391_v48 = vld [vmem:[%s7505_s5 + $0xa0] sm:$0xff] }
 0x4c6   :  { %v2913_v11 = vpop.f32.mrf.mxu3  ;;  %v7185_v15 = vmax.f32 %v3007_v32, %v3009_v2  ;;  %v4390_v32 = vld [vmem:[%s7505_s5 + $0x98] sm:$0xff]  ;;  %v4389_v2 = vld [vmem:[%s7505_s5 + $0x90] sm:$0xff] }
 0x4c7   :  { %v2884_v12 = vpop.f32.mrf.mxu2 }
 0x4c8   :  { %3048 = vrot.lane.b32.xlu1 %v7185_v15, %s4632_s4  ;;  %v2914_v26 = vadd.f32 %v2913_v11, %v2884_v12  ;;  %v3104_v11 = vld [vmem:[%s7505_s5 + $0x78] sm:$0xff]  ;;  %v3103_v12 = vld [vmem:[%s7505_s5 + $0x70] sm:$0xff] }
 0x4ca   :  { %v2989_v20 = vadd.f32 %v2914_v26, %v2667_v53  ;;  %v3099_v26 = vld [vmem:[%s7505_s5 + $0x50] sm:$0xff] }
 0x4cc   :  { %v3011_v57 = vadd.f32 %v7167_v25, %v2989_v20  ;;  %v4420_v20 = vld [vmem:[%s7505_s5 + $0x168] sm:$0xff] }
 0x4ce   :  { %v2915_v61 = vpop.f32.mrf.mxu3 }
 0x4cf   :  { %v2886_v33 = vpop.f32.mrf.mxu2 }
 0x4d0   :  { %v2916_v34 = vadd.f32 %v2915_v61, %v2886_v33  ;;  %3054 = vrot.lane.b32.xlu1 %v7145_v8, %s4632_s4  ;;  %v4421_v61 = vld [vmem:[%s7505_s5 + $0x170] sm:$0xff]  ;;  %v4441_v33 = vld [vmem:[%s7505_s5 + $0x200] sm:$0xff] }
 0x4d1   :  { %3316 = vmatpush.msrb.mxu0 %v4441_v33 }
 0x4d2   :  { %v2991_v54 = vadd.f32 %v2916_v34, %v2669_v9  ;;  %v3098_v9 = vld [vmem:[%s7505_s5 + $0x48] sm:$0xff]  ;;  %v4419_v34 = vld [vmem:[%s7505_s5 + $0x160] sm:$0xff] }
 0x4d4   :  { %v3013_v44 = vadd.f32 %v7167_v25, %v2991_v54  ;;  %v4440_v54 = vld [vmem:[%s7505_s5 + $0x1f8] sm:$0xff] }
 0x4d5   :  { %3317 = vmatpush.msrb.mxu0 %v4440_v54  ;;  %v3363_v54 = vld [vmem:[%s7506_s7 + $0x28] sm:$0xff] }
 0x4d6   :  { %v2918_v60 = vpop.f32.mrf.mxu3  ;;  %v7201_v52 = vmax.f32 %v3011_v57, %v3013_v44  ;;  %v3097_v57 = vld [vmem:[%s7505_s5 + $0x40] sm:$0xff]  ;;  %v4418_v44 = vld [vmem:[%s7505_s5 + $0x158] sm:$0xff] }
 0x4d7   :  { %v2889_v46 = vpop.f32.mrf.mxu2 }
 0x4d8   :  { %3052 = vrot.lane.b32.xlu2 %v7201_v52, %s4632_s4  ;;  %v2919_v63 = vadd.f32 %v2918_v60, %v2889_v46  ;;  %v3096_v60 = vld [vmem:[%s7505_s5 + $0x38] sm:$0xff]  ;;  %v3095_v46 = vld [vmem:[%s7505_s5 + $0x30] sm:$0xff] }
 0x4da   :  { %v2993_v50 = vadd.f32 %v2919_v63, %v7161_v39  ;;  %v3094_v63 = vld [vmem:[%s7505_s5 + $0x28] sm:$0xff] }
 0x4dd   :  { %v7205_v36 = vpop.permute.xlu0 %3050 }
 0x4de   :  { %v3076_v53 = vmax.f32 %v7130_v3, %v7205_v36  ;;  %v2920_v59 = vpop.f32.mrf.mxu3  ;;  %v3015_v3 = vadd.f32 %v7167_v25, %v2993_v50  ;;  %v4438_v50 = vld [vmem:[%s7505_s5 + $0x1e8] sm:$0xff] }
 0x4df   :  { %v2891_v16 = vpop.f32.mrf.mxu2 }
 0x4e0   :  { %v3084_v30 = vmax.f32 %v3076_v53, 0.0  ;;  %v2921_v22 = vadd.f32 %v2920_v59, %v2891_v16  ;;  %v4416_v53 = vld [vmem:[%s7505_s5 + $0x148] sm:$0xff]  ;;  %v4439_v59 = vld [vmem:[%s7505_s5 + $0x1f0] sm:$0xff]  ;;  %v3093_v16 = vld [vmem:[%s7505_s5 + $0x20] sm:$0xff] }
 0x4e1   :  { %3318 = vmatpush.msrb.mxu0 %v4439_v59 }
 0x4e2   :  { %v2995_v24 = vadd.f32 %v2921_v22, %v2673_v43  ;;  %4408 = vmatmul.msk.f32.vlgmr.msra.gmra.mxu3 %vm3126_vm9, %v3084_v30  ;;  %v4415_v43 = vld [vmem:[%s7505_s5 + $0x140] sm:$0xff]  ;;  %v3092_v30 = vld [vmem:[%s7505_s5 + $0x18] sm:$0xff] }
 0x4e3   :  { %3245 = vmatpush.msra.mxu3 %v4426_v27  ;;  %v4414_v22 = vld [vmem:[%s7505_s5 + $0x138] sm:$0xff]  ;;  %3319 = vmatpush.msrb.mxu0 %v4438_v50  ;;  %v4431_v27 = vld [vmem:[%s7505_s5 + $0x1b0] sm:$0xff] }
 0x4e4   :  { %v3017_v39 = vadd.f32 %v7167_v25, %v2995_v24  ;;  %v4397_v25 = vld [vmem:[%s7505_s5 + $0xd0] sm:$0xff]  ;;  %v3090_v24 = vld [vmem:[%s7505_s5 + $0x8] sm:$0xff] }
 0x4e5   :  { %v7226_v62 = vpop.permute.xlu0 %3046  ;;  %3246 = vmatpush.msra.mxu3 %v4425_v37 }
 0x4e6   :  { %v3074_v19 = vmax.f32 %v7111_v42, %v7226_v62  ;;  %v7230_v18 = vmax.f32 %v3015_v3, %v3017_v39  ;;  %v4398_v42 = vld [vmem:[%s7505_s5 + $0xd8] sm:$0xff]  ;;  %v4437_v3 = vld [vmem:[%s7505_s5 + $0x1e0] sm:$0xff] }
 0x4e7   :  { %3140 = vmatpush.msra.mxu2 %v4398_v42  ;;  %3247 = vmatpush.msra.mxu3 %v4424_v47  ;;  %v3089_v39 = vld [vmem:[%s7505_s5] sm:$0xff]  ;;  %v4432_v42 = vld [vmem:[%s7505_s5 + $0x1b8] sm:$0xff] }
 0x4e8   :  { %v3082_v40 = vmax.f32 %v3074_v19, 0.0  ;;  %3056 = vrot.lane.b32.xlu1 %v7230_v18, %s4632_s4  ;;  %3320 = vmatpush.msrb.mxu0 %v4437_v3  ;;  %v4436_v19 = vld [vmem:[%s7505_s5 + $0x1d8] sm:$0xff] }
 0x4e9   :  { %3141 = vmatpush.msra.mxu2 %v4397_v25  ;;  %3248 = vmatpush.msra.mxu3 %v4423_v58 }
 0x4ea   :  { %4410 = vmatmul.msk.f32.vlgmr.msrb.gmra.mxu3 %vm3126_vm9, %v3082_v40  ;;  %3321 = vmatpush.msrb.mxu0 %v4436_v19  ;;  %v4434_v40 = vld [vmem:[%s7505_s5 + $0x1c8] sm:$0xff] }
 0x4eb   :  { %3142 = vmatpush.msra.mxu2 %v4396_v49  ;;  %3249 = vmatpush.msra.mxu3 %v4422_v35  ;;  %v3372_v35 = vld [vmem:[%s7506_s7 + $0x70] sm:$0xff] }
 0x4ec   :  { %3322 = vmatpush.msrb.mxu0 %v4435_v6 }
 0x4ed   :  { %3143 = vmatpush.msra.mxu2 %v4395_v55  ;;  %3250 = vmatpush.msra.mxu3 %v4421_v61 }
 0x4ee   :  { %3323 = vmatpush.msrb.mxu0 %v4434_v40  ;;  %v4625_v40 = vld [vmem:[%s7508_s8] ss:$0 sm:$0xff] }
 0x4ef   :  { %3144 = vmatpush.msra.mxu2 %v4394_v21  ;;  %3251 = vmatpush.msra.mxu3 %v4420_v20  ;;  %v3365_v20 = vld [vmem:[%s7506_s7 + $0x38] sm:$0xff] }
 0x4f0   :  { %3324 = vmatpush.msrb.mxu0 %v4433_v13 }
 0x4f1   :  { %3145 = vmatpush.msra.mxu2 %v4393_v29  ;;  %3252 = vmatpush.msra.mxu3 %v4419_v34  ;;  %v3364_v34 = vld [vmem:[%s7506_s7 + $0x30] sm:$0xff] }
 0x4f2   :  { %3325 = vmatpush.msrb.mxu0 %v4432_v42 }
 0x4f3   :  { %3146 = vmatpush.msra.mxu2 %v4392_v31  ;;  %3253 = vmatpush.msra.mxu3 %v4418_v44  ;;  %v4447_v31 = vld [vmem:[%s7505_s5 + $0x230] sm:$0xff] }
 0x4f4   :  { %3326 = vmatpush.msrb.mxu0 %v4431_v27  ;;  %v3360_v44 = vld [vmem:[%s7506_s7 + $0x10] sm:$0xff] }
 0x4f5   :  { %3147 = vmatpush.msra.mxu2 %v4391_v48  ;;  %3254 = vmatpush.msra.mxu3 %v4417_v51  ;;  %v3358_v51 = vld [vmem:[%s7506_s7] sm:$0xff] }
 0x4f7   :  { %3148 = vmatpush.msra.mxu2 %v4390_v32  ;;  %3255 = vmatpush.msra.mxu3 %v4416_v53 }
 0x4f9   :  { %3149 = vmatpush.msra.mxu2 %v4389_v2  ;;  %3256 = vmatpush.msra.mxu3 %v4415_v43  ;;  %v3371_v2 = vld [vmem:[%s7506_s7 + $0x68] sm:$0xff] }
 0x4fb   :  { %3180 = vmatpush.msrb.mxu2 %v3104_v11  ;;  %3257 = vmatpush.msra.mxu3 %v4414_v22 }
 0x4fd   :  { %3181 = vmatpush.msrb.mxu2 %v3103_v12  ;;  %3258 = vmatpush.msra.mxu3 %v4413_v10  ;;  %v3059_v32 = vpop.permute.xlu0 %3058  ;;  %v3369_v12 = vld [vmem:[%s7506_s7 + $0x58] sm:$0xff] }
 0x4fe   :  { %v3080_v11 = vmax.f32 %v7155_v45, %v3059_v32  ;;  %v3366_v45 = vld [vmem:[%s7506_s7 + $0x40] sm:$0xff] }
 0x4ff   :  { %3182 = vmatpush.msrb.mxu2 %v3102_v23  ;;  %3259 = vmatpush.msra.mxu3 %v4412_v1  ;;  %v3368_v23 = vld [vmem:[%s7506_s7 + $0x50] sm:$0xff] }
 0x501   :  { %3183 = vmatpush.msrb.mxu2 %v3101_v17  ;;  %3260 = vmatpush.msra.mxu3 %v4411_v4  ;;  %v3088_v17 = vmax.f32 %v3080_v11, 0.0 }
 0x503   :  { %3184 = vmatpush.msrb.mxu2 %v3100_v0  ;;  %v3367_v0 = vld [vmem:[%s7506_s7 + $0x48] sm:$0xff] }
 0x505   :  { %3185 = vmatpush.msrb.mxu2 %v3099_v26 }
 0x507   :  { %3186 = vmatpush.msrb.mxu2 %v3098_v9 }
 0x509   :  { %3187 = vmatpush.msrb.mxu2 %v3097_v57  ;;  %v3361_v57 = vld [vmem:[%s7506_s7 + $0x18] sm:$0xff] }
 0x50b   :  { %3188 = vmatpush.msrb.mxu2 %v3096_v60 }
 0x50d   :  { %3189 = vmatpush.msrb.mxu2 %v3095_v46  ;;  %v3359_v46 = vld [vmem:[%s7506_s7 + $0x8] sm:$0xff] }
 0x50f   :  { %3190 = vmatpush.msrb.mxu2 %v3094_v63 }
 0x511   :  { %3191 = vmatpush.msrb.mxu2 %v3093_v16 }
 0x512   :  { %v3045_v25 = vpop.permute.xlu2 %3044 }
 0x513   :  { %3192 = vmatpush.msrb.mxu2 %v3092_v30  ;;  %v3061_v37 = vsel %vm3060_vm10, %v3045_v25, %v7226_v62  ;;  %v4448_v62 = vld [vmem:[%s7505_s5 + $0x238] sm:$0xf] }
 0x515   :  { %3193 = vmatpush.msrb.mxu2 %v3091_v41 }
 0x517   :  { %3194 = vmatpush.msrb.mxu2 %v3090_v24 }
 0x519   :  { %3195 = vmatpush.msrb.mxu2 %v3089_v39  ;;  %v4624_v39 = vld [vmem:[%s7507_s6] ss:$0 sm:$0xff] }
 0x532   :  { %v3053_v21 = vpop.permute.xlu2 %3052 }
 0x53a   :  { %v3049_v49 = vpop.permute.xlu1 %3048 }
 0x53b   :  { %v3062_v7 = vsel %vm3060_vm10, %v3049_v49, %v7205_v36  ;;  %v4427_v36 = vld [vmem:[%s7505_s5 + $0x1a0] sm:$0xff] }
 0x53c   :  { %v3075_v38 = vmax.f32 %v7185_v15, %v3062_v7  ;;  %v3073_v15 = vmax.f32 %v7171_v28, %v3061_v37 }
 0x53e   :  { %v3083_v55 = vmax.f32 %v3075_v38, 0.0  ;;  %v3081_v14 = vmax.f32 %v3073_v15, 0.0 }
 0x540   :  { %3150 = vmatmul.f32.vlgmr.msra.gmra.mxu2 %v3083_v55 }
 0x541   :  { %4429 = vmatpush.msk.msra.mxu2 %vm3130_vm8, %v4428_v56 }
 0x542   :  { %v3055_v5 = vpop.permute.xlu1 %3054 }
 0x543   :  { %v3063_v47 = vsel %vm3060_vm10, %v3053_v21, %v3055_v5  ;;  %3280 = vmatpush.msra.mxu2 %v4427_v36  ;;  %v3078_v28 = vmax.f32 %v7145_v8, %v3055_v5  ;;  %v3370_v8 = vld [vmem:[%s7506_s7 + $0x60] sm:$0xff] }
 0x544   :  { %v3077_v29 = vmax.f32 %v7201_v52, %v3063_v47  ;;  %v3373_v52 = vld [vmem:[%s7506_s7 + $0x78] sm:$0xff] }
 0x545   :  { %v3086_v48 = vmax.f32 %v3078_v28, 0.0  ;;  %3378 = vmatpush.msrb.mxu1 %v3373_v52 }
 0x546   :  { %v3085_v58 = vmax.f32 %v3077_v29, 0.0 }
 0x547   :  { %3379 = vmatpush.msrb.mxu1 %v3372_v35 }
 0x548   :  { %3196 = vmatmul.f32.vlgmr.msrb.gmra.mxu2 %v3081_v14  ;;  %3261 = vmatmul.f32.vlgmr.msra.gmra.mxu3 %v3085_v58 }
 0x549   :  { %4449 = vmatpush.msk.msrb.mxu2 %vm3130_vm8, %v4448_v62  ;;  %3380 = vmatpush.msrb.mxu1 %v3371_v2 }
 0x54b   :  { %3346 = vmatpush.msrb.mxu2 %v4447_v31  ;;  %3381 = vmatpush.msrb.mxu1 %v3370_v8 }
 0x54d   :  { %3382 = vmatpush.msrb.mxu1 %v3369_v12 }
 0x54f   :  { %3383 = vmatpush.msrb.mxu1 %v3368_v23 }
 0x550   :  { %4430 = vmatmul.msk.f32.vlgmr.msra.gmra.mxu2 %vm3126_vm9, %v3086_v48 }
 0x551   :  { %3384 = vmatpush.msrb.mxu1 %v3367_v0 }
 0x553   :  { %3385 = vmatpush.msrb.mxu1 %v3366_v45 }
 0x555   :  { %3386 = vmatpush.msrb.mxu1 %v3365_v20 }
 0x557   :  { %3387 = vmatpush.msrb.mxu1 %v3364_v34 }
 0x558   :  { %4450 = vmatmul.msk.f32.vlgmr.msrb.gmra.mxu2 %vm3126_vm9, %v3088_v17 }
 0x559   :  { %3388 = vmatpush.msrb.mxu1 %v3363_v54 }
 0x55a   :  { %v3057_v26 = vpop.permute.xlu1 %3056 }
 0x55b   :  { %v3064_v61 = vsel %vm3060_vm10, %v3057_v26, %v3059_v32 }
 0x55c   :  { %v3079_v33 = vmax.f32 %v7230_v18, %v3064_v61  ;;  %v3362_v18 = vld [vmem:[%s7506_s7 + $0x20] sm:$0xff] }
 0x55d   :  { %3389 = vmatpush.msrb.mxu1 %v3362_v18 }
 0x55e   :  { %v3087_v9 = vmax.f32 %v3079_v33, 0.0 }
 0x55f   :  { %3390 = vmatpush.msrb.mxu1 %v3361_v57 }
 0x560   :  { %3327 = vmatmul.f32.vlgmr.msrb.gmra.mxu0 %v3087_v9 }
 0x561   :  { %3391 = vmatpush.msrb.mxu1 %v3360_v44 }
 0x563   :  { %3392 = vmatpush.msrb.mxu1 %v3359_v46 }
 0x565   :  { %3393 = vmatpush.msrb.mxu1 %v3358_v51  ;;  %v3171_v63 = vpop.f32.mrf.mxu3 }
 0x56d   :  { %v3217_v59 = vpop.f32.mrf.mxu3 }
 0x5c3   :  { %v3151_v60 = vpop.f32.mrf.mxu2 }
 0x5c4   :  { %v3172_v43 = vadd.f32 %v3171_v63, %v3151_v60 }
 0x5cb   :  { %v3197_v53 = vpop.f32.mrf.mxu2  ;;  %v3262_v30 = vpop.f32.mrf.mxu3 }
 0x5cc   :  { %v3198_v50 = vadd.f32 %v3197_v53, %v3172_v43 }
 0x5ce   :  { %v3218_v41 = vadd.f32 %v3217_v59, %v3198_v50 }
 0x5d3   :  { %v3282_v16 = vpop.f32.mrf.mxu2 }
 0x5d4   :  { %v3283_v22 = vadd.f32 %v3282_v16, %v3262_v30 }
 0x5d6   :  { %v3285_v1 = vadd.f32 %v3283_v22, %v3218_v41 }
 0x5db   :  { %v3348_v10 = vpop.f32.mrf.mxu2 }
 0x5dd   :  { %v3328_v24 = vpop.f32.mrf.mxu0 }
 0x5de   :  { %v3349_v3 = vadd.f32 %v3348_v10, %v3328_v24 }
 0x5e0   :  { %v3351_v4 = vadd.f32 %v3349_v3, %v3285_v1 }
 0x5e2   :  { %v3356_v19 = vadd.f32 %v4624_v39, %v3351_v4 }
 0x5e4   :  { %v3357_v6 = vmax.f32 %v3356_v19, 0.0 }
 0x5e6   :  { %3394 = vmatmul.f32.vlgmr.msrb.gmra.mxu1 %v3357_v6 }
 0x663   :  { %v3395_v13 = vpop.f32.mrf.mxu1 }
 0x664   :  { %v3396_v42 = vadd.f32 %v4625_v40, %v3395_v13 }
 0x666   :  { %3398 = vmax.xlane.f32.xlu2 %v3396_v42 }
 0x6d9   :  { %v3399_v25 = vpop.xlane.xlu2 %3398 }
 0x6da   :  { %v3400_v49 = vsub.f32 %v3396_v42, %v3399_v25 }
 0x6dc   :  { %v3401_v7 = vmul.f32 1.442695, %v3400_v49 }
 0x6de   :  { %4626 = vpow2.f32 %v3401_v7 }
 0x6e4   :  { %v4627_v38 = vpop.eup %4626 }
 0x6e5   :  { %3403 = vadd.xlane.f32.xlu0 %v4627_v38 }
 0x758   :  { %v3404_v55 = vpop.xlane.xlu0 %3403 }
 0x759   :  { %4628 = vlog2.f32 %v3404_v55 }
 0x75f   :  { %v4629_v56 = vpop.eup %4628 }
 0x760   :  { %v3406_v27 = vmul.f32 0.6931472, %v4629_v56 }
 0x762   :  { %v3407_v37 = vsub.f32 %v3400_v49, %v3406_v27 }
 0x764   :  { %3408 = vst [vmem:[%s7509_s9] sm:$0xff] %v3407_v37 }

</bundles_post_ra>
